<compile_context>
chip_gen: v5e
topology: v5e:2x2
jax: 0.10.0
libtpu: 0.0.40
codegen_flags: <defaults>
</compile_context>

<pallas_src>
import jax
import jax.numpy as jnp
from jax import lax
from jax.experimental import pallas as pl
from jax.experimental.pallas import tpu as pltpu


def glove_kernel(i_ids_ref, j_ids_ref, uiT_ref, ujT_ref, out_ref):
    """Single-step kernel: gathers + dot + (fused) bias for the whole batch.

    i_ids_ref, j_ids_ref : (1, B_pad) int32  — clamped token ids, lane-dense
    uiT_ref, ujT_ref     : (Daug, V) float32 — bias-augmented, pre-transposed tables
    out_ref              : (1, B_pad) float32 — scores, lane-dense
    """
    V = uiT_ref.shape[1]
    B_pad = out_ref.shape[1]

    # One-hot selection matrices, built lane-dense: onehot[v, b] = (ids[b] == v).
    iota_v = lax.broadcasted_iota(jnp.int32, (V, B_pad), 0)          # (V, B_pad)
    onehot_i = (iota_v == i_ids_ref[...]).astype(jnp.float32)        # (V, B_pad)
    onehot_j = (iota_v == j_ids_ref[...]).astype(jnp.float32)        # (V, B_pad)

    # Embedding gather on the MXU: (Daug, V) @ (V, B_pad) -> (Daug, B_pad).
    # HIGHEST precision so the f32 table values pass through the one-hot matmul exactly.
    ei = jnp.dot(uiT_ref[...], onehot_i,
                 preferred_element_type=jnp.float32,
                 precision=lax.Precision.HIGHEST)                    # (Daug, B_pad)
    ej = jnp.dot(ujT_ref[...], onehot_j,
                 preferred_element_type=jnp.float32,
                 precision=lax.Precision.HIGHEST)                    # (Daug, B_pad)

    # Elementwise product + sublane reduction -> lane-dense (1, B_pad) scores.
    # The bias terms are already folded into the augmented feature rows.
    out_ref[...] = jnp.sum(ei * ej, axis=0, keepdims=True)


def prepare_glove_params(ui, uj, bi, bj):
    """One-time layout prep at model-load time (hoisted out of the per-call path).

    Returns the two bias-augmented, zero-padded, transposed tables of shape
    (Daug_pad, V):  rows [0, D) = embeddings, row D = bias / ones, row D+1 = ones / bias,
    remaining rows = zero padding up to a multiple of 8 sublanes.
    """
    V, D = ui.shape
    ones = jnp.ones((V, 1), jnp.float32)
    ui_aug = jnp.concatenate(
        [ui.astype(jnp.float32), bi.reshape(V, 1).astype(jnp.float32), ones], axis=1)
    uj_aug = jnp.concatenate(
        [uj.astype(jnp.float32), ones, bj.reshape(V, 1).astype(jnp.float32)], axis=1)
    daug = D + 2
    daug_pad = ((daug + 7) // 8) * 8
    pad = daug_pad - daug
    ui_aug = jnp.pad(ui_aug, ((0, 0), (0, pad)))
    uj_aug = jnp.pad(uj_aug, ((0, 0), (0, pad)))
    # Pre-transpose so gathered tiles come out feature-major and the final
    # reduction is a sublane reduce producing a lane-dense score row.
    return ui_aug.T, uj_aug.T                      # each (Daug_pad, V) float32


@jax.jit
def glove_forward(i_vecs, j_vecs, uiT, ujT):
    """Returns sum(ui[i]*uj[j], axis=1) + bi[i] + bj[j], shape (B,) float32."""
    daug, V = uiT.shape
    B = i_vecs.shape[0]
    B_pad = max(128, ((B + 127) // 128) * 128)     # lane-dense output width

    # Resident-table fast path: both tables must fit comfortably in VMEM on every
    # generation (v7x has only 64 MiB physical). Larger vocabs need a streaming path.
    assert 2 * uiT.size * 4 <= 8 * 1024 * 1024, (
        "embedding tables too large for the VMEM-resident path")

    # Safety clamp (review concern): out-of-range ids must not drive OOB reads.
    i_ids = jnp.clip(i_vecs.astype(jnp.int32), 0, V - 1)
    j_ids = jnp.clip(j_vecs.astype(jnp.int32), 0, V - 1)
    i_row = jnp.zeros((1, B_pad), jnp.int32).at[0, :B].set(i_ids)
    j_row = jnp.zeros((1, B_pad), jnp.int32).at[0, :B].set(j_ids)

    out = pl.pallas_call(
        glove_kernel,
        out_shape=jax.ShapeDtypeStruct((1, B_pad), jnp.float32),
        in_specs=[
            pl.BlockSpec(memory_space=pltpu.MemorySpace.VMEM),   # i ids (1, B_pad)
            pl.BlockSpec(memory_space=pltpu.MemorySpace.VMEM),   # j ids (1, B_pad)
            pl.BlockSpec(memory_space=pltpu.MemorySpace.VMEM),   # uiT   (Daug, V)
            pl.BlockSpec(memory_space=pltpu.MemorySpace.VMEM),   # ujT   (Daug, V)
        ],
        out_specs=pl.BlockSpec(memory_space=pltpu.MemorySpace.VMEM),
    )(i_row, j_row, uiT, ujT)

    return out[0, :B]


if __name__ == "__main__":
    vocab_len = 256   # small synthetic vocabulary (len(words) in the original script)
    num_dim = 128     # matches the original num_dim
    batch = 8

    key = jax.random.PRNGKey(0)
    k_ui, k_uj, k_bi, k_bj, k_i, k_j = jax.random.split(key, 6)

    # PyTorch init: ui/uj ~ U(-1, 1); bi/bj are zero-initialized (but trainable).
    # Use small nonzero biases here so the bias path is actually exercised.
    ui = jax.random.uniform(k_ui, (vocab_len, num_dim), jnp.float32, -1.0, 1.0)
    uj = jax.random.uniform(k_uj, (vocab_len, num_dim), jnp.float32, -1.0, 1.0)
    bi = jax.random.uniform(k_bi, (vocab_len, 1), jnp.float32, -0.1, 0.1)
    bj = jax.random.uniform(k_bj, (vocab_len, 1), jnp.float32, -0.1, 0.1)

    i_vecs = jax.random.randint(k_i, (batch,), 0, vocab_len, dtype=jnp.int32)
    j_vecs = jax.random.randint(k_j, (batch,), 0, vocab_len, dtype=jnp.int32)

    uiT, ujT = prepare_glove_params(ui, uj, bi, bj)   # once, at "model load" time
    out = glove_forward(i_vecs, j_vecs, uiT, ujT)
    jax.block_until_ready(out)

    # Pure-JAX reference (same math as the PyTorch forward).
    ref = (jnp.sum(ui[i_vecs] * uj[j_vecs], axis=1)
           + bi[i_vecs, 0] + bj[j_vecs, 0])

    assert out.shape == (batch,)
    assert jnp.allclose(out, ref, atol=1e-4, rtol=1e-4), (out, ref)
    print("KERNEL_OK")
</pallas_src>

<mosaic_0001>
module attributes {stable_mosaic.version = 11 : i64} {
  func.func @glove_kernel(%arg0: memref<1x128xi32, #tpu.memory_space<vmem>>, %arg1: memref<1x128xi32, #tpu.memory_space<vmem>>, %arg2: memref<136x256xf32, #tpu.memory_space<vmem>>, %arg3: memref<136x256xf32, #tpu.memory_space<vmem>>, %arg4: memref<1x128xf32, #tpu.memory_space<vmem>>) attributes {dimension_semantics = [], scalar_prefetch = 0 : i64, scratch_operands = 0 : i64, tpu.core_type = #tpu.core_type<tc>} {
    %0 = tpu.iota {dimensions = array<i32: 0>} : vector<256x128xi32>
    %c0 = arith.constant 0 : index
    %c0_0 = arith.constant 0 : index
    %1 = vector.load %arg0[%c0, %c0_0] : memref<1x128xi32, #tpu.memory_space<vmem>>, vector<1x128xi32>
    %2 = vector.broadcast %1 : vector<1x128xi32> to vector<256x128xi32>
    %3 = arith.cmpi eq, %0, %2 : vector<256x128xi32>
    %4 = arith.extui %3 : vector<256x128xi1> to vector<256x128xi32>
    %5 = arith.sitofp %4 : vector<256x128xi32> to vector<256x128xf32>
    %c0_1 = arith.constant 0 : index
    %c0_2 = arith.constant 0 : index
    %6 = vector.load %arg1[%c0_1, %c0_2] : memref<1x128xi32, #tpu.memory_space<vmem>>, vector<1x128xi32>
    %7 = vector.broadcast %6 : vector<1x128xi32> to vector<256x128xi32>
    %8 = arith.cmpi eq, %0, %7 : vector<256x128xi32>
    %9 = arith.extui %8 : vector<256x128xi1> to vector<256x128xi32>
    %10 = arith.sitofp %9 : vector<256x128xi32> to vector<256x128xf32>
    %c0_3 = arith.constant 0 : index
    %c0_4 = arith.constant 0 : index
    %11 = vector.load %arg2[%c0_3, %c0_4] : memref<136x256xf32, #tpu.memory_space<vmem>>, vector<136x256xf32>
    %cst = arith.constant dense<0.000000e+00> : vector<136x128xf32>
    %12 = tpu.matmul %11, %5, %cst {dimension_numbers = #tpu.dot_dimension_numbers<[1], [0], [0], [1], [0, 0, 1, 1], [], []>, precision = #tpu.contract_precision<fp32>} : vector<136x256xf32>, vector<256x128xf32>, vector<136x128xf32> -> vector<136x128xf32>
    %c0_5 = arith.constant 0 : index
    %c0_6 = arith.constant 0 : index
    %13 = vector.load %arg3[%c0_5, %c0_6] : memref<136x256xf32, #tpu.memory_space<vmem>>, vector<136x256xf32>
    %cst_7 = arith.constant dense<0.000000e+00> : vector<136x128xf32>
    %14 = tpu.matmul %13, %10, %cst_7 {dimension_numbers = #tpu.dot_dimension_numbers<[1], [0], [0], [1], [0, 0, 1, 1], [], []>, precision = #tpu.contract_precision<fp32>} : vector<136x256xf32>, vector<256x128xf32>, vector<136x128xf32> -> vector<136x128xf32>
    %15 = arith.mulf %12, %14 : vector<136x128xf32>
    %cst_8 = arith.constant dense<0.000000e+00> : vector<128xf32>
    %16 = vector.multi_reduction <add>, %15, %cst_8 [0] : vector<136x128xf32> to vector<128xf32>
    %17 = vector.shape_cast %16 : vector<128xf32> to vector<1x128xf32>
    %c0_9 = arith.constant 0 : index
    %c0_10 = arith.constant 0 : index
    %18 = vector.load %arg4[%c0_9, %c0_10] : memref<1x128xf32, #tpu.memory_space<vmem>>, vector<1x128xf32>
    tpu.vector_store %arg4[%c0_9, %c0_10], %17 {strides = array<i32>} : memref<1x128xf32, #tpu.memory_space<vmem>>, vector<1x128xf32>,
    return
  }
}

</mosaic_0001>

<bundles_post_ra>
// kernel: glove_forward.1
= control target key start
LH: loop header
LB: loop body
LE: loop exit
PB: predicated region body
PF: predicated region fallthrough
CT: control target
= control target key end

     0   :  { %9 = vsyncpa [#allocation3], 0  ;;  %s6994_s0 = inlined_call_operand.vmem [shape: s32[1,128], index: 0, kind: input, shape index: {}]   ;;  %s6995_s1 = inlined_call_operand.vmem [shape: s32[1,128], index: 1, kind: input, shape index: {}]   ;;  %s6996_s2 = inlined_call_operand.hbm [shape: f32[136,256], index: 2, kind: input, shape index: {}]   ;;  %s6997_s3 = inlined_call_operand.hbm [shape: f32[136,256], index: 3, kind: input, shape index: {}]   ;;  %s6998_s4 = inlined_call_operand.vmem [shape: f32[1,128], index: 4, kind: output, shape index: {}]  }
   0x1   :  { %s19_s17 = sshll.u32 %s6996_s2, 4  ;;  %s20_s17 = int_to_ptr.hbm [resolvable:$true] %s19_s17 }
   0x2   :  { %10 = vsyncpa [#allocation5], 0  ;;  %s4057_s18 = smov [#allocation2]   ;;  %s32_s22 = sshll.u32 %s6997_s3, 4  ;;  %s33_s22 = int_to_ptr.hbm [resolvable:$true] %s32_s22 }
   0x3   :  { %s21_s19 = sshll.u32 %s4057_s18, 4  ;;  %s4058_s23 = smov 256   ;;  %s22_s19 = int_to_ptr.vmem [resolvable:$true] %s21_s19 }
   0x4   :  { %s4059_s24 = smov 16   ;;  %s4060_s25 = smov [#allocation4]  }
   0x5   :  { %27 = dma.hbm_to_vmem [thread:$0]  %s20_s17, 4352, %s22_s19, [#allocation3], %s4058_s23, %s4058_s23, %s4059_s24  }
   0x6   :  { %s34_s26 = sshll.u32 %s4060_s25, 4  ;;  %s35_s26 = int_to_ptr.vmem [resolvable:$true] %s34_s26 }
   0x7   :  { %40 = dma.hbm_to_vmem [thread:$0]  %s33_s22, 4352, %s35_s26, [#allocation5], %s4058_s23, %s4058_s23, %s4059_s24  }
   0x8   :  { %4053 = dma.done.wait [#allocation3], 4352  }
   0x9   :  { %4054 = vsyncadd [#allocation3], 4294962944 }
   0xa   :  { %4055 = dma.done.wait [#allocation5], 4352  }
   0xb   :  { %4056 = vsyncadd [#allocation5], 4294962944  ;;  %v49_v0 = vlaneseq  ;;  %v4111_v6 = vld [vmem:[%s6994_s0] ss:$0 sm:$0xff]  ;;  %v7044_v8 = vmov 1.0   ;;  %v7028_v9 = vmov 0.0  }
   0xd   :  { %v4094_v1 = vshrl.u32 %v49_v0, 7 }
   0xf   :  { %7230 = vst [vmem:[#allocation8_spill] sm:$0xff] %v4094_v1  ;;  %v4097_v2 = vadd.s32 120, %v4094_v1  ;;  %v4100_v3 = vadd.s32 112, %v4094_v1  ;;  %v4103_v4 = vadd.s32 104, %v4094_v1  ;;  %v4106_v5 = vadd.s32 96, %v4094_v1 }
  0x10   :  { %v4114_v7 = vadd.s32 88, %v4094_v1  ;;  %v4137_v11 = vadd.s32 80, %v4094_v1  ;;  %v4162_v16 = vadd.s32 72, %v4094_v1  ;;  %v4173_v20 = vadd.s32 64, %v4094_v1 }
  0x11   :  { %7231 = vst [vmem:[#allocation9_spill] sm:$0xff] %v4097_v2  ;;  %vm99_vm0 = vcmp.eq.s32.totalorder %v4097_v2, %v4111_v6  ;;  %vm98_vm1 = vcmp.eq.s32.totalorder %v4100_v3, %v4111_v6  ;;  %vm97_vm2 = vcmp.eq.s32.totalorder %v4103_v4, %v4111_v6  ;;  %vm96_vm3 = vcmp.eq.s32.totalorder %v4106_v5, %v4111_v6 }
  0x12   :  { %3804 = vmatpush.msk.msra.mxu0 %vm99_vm0, %v7044_v8  ;;  %v3755_v10 = vsel %vm99_vm0, 1.0, %v7028_v9  ;;  %3820 = vmatpush.msk.msra.mxu3 %vm99_vm0, %v7044_v8  ;;  %v3754_v13 = vsel %vm98_vm1, 1.0, %v7028_v9  ;;  %vm95_vm4 = vcmp.eq.s32.totalorder %v4114_v7, %v4111_v6  ;;  %v3753_v15 = vsel %vm97_vm2, 1.0, %v7028_v9 }
  0x13   :  { %v4139_v12 = vsub.f32 %v3755_v10, %v3755_v10  ;;  %v4149_v14 = vsub.f32 %v3754_v13, %v3754_v13  ;;  %v4166_v18 = vsub.f32 %v3753_v15, %v3753_v15  ;;  %v3752_v19 = vsel %vm96_vm3, 1.0, %v7028_v9 }
  0x14   :  { %3805 = vmatpush.msk.msra.mxu0 %vm98_vm1, %v7044_v8  ;;  %3821 = vmatpush.msk.msra.mxu3 %vm98_vm1, %v7044_v8  ;;  %vm94_vm5 = vcmp.eq.s32.totalorder %v4137_v11, %v4111_v6  ;;  %v4182_v22 = vsub.f32 %v3752_v19, %v3752_v19  ;;  %v4189_v23 = vadd.s32 56, %v4094_v1  ;;  %v3751_v26 = vsel %vm95_vm4, 1.0, %v7028_v9  ;;  %v278_v19 = vld [vmem:[#allocation2] sm:$0xff] }
  0x15   :  { %648 = vmatpush.msra.mxu2 %v4139_v12  ;;  %v483_v17 = vand.u32 4294901760, %v4139_v12  ;;  %v489_v21 = vand.u32 4294901760, %v4149_v14  ;;  %v7016_v25 = vand.u32 4294901760, %v4166_v18  ;;  %v4201_v27 = vadd.s32 48, %v4094_v1 }
  0x16   :  { %3806 = vmatpush.msk.msra.mxu0 %vm97_vm2, %v7044_v8  ;;  %3822 = vmatpush.msk.msra.mxu3 %vm97_vm2, %v7044_v8  ;;  %vm93_vm6 = vcmp.eq.s32.totalorder %v4162_v16, %v4111_v6  ;;  %v4212_v29 = vsub.f32 %v3751_v26, %v3751_v26  ;;  %v7015_v30 = vand.u32 4294901760, %v4182_v22  ;;  %v3750_v33 = vsel %vm94_vm5, 1.0, %v7028_v9 }
  0x17   :  { %651 = vmatpush.msra.mxu2 %v4149_v14  ;;  %v484_v24 = vsub.f32 %v4139_v12, %v483_v17  ;;  %7232 = vst [vmem:[#allocation10_spill] sm:$0xff] %v4201_v27  ;;  %v490_v28 = vsub.f32 %v4149_v14, %v489_v21  ;;  %v496_v32 = vsub.f32 %v4166_v18, %v7016_v25  ;;  %v4228_v34 = vadd.s32 40, %v4094_v1 }
  0x18   :  { %3807 = vmatpush.msk.msra.mxu0 %vm96_vm3, %v7044_v8  ;;  %3823 = vmatpush.msk.msra.mxu3 %vm96_vm3, %v7044_v8  ;;  %vm92_vm7 = vcmp.eq.s32.totalorder %v4173_v20, %v4111_v6  ;;  %v502_v36 = vsub.f32 %v4182_v22, %v7015_v30  ;;  %v4239_v37 = vsub.f32 %v3750_v33, %v3750_v33  ;;  %v7013_v39 = vand.u32 4294901760, %v4212_v29 }
  0x19   :  { %v485_v31 = vand.u32 4294901760, %v484_v24  ;;  %654 = vmatpush.msra.mxu2 %v4166_v18  ;;  %7233 = vst [vmem:[#allocation11_spill] sm:$0xff] %v4228_v34  ;;  %v491_v35 = vand.u32 4294901760, %v490_v28  ;;  %v497_v38 = vand.u32 4294901760, %v496_v32  ;;  %vm91_vm8 = vcmp.eq.s32.totalorder %v4189_v23, %v4111_v6 }
  0x1a   :  { %3808 = vmatpush.msk.msra.mxu0 %vm95_vm4, %v7044_v8  ;;  %3824 = vmatpush.msk.msra.mxu3 %vm95_vm4, %v7044_v8  ;;  %v3749_v40 = vsel %vm93_vm6, 1.0, %v7028_v9  ;;  %v7012_v42 = vand.u32 4294901760, %v4239_v37  ;;  %v4265_v43 = vadd.s32 32, %v4094_v1  ;;  %v4268_v44 = vadd.s32 24, %v4094_v1 }
  0x1b   :  { %486 = vmatpush.msra.mxu1 %v485_v31  ;;  %657 = vmatpush.msra.mxu2 %v4182_v22  ;;  %v4257_v41 = vsub.f32 %v3749_v40, %v3749_v40  ;;  %v503_v45 = vand.u32 4294901760, %v502_v36  ;;  %v508_v46 = vsub.f32 %v4212_v29, %v7013_v39  ;;  %vm90_vm9 = vcmp.eq.s32.totalorder %v4201_v27, %v4111_v6 }
  0x1c   :  { %3809 = vmatpush.msk.msra.mxu0 %vm94_vm5, %v7044_v8  ;;  %3825 = vmatpush.msk.msra.mxu3 %vm94_vm5, %v7044_v8  ;;  %7234 = vst [vmem:[#allocation12_spill] sm:$0xff] %v4265_v43  ;;  %v3748_v47 = vsel %vm92_vm7, 1.0, %v7028_v9  ;;  %v514_v48 = vsub.f32 %v4239_v37, %v7012_v42  ;;  %v3747_v51 = vsel %vm91_vm8, 1.0, %v7028_v9  ;;  %vm89_vm10 = vcmp.eq.s32.totalorder %v4228_v34, %v4111_v6 }
  0x1d   :  { %7235 = vst [vmem:[#allocation13_spill] sm:$0xff] %v4268_v44  ;;  %492 = vmatpush.msra.mxu1 %v491_v35  ;;  %660 = vmatpush.msra.mxu2 %v4212_v29  ;;  %v4287_v49 = vsub.f32 %v3748_v47, %v3748_v47  ;;  %v7010_v50 = vand.u32 4294901760, %v4257_v41  ;;  %v509_v52 = vand.u32 4294901760, %v508_v46  ;;  %v4301_v53 = vsub.f32 %v3747_v51, %v3747_v51 }
  0x1e   :  { %3810 = vmatpush.msk.msra.mxu0 %vm93_vm6, %v7044_v8  ;;  %3826 = vmatpush.msk.msra.mxu3 %vm93_vm6, %v7044_v8  ;;  %v4304_v54 = vadd.s32 16, %v4094_v1  ;;  %v3746_v57 = vsel %vm90_vm9, 1.0, %v7028_v9  ;;  %v4323_v58 = vadd.s32 8, %v4094_v1  ;;  %v515_v59 = vand.u32 4294901760, %v514_v48 }
  0x1f   :  { %498 = vmatpush.msra.mxu1 %v497_v38  ;;  %663 = vmatpush.msra.mxu2 %v4239_v37  ;;  %v520_v55 = vsub.f32 %v4257_v41, %v7010_v50  ;;  %v7009_v56 = vand.u32 4294901760, %v4287_v49  ;;  %vm88_vm11 = vcmp.eq.s32.totalorder %v4265_v43, %v4111_v6  ;;  %v4328_v60 = vsub.f32 %v3746_v57, %v3746_v57 }
  0x20   :  { %7236 = vst [vmem:[#allocation14_spill] sm:$0xff] %v4304_v54  ;;  %3811 = vmatpush.msk.msra.mxu0 %vm92_vm7, %v7044_v8  ;;  %3827 = vmatpush.msk.msra.mxu3 %vm92_vm7, %v7044_v8  ;;  %v7005_v61 = vand.u32 4294901760, %v4301_v53  ;;  %vm6999_vm12 = vcmp.eq.s32.totalorder %v4268_v44, %v4111_v6  ;;  %v3745_v0 = vsel %vm89_vm10, 1.0, %v7028_v9  ;;  %vm7017_vm13 = vcmp.eq.s32.totalorder %v4304_v54, %v4111_v6 }
  0x21   :  { %7237 = vst [vmem:[#allocation15_spill] sm:$0xff] %v4323_v58  ;;  %504 = vmatpush.msra.mxu1 %v503_v45  ;;  %666 = vmatpush.msra.mxu2 %v4257_v41  ;;  %v521_v62 = vand.u32 4294901760, %v520_v55  ;;  %v526_v63 = vsub.f32 %v4287_v49, %v7009_v56  ;;  %v4352_v13 = vsub.f32 %v3745_v0, %v3745_v0  ;;  %v7004_v15 = vand.u32 4294901760, %v4328_v60  ;;  %v280_v55 = vld [vmem:[#allocation2 + $0x10] sm:$0xff] }
  0x22   :  { %3812 = vmatpush.msk.msra.mxu0 %vm91_vm8, %v7044_v8  ;;  %3828 = vmatpush.msk.msra.mxu3 %vm91_vm8, %v7044_v8  ;;  %v532_v10 = vsub.f32 %v4301_v53, %v7005_v61  ;;  %v3744_v26 = vsel %vm88_vm11, 1.0, %v7028_v9  ;;  %vm7008_vm14 = vcmp.eq.s32.totalorder %v4323_v58, %v4111_v6  ;;  %v3743_v33 = vsel %vm6999_vm12, 1.0, %v7028_v9 }
  0x23   :  { %510 = vmatpush.msra.mxu1 %v509_v52  ;;  %669 = vmatpush.msra.mxu2 %v4287_v49  ;;  %v527_v24 = vand.u32 4294901760, %v526_v63  ;;  %v538_v28 = vsub.f32 %v4328_v60, %v7004_v15  ;;  %v4373_v31 = vsub.f32 %v3744_v26, %v3744_v26  ;;  %v7002_v32 = vand.u32 4294901760, %v4352_v13 }
  0x24   :  { %3813 = vmatpush.msk.msra.mxu0 %vm90_vm9, %v7044_v8  ;;  %3829 = vmatpush.msk.msra.mxu3 %vm90_vm9, %v7044_v8  ;;  %vm7011_vm15 = vcmp.eq.s32.totalorder %v4094_v1, %v4111_v6  ;;  %v4392_v35 = vand.u32 4294901760, %v278_v19  ;;  %v3742_v36 = vsel %vm7017_vm13, 1.0, %v7028_v9  ;;  %v533_v38 = vand.u32 4294901760, %v532_v10 }
  0x25   :  { %516 = vmatpush.msra.mxu1 %v515_v59  ;;  %672 = vmatpush.msra.mxu2 %v4301_v53  ;;  %v544_v40 = vsub.f32 %v4352_v13, %v7002_v32  ;;  %v4402_v45 = vsub.f32 %v3743_v33, %v3743_v33  ;;  %v7001_v46 = vand.u32 4294901760, %v4373_v31  ;;  %v4416_v48 = vsub.f32 %v3742_v36, %v3742_v36 }
  0x26   :  { %3814 = vmatpush.msk.msra.mxu0 %vm89_vm10, %v7044_v8  ;;  %3830 = vmatpush.msk.msra.mxu3 %vm89_vm10, %v7044_v8  ;;  %v4414_v47 = vsub.f32 %v278_v19, %v4392_v35  ;;  %v3741_v51 = vsel %vm7008_vm14, 1.0, %v7028_v9  ;;  %v3740_v52 = vsel %vm7011_vm15, 1.0, %v7028_v9  ;;  %v539_v57 = vand.u32 4294901760, %v538_v28 }
  0x27   :  { %522 = vmatpush.msra.mxu1 %v521_v62  ;;  %675 = vmatpush.msra.mxu2 %v4328_v60  ;;  %v550_v59 = vsub.f32 %v4373_v31, %v7001_v46  ;;  %v7000_v62 = vand.u32 4294901760, %v4402_v45  ;;  %v4431_v63 = vsub.f32 %v3741_v51, %v3741_v51  ;;  %v7003_v10 = vand.u32 4294901760, %v4416_v48 }
  0x28   :  { %3815 = vmatpush.msk.msra.mxu0 %vm88_vm11, %v7044_v8  ;;  %3831 = vmatpush.msk.msra.mxu3 %vm88_vm11, %v7044_v8  ;;  %v346_v0 = vand.u32 4294901760, %v4414_v47  ;;  %v4443_v19 = vsub.f32 %v3740_v52, %v3740_v52  ;;  %v545_v26 = vand.u32 4294901760, %v544_v40  ;;  %v4453_v36 = vand.u32 4294901760, %v280_v55  ;;  %v282_v52 = vld [vmem:[#allocation2 + $0x20] sm:$0xff] }
  0x29   :  { %528 = vmatpush.msra.mxu1 %v527_v24  ;;  %678 = vmatpush.msra.mxu2 %v4352_v13  ;;  %v4446_v24 = vadd.s32 248, %v4094_v1  ;;  %v556_v28 = vsub.f32 %v4402_v45, %v7000_v62  ;;  %v7007_v33 = vand.u32 4294901760, %v4431_v63  ;;  %v551_v62 = vand.u32 4294901760, %v550_v59 }
  0x2a   :  { %3816 = vmatpush.msk.msra.mxu0 %vm6999_vm12, %v7044_v8  ;;  %3832 = vmatpush.msk.msra.mxu3 %vm6999_vm12, %v7044_v8  ;;  %v347_v51 = vsub.f32 %v4414_v47, %v346_v0  ;;  %v7006_v40 = vand.u32 4294901760, %v4443_v19  ;;  %v4476_v32 = vsub.f32 %v280_v55, %v4453_v36  ;;  %v4499_v61 = vand.u32 4294901760, %v282_v52 }
  0x2b   :  { %7238 = vst [vmem:[#allocation16_spill] sm:$0xff] %v4446_v24  ;;  %534 = vmatpush.msra.mxu1 %v533_v38  ;;  %681 = vmatpush.msra.mxu2 %v4373_v31  ;;  %v562_v38 = vsub.f32 %v4416_v48, %v7003_v10  ;;  %vm7018_vm12 = vcmp.eq.s32.totalorder %v4446_v24, %v4111_v6  ;;  %v557_v15 = vand.u32 4294901760, %v556_v28  ;;  %v4520_v50 = vadd.s32 224, %v4094_v1 }
  0x2c   :  { %3817 = vmatpush.msk.msra.mxu0 %vm7017_vm13, %v7044_v8  ;;  %3833 = vmatpush.msk.msra.mxu3 %vm7017_vm13, %v7044_v8  ;;  %v3771_v46 = vsel %vm7018_vm12, 1.0, %v7028_v9  ;;  %v348_v10 = vand.u32 4294901760, %v347_v51  ;;  %v354_v55 = vand.u32 4294901760, %v4476_v32  ;;  %v574_v28 = vsub.f32 %v4443_v19, %v7006_v40 }
  0x2d   :  { %540 = vmatpush.msra.mxu1 %v539_v57  ;;  %684 = vmatpush.msra.mxu2 %v4402_v45  ;;  %v568_v57 = vsub.f32 %v4431_v63, %v7007_v33  ;;  %v4489_v59 = vsub.f32 %v3771_v46, %v3771_v46  ;;  %v4497_v51 = vadd.s32 240, %v4094_v1  ;;  %v563_v46 = vand.u32 4294901760, %v562_v38  ;;  %v284_v38 = vld [vmem:[#allocation2 + $0x30] sm:$0xff]  ;;  %7241 = vst [vmem:[#allocation19_spill] sm:$0xff] %v4520_v50 }
  0x2e   :  { %3818 = vmatpush.msk.msra.mxu0 %vm7008_vm14, %v7044_v8  ;;  %3834 = vmatpush.msk.msra.mxu3 %vm7008_vm14, %v7044_v8  ;;  %v4511_v40 = vadd.s32 232, %v4094_v1  ;;  %v355_v33 = vsub.f32 %v4476_v32, %v354_v55  ;;  %v4517_v56 = vsub.f32 %v282_v52, %v4499_v61  ;;  %v575_v42 = vand.u32 4294901760, %v574_v28 }
  0x2f   :  { %546 = vmatpush.msra.mxu1 %v545_v26  ;;  %687 = vmatpush.msra.mxu2 %v4416_v48  ;;  %7239 = vst [vmem:[#allocation17_spill] sm:$0xff] %v4497_v51  ;;  %v7014_v26 = vand.u32 4294901760, %v4489_v59  ;;  %vm114_vm14 = vcmp.eq.s32.totalorder %v4497_v51, %v4111_v6  ;;  %v569_v52 = vand.u32 4294901760, %v568_v57  ;;  %v4541_v30 = vand.u32 4294901760, %v284_v38 }
  0x30   :  { %3819 = vmatpush.msk.msra.mxu0 %vm7011_vm15, %v7044_v8  ;;  %3835 = vmatpush.msk.msra.mxu3 %vm7011_vm15, %v7044_v8  ;;  %7240 = vst [vmem:[#allocation18_spill] sm:$0xff] %v4511_v40  ;;  %vm113_vm15 = vcmp.eq.s32.totalorder %v4511_v40, %v4111_v6  ;;  %vm112_vm13 = vcmp.eq.s32.totalorder %v4520_v50, %v4111_v6  ;;  %v356_v12 = vand.u32 4294901760, %v355_v33  ;;  %v4988_v43 = vadd.s32 136, %v4094_v1  ;;  %v297_v50 = vld [vmem:[#allocation2 + $0x98] sm:$0xff] }
  0x31   :  { %349 = vmatmul.f32.vlgmr.msra.gmra.mxu0 %v348_v10  ;;  %552 = vmatpush.msra.mxu1 %v551_v62  ;;  %v1321_v10 = vsub.f32 %v4489_v59, %v7014_v26  ;;  %v3770_v62 = vsel %vm114_vm14, 1.0, %v7028_v9  ;;  %7242 = vst [vmem:[#allocation20_spill] sm:$0xff] %v4541_v30  ;;  %v3768_v57 = vsel %vm112_vm13, 1.0, %v7028_v9 }
  0x32   :  { %690 = vmatpush.msra.mxu2 %v4431_v63  ;;  %815 = vmatmul.f32.vlgmr.msra.gmra.mxu3 %v346_v0  ;;  %v4534_v39 = vsub.f32 %v3770_v62, %v3770_v62  ;;  %v3769_v0 = vsel %vm113_vm15, 1.0, %v7028_v9  ;;  %v4581_v62 = vsub.f32 %v284_v38, %v4541_v30  ;;  %7282 = vst [vmem:[#allocation39_spill] sm:$0xff] %v4988_v43 }
  0x33   :  { %558 = vmatpush.msra.mxu1 %v557_v15  ;;  %918 = vmatpush.msrb.mxu0 %v483_v17  ;;  %v1322_v26 = vand.u32 4294901760, %v1321_v10  ;;  %v4543_v25 = vsub.f32 %v3769_v0, %v3769_v0  ;;  %v362_v17 = vand.u32 4294901760, %v4517_v56  ;;  %v286_v0 = vld [vmem:[#allocation2 + $0x40] sm:$0xff] }
  0x34   :  { %693 = vmatpush.msra.mxu2 %v4443_v19  ;;  %v7027_v15 = vand.u32 4294901760, %v4534_v39 }
  0x35   :  { %564 = vmatpush.msra.mxu1 %v563_v46  ;;  %696 = vmatmul.f32.vlgmr.msra.gmra.mxu2 %v4414_v47  ;;  %v7026_v28 = vand.u32 4294901760, %v4543_v25  ;;  %v4559_v46 = vsub.f32 %v3768_v57, %v3768_v57  ;;  %v4562_v47 = vadd.s32 216, %v4094_v1  ;;  %v363_v14 = vsub.f32 %v4517_v56, %v362_v17 }
  0x36   :  { %3852 = vmatpush.msk.msrb.mxu2 %vm7018_vm12, %v7044_v8  ;;  %1323 = vmatpush.msrb.mxu3 %v1322_v26  ;;  %v1327_v33 = vsub.f32 %v4534_v39, %v7027_v15  ;;  %v4883_v15 = vadd.s32 160, %v4094_v1 }
  0x37   :  { %7243 = vst [vmem:[#allocation21_spill] sm:$0xff] %v4562_v47  ;;  %570 = vmatpush.msra.mxu1 %v569_v52  ;;  %922 = vmatpush.msrb.mxu0 %v489_v21  ;;  %v1333_v26 = vsub.f32 %v4543_v25, %v7026_v28  ;;  %v7024_v10 = vand.u32 4294901760, %v4559_v46  ;;  %vm111_vm12 = vcmp.eq.s32.totalorder %v4562_v47, %v4111_v6 }
  0x38   :  { %3853 = vmatpush.msk.msrb.mxu2 %vm114_vm14, %v7044_v8  ;;  %v1328_v21 = vand.u32 4294901760, %v1327_v33  ;;  %v364_v33 = vand.u32 4294901760, %v363_v14  ;;  %7276 = vst [vmem:[#allocation35_spill] sm:$0xff] %v4883_v15 }
  0x39   :  { %357 = vmatmul.f32.gmra.mxu0 %v356_v12  ;;  %576 = vmatpush.msra.mxu1 %v575_v42  ;;  %v1334_v52 = vand.u32 4294901760, %v1333_v26  ;;  %v1339_v57 = vsub.f32 %v4559_v46, %v7024_v10  ;;  %v3767_v42 = vsel %vm111_vm12, 1.0, %v7028_v9  ;;  %v370_v26 = vand.u32 4294901760, %v4581_v62 }
  0x3a   :  { %578 = vmatmul.f32.vlgmr.msra.gmra.mxu1 %v4392_v35  ;;  %821 = vmatmul.f32.gmra.mxu3 %v354_v55  ;;  %v4595_v38 = vsub.f32 %v3767_v42, %v3767_v42  ;;  %v7244_v55 = vand.u32 4294901760, %v4166_v18  ;;  %v7246_v18 = vand.u32 4294901760, %v4182_v22 }
  0x3b   :  { %3836 = vmatpush.msk.msrb.mxu1 %vm99_vm0, %v7044_v8  ;;  %1329 = vmatpush.msrb.mxu3 %v1328_v21  ;;  %v1340_v12 = vand.u32 4294901760, %v1339_v57  ;;  %v4609_v21 = vand.u32 4294901760, %v286_v0  ;;  %v371_v14 = vsub.f32 %v4581_v62, %v370_v26  ;;  %v4636_v57 = vadd.s32 208, %v4094_v1 }
  0x3c   :  { %3854 = vmatpush.msk.msrb.mxu2 %vm113_vm15, %v7044_v8  ;;  %926 = vmatpush.msrb.mxu0 %v7244_v55  ;;  %v7020_v42 = vand.u32 4294901760, %v4595_v38  ;;  %v288_v55 = vld [vmem:[#allocation2 + $0x50] sm:$0xff] }
  0x3d   :  { %701 = vmatmul.f32.gmra.mxu2 %v4476_v32  ;;  %3837 = vmatpush.msk.msrb.mxu1 %vm98_vm1, %v7044_v8  ;;  %7245 = vst [vmem:[#allocation22_spill] sm:$0xff] %v4609_v21  ;;  %vm110_vm0 = vcmp.eq.s32.totalorder %v4636_v57, %v4111_v6 }
  0x3e   :  { %1335 = vmatpush.msrb.mxu3 %v1334_v52  ;;  %3855 = vmatpush.msk.msrb.mxu2 %vm112_vm13, %v7044_v8  ;;  %v1345_v32 = vsub.f32 %v4595_v38, %v7020_v42  ;;  %v377_v52 = vsub.f32 %v286_v0, %v4609_v21  ;;  %7247 = vst [vmem:[#allocation23_spill] sm:$0xff] %v4636_v57  ;;  %v7256_v42 = vand.u32 4294901760, %v4328_v60  ;;  %v4721_v60 = vadd.s32 192, %v4094_v1 }
  0x3f   :  { %3838 = vmatpush.msk.msrb.mxu1 %vm97_vm2, %v7044_v8  ;;  %930 = vmatpush.msrb.mxu0 %v7246_v18  ;;  %v7250_v18 = vand.u32 4294901760, %v4239_v37 }
  0x40   :  { %1341 = vmatpush.msrb.mxu3 %v1340_v12  ;;  %3856 = vmatpush.msk.msrb.mxu2 %vm111_vm12, %v7044_v8  ;;  %v1346_v22 = vand.u32 4294901760, %v1345_v32  ;;  %v7248_v12 = vand.u32 4294901760, %v4212_v29  ;;  %v3766_v29 = vsel %vm110_vm0, 1.0, %v7028_v9  ;;  %v378_v0 = vand.u32 4294901760, %v377_v52  ;;  %7257 = vst [vmem:[#allocation27_spill] sm:$0xff] %v4721_v60 }
  0x41   :  { %365 = vmatmul.f32.gmra.mxu0 %v364_v33  ;;  %3839 = vmatpush.msk.msrb.mxu1 %vm96_vm3, %v7044_v8  ;;  %v4656_v33 = vand.u32 4294901760, %v288_v55  ;;  %v4660_v32 = vsub.f32 %v3766_v29, %v3766_v29  ;;  %v4678_v29 = vadd.s32 200, %v4094_v1  ;;  %vm108_vm2 = vcmp.eq.s32.totalorder %v4721_v60, %v4111_v6 }
  0x42   :  { %582 = vmatmul.f32.gmra.mxu1 %v4453_v36  ;;  %827 = vmatmul.f32.gmra.mxu3 %v362_v17  ;;  %v372_v17 = vand.u32 4294901760, %v371_v14  ;;  %v379_v37 = vsub.f32 %v377_v52, %v378_v0  ;;  %vm7262_vm3 = vcmp.eq.s32.totalorder %v4268_v44, %v4111_v6  ;;  %v306_v44 = vld [vmem:[#allocation2 + $0xe0] sm:$0xff] }
  0x43   :  { %934 = vmatpush.msrb.mxu0 %v7248_v12  ;;  %1347 = vmatpush.msrb.mxu3 %v1346_v22  ;;  %7249 = vst [vmem:[#allocation24_spill] sm:$0xff] %v4656_v33  ;;  %v7019_v22 = vand.u32 4294901760, %v4660_v32  ;;  %v7251_v12 = vand.u32 4294901760, %v4257_v41  ;;  %v290_v41 = vld [vmem:[#allocation2 + $0x60] sm:$0xff]  ;;  %vm109_vm1 = vcmp.eq.s32.totalorder %v4678_v29, %v4111_v6 }
  0x44   :  { %3840 = vmatpush.msk.msrb.mxu1 %vm95_vm4, %v7044_v8  ;;  %3857 = vmatpush.msk.msrb.mxu2 %vm110_vm0, %v7044_v8  ;;  %7252 = vst [vmem:[#allocation25_spill] sm:$0xff] %v4678_v29  ;;  %vm7265_vm4 = vcmp.eq.s32.totalorder %v4304_v54, %v4111_v6  ;;  %v4959_v54 = vadd.s32 144, %v4094_v1  ;;  %v295_v29 = vld [vmem:[#allocation2 + $0x88] sm:$0xff] }
  0x45   :  { %706 = vmatmul.f32.gmra.mxu2 %v4517_v56  ;;  %938 = vmatpush.msrb.mxu0 %v7250_v18  ;;  %v385_v56 = vsub.f32 %v288_v55, %v4656_v33  ;;  %v1351_v14 = vsub.f32 %v4660_v32, %v7019_v22  ;;  %v380_v55 = vand.u32 4294901760, %v379_v37 }
  0x46   :  { %3841 = vmatpush.msk.msrb.mxu1 %vm94_vm5, %v7044_v8  ;;  %3858 = vmatpush.msk.msrb.mxu2 %vm109_vm1, %v7044_v8  ;;  %7280 = vst [vmem:[#allocation38_spill] sm:$0xff] %v4959_v54 }
  0x47   :  { %942 = vmatpush.msrb.mxu0 %v7251_v12  ;;  %v1352_v18 = vand.u32 4294901760, %v1351_v14  ;;  %v4698_v12 = vand.u32 4294901760, %v290_v41 }
  0x48   :  { %3842 = vmatpush.msk.msrb.mxu1 %vm93_vm6, %v7044_v8  ;;  %3859 = vmatpush.msk.msrb.mxu2 %vm108_vm2, %v7044_v8  ;;  %vm7268_vm6 = vcmp.eq.s32.totalorder %v4323_v58, %v4111_v6  ;;  %v304_v58 = vld [vmem:[#allocation2 + $0xd0] sm:$0xff] }
  0x49   :  { %373 = vmatmul.f32.gmra.mxu0 %v372_v17  ;;  %v7253_v17 = vand.u32 4294901760, %v4287_v49  ;;  %v386_v49 = vand.u32 4294901760, %v385_v56  ;;  %7254 = vst [vmem:[#allocation26_spill] sm:$0xff] %v4698_v12  ;;  %1353 = vmatpush.msrb.mxu3 %v1352_v18  ;;  %v292_v18 = vld [vmem:[#allocation2 + $0x70] sm:$0xff] }
  0x4a   :  { %586 = vmatmul.f32.gmra.mxu1 %v4499_v61  ;;  %833 = vmatmul.f32.gmra.mxu3 %v370_v26  ;;  %v3765_v26 = vsel %vm109_vm1, 1.0, %v7028_v9 }
  0x4b   :  { %946 = vmatpush.msrb.mxu0 %v7253_v17  ;;  %3843 = vmatpush.msk.msrb.mxu1 %vm92_vm7, %v7044_v8  ;;  %v4700_v14 = vsub.f32 %v3765_v26, %v3765_v26  ;;  %v7255_v17 = vand.u32 4294901760, %v4301_v53  ;;  %v393_v53 = vsub.f32 %v290_v41, %v4698_v12  ;;  %v7258_v26 = vand.u32 4294901760, %v4352_v13 }
  0x4c   :  { %v3764_v13 = vsel %vm108_vm2, 1.0, %v7028_v9  ;;  %vm7270_vm7 = vcmp.eq.s32.totalorder %v4094_v1, %v4111_v6 }
  0x4d   :  { %711 = vmatmul.f32.gmra.mxu2 %v4581_v62  ;;  %950 = vmatpush.msrb.mxu0 %v7255_v17  ;;  %v7023_v22 = vand.u32 4294901760, %v4700_v14  ;;  %v387_v62 = vsub.f32 %v385_v56, %v386_v49  ;;  %v4741_v17 = vsub.f32 %v3764_v13, %v3764_v13 }
  0x4e   :  { %3844 = vmatpush.msk.msrb.mxu1 %vm91_vm8, %v7044_v8  ;;  %vm7272_vm8 = vcmp.eq.s32.totalorder %v4446_v24, %v4111_v6  ;;  %v299_v24 = vld [vmem:[#allocation2 + $0xa8] sm:$0xff] }
  0x4f   :  { %954 = vmatpush.msrb.mxu0 %v7256_v42  ;;  %v1357_v37 = vsub.f32 %v4700_v14, %v7023_v22  ;;  %v388_v41 = vand.u32 4294901760, %v387_v62  ;;  %v7261_v62 = vand.u32 4294901760, %v4402_v45  ;;  %v4762_v45 = vadd.s32 184, %v4094_v1 }
  0x50   :  { %3845 = vmatpush.msk.msrb.mxu1 %vm90_vm9, %v7044_v8  ;;  %v4845_v22 = vadd.s32 168, %v4094_v1 }
  0x51   :  { %381 = vmatmul.f32.gmra.mxu0 %v380_v55  ;;  %v1358_v42 = vand.u32 4294901760, %v1357_v37  ;;  %v394_v55 = vand.u32 4294901760, %v393_v53  ;;  %v7260_v37 = vand.u32 4294901760, %v4373_v31  ;;  %v294_v31 = vld [vmem:[#allocation2 + $0x80] sm:$0xff]  ;;  %7263 = vst [vmem:[#allocation29_spill] sm:$0xff] %v4762_v45  ;;  %vm107_vm5 = vcmp.eq.s32.totalorder %v4762_v45, %v4111_v6 }
  0x52   :  { %590 = vmatmul.f32.gmra.mxu1 %v4541_v30  ;;  %839 = vmatmul.f32.gmra.mxu3 %v378_v0  ;;  %v4731_v0 = vand.u32 4294901760, %v292_v18  ;;  %7274 = vst [vmem:[#allocation33_spill] sm:$0xff] %v4845_v22  ;;  %v5015_v30 = vadd.s32 128, %v4094_v1 }
  0x53   :  { %958 = vmatpush.msrb.mxu0 %v7258_v26  ;;  %3846 = vmatpush.msk.msrb.mxu1 %vm89_vm10, %v7044_v8  ;;  %vm105_vm10 = vcmp.eq.s32.totalorder %v4845_v22, %v4111_v6 }
  0x54   :  { %7259 = vst [vmem:[#allocation28_spill] sm:$0xff] %v4731_v0  ;;  %1359 = vmatpush.msrb.mxu3 %v1358_v42  ;;  %v395_v42 = vsub.f32 %v393_v53, %v394_v55  ;;  %v401_v26 = vsub.f32 %v292_v18, %v4731_v0  ;;  %3860 = vmatpush.msk.msrb.mxu2 %vm107_vm5, %v7044_v8 }
  0x55   :  { %716 = vmatmul.f32.gmra.mxu2 %v377_v52  ;;  %962 = vmatpush.msrb.mxu0 %v7260_v37  ;;  %v7022_v52 = vand.u32 4294901760, %v4741_v17  ;;  %7283 = vst [vmem:[#allocation40_spill] sm:$0xff] %v5015_v30 }
  0x56   :  { %3847 = vmatpush.msk.msrb.mxu1 %vm88_vm11, %v7044_v8  ;;  %v402_v37 = vand.u32 4294901760, %v401_v26  ;;  %vm104_vm11 = vcmp.eq.s32.totalorder %v4883_v15, %v4111_v6 }
  0x57   :  { %966 = vmatpush.msrb.mxu0 %v7261_v62  ;;  %v1363_v13 = vsub.f32 %v4741_v17, %v7022_v52  ;;  %v4772_v62 = vand.u32 4294901760, %v294_v31 }
  0x58   :  { %3848 = vmatpush.msk.msrb.mxu1 %vm7262_vm3, %v7044_v8 }
  0x59   :  { %389 = vmatmul.f32.gmra.mxu0 %v388_v41  ;;  %v7264_v41 = vand.u32 4294901760, %v4416_v48  ;;  %v1364_v18 = vand.u32 4294901760, %v1363_v13  ;;  %7266 = vst [vmem:[#allocation30_spill] sm:$0xff] %v4772_v62  ;;  %v3763_v48 = vsel %vm107_vm5, 1.0, %v7028_v9 }
  0x5a   :  { %594 = vmatmul.f32.gmra.mxu1 %v4609_v21  ;;  %845 = vmatmul.f32.gmra.mxu3 %v386_v49  ;;  %v396_v49 = vand.u32 4294901760, %v395_v42  ;;  %v4784_v13 = vsub.f32 %v3763_v48, %v3763_v48  ;;  %v296_v48 = vld [vmem:[#allocation2 + $0x90] sm:$0xff] }
  0x5b   :  { %970 = vmatpush.msrb.mxu0 %v7264_v41  ;;  %3849 = vmatpush.msk.msrb.mxu1 %vm7265_vm4, %v7044_v8  ;;  %v7267_v41 = vand.u32 4294901760, %v4431_v63  ;;  %v403_v63 = vsub.f32 %v401_v26, %v402_v37  ;;  %vm102_vm4 = vcmp.eq.s32.totalorder %v4959_v54, %v4111_v6 }
  0x5c   :  { %1365 = vmatpush.msrb.mxu3 %v1364_v18  ;;  %v7021_v42 = vand.u32 4294901760, %v4784_v13  ;;  %v409_v18 = vsub.f32 %v294_v31, %v4772_v62 }
  0x5d   :  { %721 = vmatmul.f32.gmra.mxu2 %v385_v56  ;;  %974 = vmatpush.msrb.mxu0 %v7267_v41  ;;  %v7269_v56 = vand.u32 4294901760, %v4443_v19  ;;  %v4804_v41 = vadd.s32 176, %v4094_v1 }
  0x5e   :  { %3850 = vmatpush.msk.msrb.mxu1 %vm7268_vm6, %v7044_v8  ;;  %v1369_v19 = vsub.f32 %v4784_v13, %v7021_v42  ;;  %vm101_vm6 = vcmp.eq.s32.totalorder %v4988_v43, %v4111_v6  ;;  %v7305_v43 = vld [vmem:[#allocation14_spill] sm:$0xff] }
  0x5f   :  { %978 = vmatpush.msrb.mxu0 %v7269_v56  ;;  %7271 = vst [vmem:[#allocation31_spill] sm:$0xff] %v4804_v41  ;;  %vm106_vm9 = vcmp.eq.s32.totalorder %v4804_v41, %v4111_v6  ;;  %v4813_v56 = vand.u32 4294901760, %v296_v48 }
  0x60   :  { %3851 = vmatpush.msk.msrb.mxu1 %vm7270_vm7, %v7044_v8  ;;  %v1370_v31 = vand.u32 4294901760, %v1369_v19  ;;  %v3762_v42 = vsel %vm106_vm9, 1.0, %v7028_v9  ;;  %3861 = vmatpush.msk.msrb.mxu2 %vm106_vm9, %v7044_v8  ;;  %vm100_vm7 = vcmp.eq.s32.totalorder %v5015_v30, %v4111_v6 }
  0x61   :  { %1485 = vmatpush.msra.mxu0 %v4489_v59  ;;  %7273 = vst [vmem:[#allocation32_spill] sm:$0xff] %v4813_v56 }
  0x62   :  { %397 = vmatmul.f32.gmra.mxu0 %v396_v49  ;;  %598 = vmatmul.f32.gmra.mxu1 %v4656_v33  ;;  %v410_v49 = vand.u32 4294901760, %v409_v18  ;;  %v4921_v33 = vadd.s32 152, %v4094_v1 }
  0x63   :  { %851 = vmatmul.f32.gmra.mxu3 %v394_v55  ;;  %3868 = vmatpush.msk.msra.mxu1 %vm7272_vm8, %v7044_v8  ;;  %v404_v55 = vand.u32 4294901760, %v403_v63 }
  0x64   :  { %1488 = vmatpush.msra.mxu0 %v4534_v39  ;;  %1371 = vmatpush.msrb.mxu3 %v1370_v31  ;;  %v411_v19 = vsub.f32 %v409_v18, %v410_v49  ;;  %v417_v31 = vsub.f32 %v296_v48, %v4813_v56  ;;  %7279 = vst [vmem:[#allocation37_spill] sm:$0xff] %v4921_v33 }
  0x65   :  { %726 = vmatmul.f32.gmra.mxu2 %v393_v53  ;;  %3869 = vmatpush.msk.msra.mxu1 %vm114_vm14, %v7044_v8  ;;  %v4827_v53 = vsub.f32 %v3762_v42, %v3762_v42  ;;  %v298_v42 = vld [vmem:[#allocation2 + $0xa0] sm:$0xff]  ;;  %vm103_vm3 = vcmp.eq.s32.totalorder %v4921_v33, %v4111_v6  ;;  %v293_v33 = vld [vmem:[#allocation2 + $0x78] sm:$0xff] }
  0x66   :  { %1491 = vmatpush.msra.mxu0 %v4543_v25  ;;  %v4854_v10 = vand.u32 4294901760, %v298_v42  ;;  %3862 = vmatpush.msk.msrb.mxu2 %vm105_vm10, %v7044_v8  ;;  %v5386_v22 = vand.u32 4294901760, %v293_v33 }
  0x67   :  { %3870 = vmatpush.msk.msra.mxu1 %vm113_vm15, %v7044_v8  ;;  %v7025_v63 = vand.u32 4294901760, %v4827_v53 }
  0x68   :  { %1494 = vmatpush.msra.mxu0 %v4559_v46  ;;  %7275 = vst [vmem:[#allocation34_spill] sm:$0xff] %v4854_v10  ;;  %3863 = vmatpush.msk.msrb.mxu2 %vm104_vm11, %v7044_v8  ;;  %v5396_v60 = vsub.f32 %v293_v33, %v5386_v22 }
  0x69   :  { %3871 = vmatpush.msk.msra.mxu1 %vm112_vm13, %v7044_v8  ;;  %v1375_v52 = vsub.f32 %v4827_v53, %v7025_v63  ;;  %v3761_v63 = vsel %vm105_vm10, 1.0, %v7028_v9 }
  0x6a   :  { %405 = vmatmul.f32.gmra.mxu0 %v404_v55  ;;  %602 = vmatmul.f32.gmra.mxu1 %v4698_v12  ;;  %v418_v55 = vand.u32 4294901760, %v417_v31 }
  0x6b   :  { %857 = vmatmul.f32.gmra.mxu3 %v402_v37  ;;  %3872 = vmatpush.msk.msra.mxu1 %vm111_vm12, %v7044_v8  ;;  %v1376_v48 = vand.u32 4294901760, %v1375_v52  ;;  %v412_v37 = vand.u32 4294901760, %v411_v19  ;;  %v4865_v52 = vsub.f32 %v3761_v63, %v3761_v63  ;;  %v300_v63 = vld [vmem:[#allocation2 + $0xb0] sm:$0xff] }
  0x6c   :  { %1497 = vmatpush.msra.mxu0 %v4595_v38  ;;  %v419_v19 = vsub.f32 %v417_v31, %v418_v55  ;;  %v4892_v9 = vand.u32 4294901760, %v300_v63  ;;  %3864 = vmatpush.msk.msrb.mxu2 %vm103_vm3, %v7044_v8 }
  0x6d   :  { %731 = vmatmul.f32.gmra.mxu2 %v401_v26  ;;  %1377 = vmatpush.msrb.mxu3 %v1376_v48  ;;  %v7030_v26 = vand.u32 4294901760, %v4865_v52  ;;  %v425_v48 = vsub.f32 %v298_v42, %v4854_v10 }
  0x6e   :  { %1500 = vmatpush.msra.mxu0 %v4660_v32  ;;  %3873 = vmatpush.msk.msra.mxu1 %vm110_vm0, %v7044_v8  ;;  %7277 = vst [vmem:[#allocation36_spill] sm:$0xff] %v4892_v9 }
  0x6f   :  { %v1381_v28 = vsub.f32 %v4865_v52, %v7030_v26  ;;  %v7278_v26 = vmov 0.0  }
  0x70   :  { %3874 = vmatpush.msk.msra.mxu1 %vm109_vm1, %v7044_v8  ;;  %1503 = vmatpush.msra.mxu0 %v4700_v14 }
  0x71   :  { %v1382_v42 = vand.u32 4294901760, %v1381_v28 }
  0x72   :  { %413 = vmatmul.f32.gmra.mxu0 %v412_v37  ;;  %606 = vmatmul.f32.gmra.mxu1 %v4731_v0  ;;  %v426_v37 = vand.u32 4294901760, %v425_v48  ;;  %v3760_v0 = vsel %vm104_vm11, 1.0, %v7278_v26 }
  0x73   :  { %863 = vmatmul.f32.gmra.mxu3 %v410_v49  ;;  %3875 = vmatpush.msk.msra.mxu1 %vm108_vm2, %v7044_v8  ;;  %v420_v49 = vand.u32 4294901760, %v419_v19  ;;  %v4903_v28 = vsub.f32 %v3760_v0, %v3760_v0  ;;  %v302_v0 = vld [vmem:[#allocation2 + $0xc0] sm:$0xff] }
  0x74   :  { %1506 = vmatpush.msra.mxu0 %v4741_v17  ;;  %1383 = vmatpush.msrb.mxu3 %v1382_v42  ;;  %v427_v19 = vsub.f32 %v425_v48, %v426_v37  ;;  %v433_v42 = vsub.f32 %v300_v63, %v4892_v9 }
  0x75   :  { %736 = vmatmul.f32.gmra.mxu2 %v409_v18  ;;  %3876 = vmatpush.msk.msra.mxu1 %vm107_vm5, %v7044_v8  ;;  %v7039_v18 = vand.u32 4294901760, %v4903_v28 }
  0x76   :  { %1509 = vmatpush.msra.mxu0 %v4784_v13 }
  0x77   :  { %3877 = vmatpush.msk.msra.mxu1 %vm106_vm9, %v7044_v8  ;;  %v1387_v12 = vsub.f32 %v4903_v28, %v7039_v18  ;;  %v3759_v18 = vsel %vm103_vm3, 1.0, %v7278_v26 }
  0x78   :  { %1512 = vmatpush.msra.mxu0 %v4827_v53 }
  0x79   :  { %3878 = vmatpush.msk.msra.mxu1 %vm105_vm10, %v7044_v8  ;;  %v1388_v63 = vand.u32 4294901760, %v1387_v12  ;;  %v4941_v12 = vsub.f32 %v3759_v18, %v3759_v18 }
  0x7a   :  { %421 = vmatmul.f32.gmra.mxu0 %v420_v49  ;;  %610 = vmatmul.f32.gmra.mxu1 %v4772_v62  ;;  %v434_v49 = vand.u32 4294901760, %v433_v42  ;;  %v4930_v62 = vand.u32 4294901760, %v302_v0 }
  0x7b   :  { %869 = vmatmul.f32.gmra.mxu3 %v418_v55  ;;  %v428_v55 = vand.u32 4294901760, %v427_v19  ;;  %1515 = vmatpush.msra.mxu0 %v4865_v52 }
  0x7c   :  { %1389 = vmatpush.msrb.mxu3 %v1388_v63  ;;  %3879 = vmatpush.msk.msra.mxu1 %vm104_vm11, %v7044_v8  ;;  %v435_v19 = vsub.f32 %v433_v42, %v434_v49  ;;  %v441_v63 = vsub.f32 %v302_v0, %v4930_v62 }
  0x7d   :  { %741 = vmatmul.f32.gmra.mxu2 %v417_v31  ;;  %1518 = vmatpush.msra.mxu0 %v4903_v28  ;;  %v7048_v31 = vand.u32 4294901760, %v4941_v12 }
  0x7e   :  { %3880 = vmatpush.msk.msra.mxu1 %vm103_vm3, %v7044_v8  ;;  %v436_v8 = vand.u32 4294901760, %v435_v19  ;;  %v442_v21 = vand.u32 4294901760, %v441_v63 }
  0x7f   :  { %v1393_v18 = vsub.f32 %v4941_v12, %v7048_v31  ;;  %1521 = vmatpush.msra.mxu0 %v4941_v12  ;;  %v7281_v31 = vmov 1.0  }
  0x80   :  { %3881 = vmatpush.msk.msra.mxu1 %vm102_vm4, %v7281_v31  ;;  %3865 = vmatpush.msk.msrb.mxu2 %vm102_vm4, %v7281_v31 }
  0x81   :  { %v1394_v0 = vand.u32 4294901760, %v1393_v18 }
  0x82   :  { %429 = vmatmul.f32.gmra.mxu0 %v428_v55  ;;  %614 = vmatmul.f32.gmra.mxu1 %v4813_v56  ;;  %v4962_v55 = vand.u32 4294901760, %v304_v58  ;;  %v443_v56 = vsub.f32 %v441_v63, %v442_v21 }
  0x83   :  { %875 = vmatmul.f32.gmra.mxu3 %v426_v37  ;;  %v3758_v37 = vsel %vm102_vm4, 1.0, %v7278_v26  ;;  %3882 = vmatpush.msk.msra.mxu1 %vm101_vm6, %v7281_v31 }
  0x84   :  { %1395 = vmatpush.msrb.mxu3 %v1394_v0  ;;  %v4978_v18 = vsub.f32 %v3758_v37, %v3758_v37  ;;  %3866 = vmatpush.msk.msrb.mxu2 %vm101_vm6, %v7281_v31 }
  0x85   :  { %746 = vmatmul.f32.gmra.mxu2 %v425_v48  ;;  %v449_v48 = vsub.f32 %v304_v58, %v4962_v55  ;;  %v444_v58 = vand.u32 4294901760, %v443_v56  ;;  %3883 = vmatpush.msk.msra.mxu1 %vm100_vm7, %v7281_v31 }
  0x86   :  { %v7057_v19 = vand.u32 4294901760, %v4978_v18  ;;  %1524 = vmatpush.msra.mxu0 %v4978_v18  ;;  %3867 = vmatpush.msk.msrb.mxu2 %vm100_vm7, %v7281_v31 }
  0x87   :  { %v450_v37 = vand.u32 4294901760, %v449_v48 }
  0x88   :  { %v1399_v0 = vsub.f32 %v4978_v18, %v7057_v19 }
  0x89   :  { %v451_v56 = vsub.f32 %v449_v48, %v450_v37 }
  0x8a   :  { %437 = vmatmul.f32.gmra.mxu0 %v436_v8  ;;  %618 = vmatmul.f32.gmra.mxu1 %v4854_v10  ;;  %v1400_v34 = vand.u32 4294901760, %v1399_v0  ;;  %v4992_v8 = vand.u32 4294901760, %v306_v44 }
  0x8b   :  { %881 = vmatmul.f32.gmra.mxu3 %v434_v49  ;;  %v3757_v49 = vsel %vm101_vm6, 1.0, %v7278_v26 }
  0x8c   :  { %1401 = vmatpush.msrb.mxu3 %v1400_v34  ;;  %v457_v0 = vsub.f32 %v306_v44, %v4992_v8  ;;  %v308_v34 = vld [vmem:[#allocation2 + $0xf0] sm:$0xff] }
  0x8d   :  { %751 = vmatmul.f32.gmra.mxu2 %v433_v42  ;;  %v5006_v42 = vsub.f32 %v3757_v49, %v3757_v49  ;;  %v452_v49 = vand.u32 4294901760, %v451_v56  ;;  %v5018_v27 = vand.u32 4294901760, %v308_v34 }
  0x8f   :  { %v7064_v19 = vand.u32 4294901760, %v5006_v42  ;;  %1527 = vmatpush.msra.mxu0 %v5006_v42 }
  0x91   :  { %v1405_v10 = vsub.f32 %v5006_v42, %v7064_v19  ;;  %v465_v19 = vsub.f32 %v308_v34, %v5018_v27 }
  0x92   :  { %445 = vmatmul.f32.gmra.mxu0 %v444_v58  ;;  %622 = vmatmul.f32.gmra.mxu1 %v4892_v9  ;;  %v458_v58 = vand.u32 4294901760, %v457_v0  ;;  %v7285_v9 = vand.u32 4294901760, %v4534_v39 }
  0x93   :  { %887 = vmatmul.f32.gmra.mxu3 %v442_v21  ;;  %v1406_v44 = vand.u32 4294901760, %v1405_v10  ;;  %v3756_v21 = vsel %vm100_vm7, 1.0, %v7278_v26  ;;  %v310_v26 = vld [vmem:[#allocation2 + $0x100] sm:$0xff] }
  0x94   :  { %v5034_v10 = vsub.f32 %v3756_v21, %v3756_v21  ;;  %v459_v56 = vsub.f32 %v457_v0, %v458_v58  ;;  %v5049_v21 = vand.u32 4294901760, %v310_v26 }
  0x95   :  { %756 = vmatmul.f32.gmra.mxu2 %v441_v63  ;;  %1407 = vmatpush.msrb.mxu3 %v1406_v44  ;;  %v7284_v63 = vand.u32 4294901760, %v4489_v59  ;;  %v7286_v59 = vand.u32 4294901760, %v4543_v25  ;;  %v7288_v25 = vand.u32 4294901760, %v4595_v38  ;;  %v279_v38 = vld [vmem:[#allocation2 + $0x8] sm:$0xff] }
  0x96   :  { %v1410_v1 = vand.u32 4294901760, %v5034_v10  ;;  %1530 = vmatpush.msra.mxu0 %v5034_v10  ;;  %v460_v34 = vand.u32 4294901760, %v459_v56 }
  0x97   :  { %1755 = vmatpush.msra.mxu2 %v7284_v63 }
  0x98   :  { %v1411_v44 = vsub.f32 %v5034_v10, %v1410_v1 }
  0x99   :  { %1759 = vmatpush.msra.mxu2 %v7285_v9  ;;  %v7287_v9 = vand.u32 4294901760, %v4559_v46  ;;  %v7289_v46 = vand.u32 4294901760, %v4660_v32  ;;  %v7291_v32 = vand.u32 4294901760, %v4741_v17 }
  0x9a   :  { %453 = vmatmul.f32.gmra.mxu0 %v452_v49  ;;  %626 = vmatmul.f32.gmra.mxu1 %v4930_v62  ;;  %v466_v49 = vand.u32 4294901760, %v465_v19  ;;  %v1412_v39 = vand.u32 4294901760, %v1411_v44 }
  0x9b   :  { %893 = vmatmul.f32.gmra.mxu3 %v450_v37  ;;  %1763 = vmatpush.msra.mxu2 %v7286_v59 }
  0x9c   :  { %1413 = vmatpush.msrb.mxu3 %v1412_v39  ;;  %v467_v37 = vsub.f32 %v465_v19, %v466_v49 }
  0x9d   :  { %761 = vmatmul.f32.gmra.mxu2 %v449_v48  ;;  %v473_v48 = vsub.f32 %v310_v26, %v5049_v21  ;;  %v7290_v26 = vand.u32 4294901760, %v4700_v14  ;;  %v7292_v14 = vand.u32 4294901760, %v4784_v13  ;;  %v7294_v13 = vand.u32 4294901760, %v4865_v52  ;;  %v5124_v52 = vld [vmem:[%s6995_s1] ss:$0 sm:$0xff] }
  0x9e   :  { %1767 = vmatpush.msra.mxu2 %v7287_v9  ;;  %3884 = vmatpush.msk.msra.mxu3 %vm7272_vm8, %v7281_v31  ;;  %v468_v63 = vand.u32 4294901760, %v467_v37 }
  0x9f   :  { %v474_v56 = vand.u32 4294901760, %v473_v48 }
  0xa0   :  { %1771 = vmatpush.msra.mxu2 %v7288_v25  ;;  %3885 = vmatpush.msk.msra.mxu3 %vm114_vm14, %v7281_v31  ;;  %vm195_vm14 = vcmp.eq.s32.totalorder %v4103_v4, %v5124_v52 }
  0xa2   :  { %461 = vmatmul.f32.gmra.mxu0 %v460_v34  ;;  %630 = vmatmul.f32.gmra.mxu1 %v4962_v55  ;;  %v281_v34 = vld [vmem:[#allocation2 + $0x18] sm:$0xff] }
  0xa3   :  { %899 = vmatmul.f32.gmra.mxu3 %v458_v58  ;;  %1775 = vmatpush.msra.mxu2 %v7289_v46  ;;  %v5079_v58 = vand.u32 4294901760, %v279_v38  ;;  %v5108_v39 = vand.u32 4294901760, %v281_v34  ;;  %v283_v46 = vld [vmem:[#allocation2 + $0x28] sm:$0xff] }
  0xa4   :  { %3886 = vmatpush.msk.msra.mxu3 %vm113_vm15, %v7281_v31  ;;  %vm194_vm15 = vcmp.eq.s32.totalorder %v4106_v5, %v5124_v52 }
  0xa5   :  { %766 = vmatmul.f32.gmra.mxu2 %v457_v0  ;;  %v475_v0 = vsub.f32 %v473_v48, %v474_v56  ;;  %v5093_v44 = vsub.f32 %v279_v38, %v5079_v58  ;;  %v5130_v37 = vsub.f32 %v281_v34, %v5108_v39 }
  0xa6   :  { %1779 = vmatpush.msra.mxu2 %v7290_v26  ;;  %3887 = vmatpush.msk.msra.mxu3 %vm112_vm13, %v7281_v31  ;;  %v7297_v26 = vand.u32 4294901760, %v4978_v18  ;;  %vm196_vm13 = vcmp.eq.s32.totalorder %v4100_v3, %v5124_v52  ;;  %v7298_v18 = vand.u32 4294901760, %v5006_v42 }
  0xa7   :  { %v476_v17 = vand.u32 4294901760, %v475_v0  ;;  %v5148_v0 = vand.u32 4294901760, %v283_v46 }
  0xa8   :  { %1783 = vmatpush.msra.mxu2 %v7291_v32  ;;  %3888 = vmatpush.msk.msra.mxu3 %vm111_vm12, %v7281_v31  ;;  %vm197_vm12 = vcmp.eq.s32.totalorder %v4097_v2, %v5124_v52 }
  0xaa   :  { %469 = vmatmul.f32.gmra.mxu0 %v468_v63  ;;  %634 = vmatmul.f32.gmra.mxu1 %v4992_v8  ;;  %v7296_v63 = vand.u32 4294901760, %v4941_v12  ;;  %v7073_v12 = vand.u32 4294901760, %v5130_v37 }
  0xab   :  { %905 = vmatmul.f32.gmra.mxu3 %v466_v49  ;;  %1787 = vmatpush.msra.mxu2 %v7292_v14  ;;  %v7293_v49 = vand.u32 4294901760, %v4827_v53  ;;  %v7295_v53 = vand.u32 4294901760, %v4903_v28 }
  0xac   :  { %3889 = vmatpush.msk.msra.mxu3 %vm110_vm0, %v7281_v31  ;;  %v1192_v34 = vsub.f32 %v5130_v37, %v7073_v12  ;;  %vm193_vm0 = vcmp.eq.s32.totalorder %v4114_v7, %v5124_v52 }
  0xad   :  { %771 = vmatmul.f32.gmra.mxu2 %v465_v19  ;;  %v7074_v19 = vand.u32 4294901760, %v5093_v44 }
  0xae   :  { %3890 = vmatpush.msk.msra.mxu3 %vm109_vm1, %v7281_v31  ;;  %v350_v59 = vpop.f32.mrf.mxu0  ;;  %1791 = vmatpush.msra.mxu2 %v7293_v49  ;;  %v5176_v49 = vsub.f32 %v283_v46, %v5148_v0  ;;  %vm192_vm1 = vcmp.eq.s32.totalorder %v4137_v11, %v5124_v52 }
  0xaf   :  { %v1184_v25 = vsub.f32 %v5093_v44, %v7074_v19 }
  0xb0   :  { %3891 = vmatpush.msk.msra.mxu3 %vm108_vm2, %v7281_v31  ;;  %1795 = vmatpush.msra.mxu2 %v7294_v13  ;;  %v285_v13 = vld [vmem:[#allocation2 + $0x38] sm:$0xff]  ;;  %v7071_v6 = vand.u32 4294901760, %v5176_v49  ;;  %vm191_vm2 = vcmp.eq.s32.totalorder %v4162_v16, %v5124_v52 }
  0xb1   :  { %v1185_v32 = vand.u32 4294901760, %v1184_v25  ;;  %v5204_v10 = vand.u32 4294901760, %v285_v13 }
  0xb2   :  { %477 = vmatmul.f32.gmra.mxu0 %v476_v17  ;;  %3892 = vmatpush.msk.msra.mxu3 %vm107_vm5, %v7281_v31  ;;  %vm190_vm5 = vcmp.eq.s32.totalorder %v4173_v20, %v5124_v52 }
  0xb3   :  { %638 = vmatmul.f32.gmra.mxu1 %v5018_v27  ;;  %911 = vmatmul.f32.gmra.mxu3 %v474_v56 }
  0xb4   :  { %3893 = vmatpush.msk.msra.mxu3 %vm106_vm9, %v7281_v31  ;;  %1799 = vmatpush.msra.mxu2 %v7295_v53  ;;  %vm189_vm9 = vcmp.eq.s32.totalorder %v4189_v23, %v5124_v52 }
  0xb5   :  { %776 = vmatmul.f32.gmra.mxu2 %v473_v48  ;;  %v816_v9 = vpop.f32.mrf.mxu3 }
  0xb6   :  { %3894 = vmatpush.msk.msra.mxu3 %vm105_vm10, %v7281_v31  ;;  %v358_v28 = vpop.f32.mrf.mxu0  ;;  %1803 = vmatpush.msra.mxu2 %v7296_v63  ;;  %v1200_v63 = vsub.f32 %v5176_v49, %v7071_v6  ;;  %v291_v6 = vld [vmem:[#allocation2 + $0x68] sm:$0xff] }
  0xb7   :  { %v579_v56 = vpop.f32.mrf.mxu1  ;;  %v5344_v30 = vand.u32 4294901760, %v291_v6 }
  0xb8   :  { %3895 = vmatpush.msk.msra.mxu3 %vm104_vm11, %v7281_v31  ;;  %v580_v48 = vadd.f32 %v579_v56, %v350_v59  ;;  %v697_v38 = vpop.f32.mrf.mxu2  ;;  %1807 = vmatpush.msra.mxu2 %v7297_v26  ;;  %v5226_v56 = vsub.f32 %v285_v13, %v5204_v10 }
  0xba   :  { %980 = vmatmul.f32.vlgmr.msrb.gmra.mxu0 %v4392_v35  ;;  %3896 = vmatpush.msk.msra.mxu3 %vm103_vm3, %v7281_v31  ;;  %v698_v14 = vadd.f32 %v697_v38, %v580_v48  ;;  %v287_v38 = vld [vmem:[#allocation2 + $0x48] sm:$0xff] }
  0xbb   :  { %642 = vmatmul.f32.gmra.mxu1 %v5049_v21  ;;  %1415 = vmatmul.f32.vlgmr.msrb.gmra.mxu3 %v5079_v58 }
  0xbc   :  { %3897 = vmatpush.msk.msra.mxu3 %vm102_vm4, %v7281_v31  ;;  %1811 = vmatpush.msra.mxu2 %v7298_v18  ;;  %v5164_v17 = vadd.f32 %v816_v9, %v698_v14  ;;  %v1201_v18 = vand.u32 4294901760, %v1200_v63 }
  0xbd   :  { %3900 = vmatpush.msk.msrb.mxu0 %vm197_vm12, %v7281_v31  ;;  %1186 = vmatmul.f32.vlgmr.msrb.gmra.mxu2 %v1185_v32  ;;  %v822_v59 = vpop.f32.mrf.mxu3 }
  0xbe   :  { %3898 = vmatpush.msk.msra.mxu3 %vm101_vm6, %v7281_v31  ;;  %v366_v42 = vpop.f32.mrf.mxu0  ;;  %1815 = vmatpush.msra.mxu2 %v1410_v1  ;;  %v1193_v1 = vand.u32 4294901760, %v1192_v34  ;;  %v5248_v34 = vand.u32 4294901760, %v287_v38  ;;  %vm184_vm6 = vcmp.eq.s32.totalorder %v7305_v43, %v5124_v52  ;;  %v301_v43 = vld [vmem:[#allocation2 + $0xb8] sm:$0xff] }
  0xbf   :  { %3901 = vmatpush.msk.msrb.mxu0 %vm196_vm13, %v7281_v31  ;;  %v583_v53 = vpop.f32.mrf.mxu1 }
  0xc0   :  { %3899 = vmatpush.msk.msra.mxu3 %vm100_vm7, %v7281_v31  ;;  %v584_v9 = vadd.f32 %v583_v53, %v358_v28  ;;  %v702_v25 = vpop.f32.mrf.mxu2 }
  0xc1   :  { %3902 = vmatpush.msk.msrb.mxu0 %vm195_vm14, %v7281_v31 }
  0xc2   :  { %3916 = vmatpush.msk.msrb.mxu3 %vm197_vm12, %v7281_v31  ;;  %984 = vmatmul.f32.gmra.mxu0 %v4453_v36  ;;  %v703_v46 = vadd.f32 %v702_v25, %v584_v9  ;;  %v5274_v9 = vsub.f32 %v287_v38, %v5248_v34 }
  0xc3   :  { %1081 = vmatmul.f32.vlgmr.msrb.gmra.mxu1 %v4392_v35  ;;  %1419 = vmatmul.f32.gmra.mxu3 %v5108_v39 }
  0xc4   :  { %3917 = vmatpush.msk.msrb.mxu3 %vm196_vm13, %v7281_v31  ;;  %3903 = vmatpush.msk.msrb.mxu0 %vm194_vm15, %v7281_v31  ;;  %v5218_v28 = vadd.f32 %v822_v59, %v703_v46  ;;  %v7070_v59 = vand.u32 4294901760, %v5226_v56 }
  0xc5   :  { %1194 = vmatmul.f32.gmra.mxu2 %v1193_v1  ;;  %v828_v35 = vpop.f32.mrf.mxu3  ;;  %v289_v1 = vld [vmem:[#allocation2 + $0x58] sm:$0xff] }
  0xc6   :  { %3918 = vmatpush.msk.msrb.mxu3 %vm195_vm14, %v7281_v31  ;;  %v374_v48 = vpop.f32.mrf.mxu0  ;;  %3904 = vmatpush.msk.msrb.mxu0 %vm193_vm0, %v7281_v31  ;;  %v1208_v53 = vsub.f32 %v5226_v56, %v7070_v59 }
  0xc7   :  { %v587_v26 = vpop.f32.mrf.mxu1 }
  0xc8   :  { %3919 = vmatpush.msk.msrb.mxu3 %vm194_vm15, %v7281_v31  ;;  %v588_v32 = vadd.f32 %v587_v26, %v366_v42  ;;  %v707_v14 = vpop.f32.mrf.mxu2  ;;  %3905 = vmatpush.msk.msrb.mxu0 %vm192_vm1, %v7281_v31  ;;  %v7300_v26 = vld [vmem:[#allocation20_spill] sm:$0xff] }
  0xca   :  { %988 = vmatmul.f32.gmra.mxu0 %v4499_v61  ;;  %3920 = vmatpush.msk.msrb.mxu3 %vm193_vm0, %v7281_v31  ;;  %v708_v13 = vadd.f32 %v707_v14, %v588_v32  ;;  %v1209_v32 = vand.u32 4294901760, %v1208_v53  ;;  %v7072_v14 = vand.u32 4294901760, %v5274_v9  ;;  %v7302_v53 = vld [vmem:[#allocation12_spill] sm:$0xff] }
  0xcb   :  { %1085 = vmatmul.f32.gmra.mxu1 %v4453_v36  ;;  %1423 = vmatmul.f32.gmra.mxu3 %v5148_v0  ;;  %vm186_vm3 = vcmp.eq.s32.totalorder %v7302_v53, %v5124_v52 }
  0xcc   :  { %3921 = vmatpush.msk.msrb.mxu3 %vm192_vm1, %v7281_v31  ;;  %3906 = vmatpush.msk.msrb.mxu0 %vm191_vm2, %v7281_v31  ;;  %v5266_v42 = vadd.f32 %v828_v35, %v708_v13  ;;  %v7299_v35 = vld [vmem:[#allocation10_spill] sm:$0xff] }
  0xcd   :  { %1202 = vmatmul.f32.gmra.mxu2 %v1201_v18  ;;  %v834_v36 = vpop.f32.mrf.mxu3  ;;  %vm188_vm10 = vcmp.eq.s32.totalorder %v7299_v35, %v5124_v52  ;;  %v5296_v18 = vand.u32 4294901760, %v289_v1 }
  0xce   :  { %3922 = vmatpush.msk.msrb.mxu3 %vm191_vm2, %v7281_v31  ;;  %v382_v25 = vpop.f32.mrf.mxu0  ;;  %3907 = vmatpush.msk.msrb.mxu0 %vm190_vm5, %v7281_v31 }
  0xcf   :  { %v591_v46 = vpop.f32.mrf.mxu1 }
  0xd0   :  { %3923 = vmatpush.msk.msrb.mxu3 %vm190_vm5, %v7281_v31  ;;  %v592_v63 = vadd.f32 %v591_v46, %v374_v48  ;;  %v712_v38 = vpop.f32.mrf.mxu2  ;;  %3908 = vmatpush.msk.msrb.mxu0 %vm189_vm9, %v7281_v31  ;;  %v7301_v48 = vld [vmem:[#allocation11_spill] sm:$0xff] }
  0xd1   :  { %vm187_vm11 = vcmp.eq.s32.totalorder %v7301_v48, %v5124_v52 }
  0xd2   :  { %992 = vmatmul.f32.gmra.mxu0 %v7300_v26  ;;  %3924 = vmatpush.msk.msrb.mxu3 %vm189_vm9, %v7281_v31  ;;  %v713_v13 = vadd.f32 %v712_v38, %v592_v63  ;;  %v5322_v38 = vsub.f32 %v289_v1, %v5296_v18  ;;  %v7303_v1 = vld [vmem:[#allocation13_spill] sm:$0xff] }
  0xd3   :  { %1089 = vmatmul.f32.gmra.mxu1 %v4499_v61  ;;  %1427 = vmatmul.f32.gmra.mxu3 %v5204_v10  ;;  %v1216_v61 = vsub.f32 %v5274_v9, %v7072_v14  ;;  %vm185_vm4 = vcmp.eq.s32.totalorder %v7303_v1, %v5124_v52  ;;  %v7304_v14 = vld [vmem:[#allocation22_spill] sm:$0xff] }
  0xd4   :  { %3909 = vmatpush.msk.msrb.mxu0 %vm188_vm10, %v7281_v31  ;;  %3925 = vmatpush.msk.msrb.mxu3 %vm188_vm10, %v7281_v31  ;;  %v5316_v46 = vadd.f32 %v834_v36, %v713_v13  ;;  %v7083_v19 = vand.u32 4294901760, %v5322_v38 }
  0xd5   :  { %1210 = vmatmul.f32.gmra.mxu2 %v1209_v32  ;;  %v840_v63 = vpop.f32.mrf.mxu3  ;;  %v1217_v12 = vand.u32 4294901760, %v1216_v61 }
  0xd6   :  { %3910 = vmatpush.msk.msrb.mxu0 %vm187_vm11, %v7281_v31  ;;  %v390_v59 = vpop.f32.mrf.mxu0  ;;  %3926 = vmatpush.msk.msrb.mxu3 %vm187_vm11, %v7281_v31 }
  0xd7   :  { %v595_v36 = vpop.f32.mrf.mxu1 }
  0xd8   :  { %3911 = vmatpush.msk.msrb.mxu0 %vm186_vm3, %v7281_v31  ;;  %v596_v32 = vadd.f32 %v595_v36, %v382_v25  ;;  %v717_v13 = vpop.f32.mrf.mxu2  ;;  %3927 = vmatpush.msk.msrb.mxu3 %vm186_vm3, %v7281_v31  ;;  %v7306_v25 = vld [vmem:[#allocation15_spill] sm:$0xff] }
  0xd9   :  { %vm183_vm7 = vcmp.eq.s32.totalorder %v7306_v25, %v5124_v52  ;;  %v1996_v52 = vld [vmem:[#allocation4 + $0x50] sm:$0xff] }
  0xda   :  { %996 = vmatmul.f32.gmra.mxu0 %v7304_v14  ;;  %v718_v54 = vadd.f32 %v717_v13, %v596_v32  ;;  %3928 = vmatpush.msk.msrb.mxu3 %vm185_vm4, %v7281_v31  ;;  %v5366_v32 = vsub.f32 %v291_v6, %v5344_v30 }
  0xdb   :  { %1093 = vmatmul.f32.gmra.mxu1 %v7300_v26  ;;  %1431 = vmatmul.f32.gmra.mxu3 %v5248_v34  ;;  %v1224_v26 = vsub.f32 %v5322_v38, %v7083_v19 }
  0xdc   :  { %3912 = vmatpush.msk.msrb.mxu0 %vm185_vm4, %v7281_v31  ;;  %v5360_v61 = vadd.f32 %v840_v63, %v718_v54  ;;  %3929 = vmatpush.msk.msrb.mxu3 %vm184_vm6, %v7281_v31  ;;  %v7307_v63 = vld [vmem:[#allocation24_spill] sm:$0xff]  ;;  %v7100_v15 = vand.u32 4294901760, %v5366_v32 }
  0xdd   :  { %1218 = vmatmul.f32.gmra.mxu2 %v1217_v12  ;;  %v846_v36 = vpop.f32.mrf.mxu3  ;;  %v1225_v19 = vand.u32 4294901760, %v1224_v26 }
  0xde   :  { %3913 = vmatpush.msk.msrb.mxu0 %vm184_vm6, %v7281_v31  ;;  %3930 = vmatpush.msk.msrb.mxu3 %vm183_vm7, %v7281_v31 }
  0xdf   :  { %v398_v13 = vpop.f32.mrf.mxu0  ;;  %v599_v54 = vpop.f32.mrf.mxu1 }
  0xe0   :  { %3914 = vmatpush.msk.msrb.mxu0 %vm183_vm7, %v7281_v31  ;;  %v600_v12 = vadd.f32 %v599_v54, %v390_v59  ;;  %v722_v6 = vpop.f32.mrf.mxu2  ;;  %v1232_v54 = vsub.f32 %v5366_v32, %v7100_v15 }
  0xe2   :  { %1000 = vmatmul.f32.gmra.mxu0 %v7307_v63  ;;  %v723_v41 = vadd.f32 %v722_v6, %v600_v12  ;;  %v7308_v6 = vld [vmem:[#allocation26_spill] sm:$0xff] }
  0xe3   :  { %1097 = vmatmul.f32.gmra.mxu1 %v7304_v14  ;;  %1435 = vmatmul.f32.gmra.mxu3 %v5296_v18  ;;  %v1233_v14 = vand.u32 4294901760, %v1232_v54 }
  0xe4   :  { %v5390_v45 = vadd.f32 %v846_v36, %v723_v41  ;;  %v7107_v41 = vand.u32 4294901760, %v5396_v60  ;;  %v5400_v36 = vand.u32 4294901760, %v295_v29 }
  0xe5   :  { %1226 = vmatmul.f32.gmra.mxu2 %v1225_v19 }
  0xe6   :  { %v852_v59 = vpop.f32.mrf.mxu3  ;;  %7309 = vst [vmem:[#allocation10_spill] sm:$0xff] %v5400_v36 }
  0xe7   :  { %v406_v26 = vpop.f32.mrf.mxu0  ;;  %v603_v57 = vpop.f32.mrf.mxu1 }
  0xe8   :  { %v604_v47 = vadd.f32 %v603_v57, %v398_v13  ;;  %v727_v12 = vpop.f32.mrf.mxu2  ;;  %v1240_v57 = vsub.f32 %v5396_v60, %v7107_v41  ;;  %v5410_v13 = vsub.f32 %v295_v29, %v5400_v36 }
  0xea   :  { %1004 = vmatmul.f32.gmra.mxu0 %v7308_v6  ;;  %v728_v19 = vadd.f32 %v727_v12, %v604_v47  ;;  %7310 = vst [vmem:[#allocation20_spill] sm:$0xff] %v5410_v13  ;;  %v7311_v12 = vld [vmem:[#allocation28_spill] sm:$0xff] }
  0xeb   :  { %1101 = vmatmul.f32.gmra.mxu1 %v7307_v63  ;;  %1439 = vmatmul.f32.gmra.mxu3 %v5344_v30  ;;  %v1241_v63 = vand.u32 4294901760, %v1240_v57 }
  0xec   :  { %v5404_v15 = vadd.f32 %v852_v59, %v728_v19  ;;  %v7112_v59 = vand.u32 4294901760, %v5410_v13  ;;  %v5414_v19 = vand.u32 4294901760, %v297_v50 }
  0xed   :  { %1234 = vmatmul.f32.gmra.mxu2 %v1233_v14 }
  0xee   :  { %v858_v33 = vpop.f32.mrf.mxu3  ;;  %7312 = vst [vmem:[#allocation11_spill] sm:$0xff] %v5414_v19 }
  0xef   :  { %v414_v54 = vpop.f32.mrf.mxu0  ;;  %v607_v40 = vpop.f32.mrf.mxu1 }
  0xf0   :  { %v608_v51 = vadd.f32 %v607_v40, %v406_v26  ;;  %v732_v47 = vpop.f32.mrf.mxu2  ;;  %v1248_v40 = vsub.f32 %v5410_v13, %v7112_v59  ;;  %v5424_v26 = vsub.f32 %v297_v50, %v5414_v19 }
  0xf2   :  { %1008 = vmatmul.f32.gmra.mxu0 %v7311_v12  ;;  %v733_v14 = vadd.f32 %v732_v47, %v608_v51  ;;  %7313 = vst [vmem:[#allocation22_spill] sm:$0xff] %v5424_v26  ;;  %v7314_v47 = vld [vmem:[#allocation30_spill] sm:$0xff] }
  0xf3   :  { %1105 = vmatmul.f32.gmra.mxu1 %v7308_v6  ;;  %1443 = vmatmul.f32.gmra.mxu3 %v5386_v22  ;;  %v1249_v6 = vand.u32 4294901760, %v1248_v40 }
  0xf4   :  { %v5418_v41 = vadd.f32 %v858_v33, %v733_v14  ;;  %v7116_v33 = vand.u32 4294901760, %v5424_v26  ;;  %v5428_v14 = vand.u32 4294901760, %v299_v24 }
  0xf5   :  { %1242 = vmatmul.f32.gmra.mxu2 %v1241_v63 }
  0xf6   :  { %v864_v29 = vpop.f32.mrf.mxu3  ;;  %7315 = vst [vmem:[#allocation24_spill] sm:$0xff] %v5428_v14 }
  0xf7   :  { %v422_v57 = vpop.f32.mrf.mxu0  ;;  %v611_v31 = vpop.f32.mrf.mxu1 }
  0xf8   :  { %v612_v25 = vadd.f32 %v611_v31, %v414_v54  ;;  %v737_v51 = vpop.f32.mrf.mxu2  ;;  %v1256_v31 = vsub.f32 %v5424_v26, %v7116_v33  ;;  %v5438_v54 = vsub.f32 %v299_v24, %v5428_v14  ;;  %v303_v26 = vld [vmem:[#allocation2 + $0xc8] sm:$0xff] }
  0xfa   :  { %1012 = vmatmul.f32.gmra.mxu0 %v7314_v47  ;;  %v738_v63 = vadd.f32 %v737_v51, %v612_v25  ;;  %7316 = vst [vmem:[#allocation26_spill] sm:$0xff] %v5438_v54  ;;  %v7317_v51 = vld [vmem:[#allocation32_spill] sm:$0xff] }
  0xfb   :  { %1109 = vmatmul.f32.gmra.mxu1 %v7311_v12  ;;  %1447 = vmatmul.f32.gmra.mxu3 %v5400_v36  ;;  %v1257_v12 = vand.u32 4294901760, %v1256_v31 }
  0xfc   :  { %v5432_v59 = vadd.f32 %v864_v29, %v738_v63  ;;  %v7123_v29 = vand.u32 4294901760, %v5438_v54  ;;  %v5442_v63 = vand.u32 4294901760, %v301_v43 }
  0xfd   :  { %1250 = vmatmul.f32.gmra.mxu2 %v1249_v6 }
  0xfe   :  { %v870_v50 = vpop.f32.mrf.mxu3  ;;  %7318 = vst [vmem:[#allocation28_spill] sm:$0xff] %v5442_v63 }
  0xff   :  { %v430_v40 = vpop.f32.mrf.mxu0  ;;  %v615_v1 = vpop.f32.mrf.mxu1 }
 0x100   :  { %v616_v53 = vadd.f32 %v615_v1, %v422_v57  ;;  %v742_v25 = vpop.f32.mrf.mxu2  ;;  %v1264_v1 = vsub.f32 %v5438_v54, %v7123_v29  ;;  %v5452_v57 = vsub.f32 %v301_v43, %v5442_v63  ;;  %v305_v54 = vld [vmem:[#allocation2 + $0xd8] sm:$0xff] }
 0x102   :  { %1016 = vmatmul.f32.gmra.mxu0 %v7317_v51  ;;  %v743_v6 = vadd.f32 %v742_v25, %v616_v53  ;;  %7320 = vst [vmem:[#allocation32_spill] sm:$0xff] %v5452_v57  ;;  %v7321_v25 = vld [vmem:[#allocation34_spill] sm:$0xff] }
 0x103   :  { %1113 = vmatmul.f32.gmra.mxu1 %v7314_v47  ;;  %1451 = vmatmul.f32.gmra.mxu3 %v5414_v19  ;;  %v1265_v47 = vand.u32 4294901760, %v1264_v1 }
 0x104   :  { %v5446_v33 = vadd.f32 %v870_v50, %v743_v6  ;;  %v7128_v50 = vand.u32 4294901760, %v5452_v57  ;;  %v5456_v6 = vand.u32 4294901760, %v303_v26 }
 0x105   :  { %1258 = vmatmul.f32.gmra.mxu2 %v1257_v12 }
 0x106   :  { %7319 = vst [vmem:[#allocation30_spill] sm:$0xff] %v5446_v33  ;;  %v876_v24 = vpop.f32.mrf.mxu3 }
 0x107   :  { %v438_v31 = vpop.f32.mrf.mxu0  ;;  %v619_v36 = vpop.f32.mrf.mxu1  ;;  %7322 = vst [vmem:[#allocation34_spill] sm:$0xff] %v5456_v6 }
 0x108   :  { %v620_v13 = vadd.f32 %v619_v36, %v430_v40  ;;  %v747_v53 = vpop.f32.mrf.mxu2  ;;  %v1272_v36 = vsub.f32 %v5452_v57, %v7128_v50  ;;  %v5466_v40 = vsub.f32 %v303_v26, %v5456_v6  ;;  %v307_v57 = vld [vmem:[#allocation2 + $0xe8] sm:$0xff] }
 0x10a   :  { %1020 = vmatmul.f32.gmra.mxu0 %v7321_v25  ;;  %v748_v12 = vadd.f32 %v747_v53, %v620_v13  ;;  %7324 = vst [vmem:[#allocation42_spill] sm:$0xff] %v5466_v40  ;;  %v7325_v53 = vld [vmem:[#allocation36_spill] sm:$0xff] }
 0x10b   :  { %1117 = vmatmul.f32.gmra.mxu1 %v7317_v51  ;;  %1455 = vmatmul.f32.gmra.mxu3 %v5428_v14  ;;  %v1273_v51 = vand.u32 4294901760, %v1272_v36 }
 0x10c   :  { %v5460_v29 = vadd.f32 %v876_v24, %v748_v12  ;;  %v7133_v24 = vand.u32 4294901760, %v5466_v40  ;;  %v5470_v12 = vand.u32 4294901760, %v305_v54 }
 0x10d   :  { %1266 = vmatmul.f32.gmra.mxu2 %v1265_v47 }
 0x10e   :  { %7323 = vst [vmem:[#allocation41_spill] sm:$0xff] %v5460_v29  ;;  %v882_v43 = vpop.f32.mrf.mxu3 }
 0x10f   :  { %v446_v1 = vpop.f32.mrf.mxu0  ;;  %v623_v19 = vpop.f32.mrf.mxu1  ;;  %7326 = vst [vmem:[#allocation36_spill] sm:$0xff] %v5470_v12 }
 0x110   :  { %v624_v33 = vadd.f32 %v623_v19, %v438_v31  ;;  %v752_v13 = vpop.f32.mrf.mxu2  ;;  %v1280_v19 = vsub.f32 %v5466_v40, %v7133_v24  ;;  %v5480_v31 = vsub.f32 %v305_v54, %v5470_v12  ;;  %v309_v24 = vld [vmem:[#allocation2 + $0xf8] sm:$0xff] }
 0x112   :  { %1024 = vmatmul.f32.gmra.mxu0 %v7325_v53  ;;  %v753_v47 = vadd.f32 %v752_v13, %v624_v33  ;;  %7327 = vst [vmem:[#allocation43_spill] sm:$0xff] %v5480_v31  ;;  %v5484_v13 = vand.u32 4294901760, %v307_v57 }
 0x113   :  { %1121 = vmatmul.f32.gmra.mxu1 %v7321_v25  ;;  %1459 = vmatmul.f32.gmra.mxu3 %v5442_v63  ;;  %v1281_v25 = vand.u32 4294901760, %v1280_v19 }
 0x114   :  { %v5474_v50 = vadd.f32 %v882_v43, %v753_v47  ;;  %v7138_v43 = vand.u32 4294901760, %v5480_v31  ;;  %7328 = vst [vmem:[#allocation44_spill] sm:$0xff] %v5484_v13 }
 0x115   :  { %1274 = vmatmul.f32.gmra.mxu2 %v1273_v51 }
 0x116   :  { %v888_v26 = vpop.f32.mrf.mxu3 }
 0x117   :  { %v454_v36 = vpop.f32.mrf.mxu0  ;;  %v627_v14 = vpop.f32.mrf.mxu1 }
 0x118   :  { %v628_v29 = vadd.f32 %v627_v14, %v446_v1  ;;  %v757_v33 = vpop.f32.mrf.mxu2  ;;  %v1288_v14 = vsub.f32 %v5480_v31, %v7138_v43  ;;  %v5494_v1 = vsub.f32 %v307_v57, %v5484_v13  ;;  %v311_v43 = vld [vmem:[#allocation2 + $0x108] sm:$0xff] }
 0x11a   :  { %1028 = vmatmul.f32.gmra.mxu0 %v4930_v62  ;;  %v758_v51 = vadd.f32 %v757_v33, %v628_v29  ;;  %7329 = vst [vmem:[#allocation45_spill] sm:$0xff] %v5494_v1  ;;  %v5498_v33 = vand.u32 4294901760, %v309_v24 }
 0x11b   :  { %1125 = vmatmul.f32.gmra.mxu1 %v7325_v53  ;;  %1463 = vmatmul.f32.gmra.mxu3 %v5456_v6  ;;  %v1289_v53 = vand.u32 4294901760, %v1288_v14  ;;  %v7330_v6 = vmov 0.0  }
 0x11c   :  { %v5488_v47 = vadd.f32 %v888_v26, %v758_v51  ;;  %v7143_v26 = vand.u32 4294901760, %v5494_v1 }
 0x11d   :  { %1282 = vmatmul.f32.gmra.mxu2 %v1281_v25 }
 0x11e   :  { %v894_v54 = vpop.f32.mrf.mxu3 }
 0x11f   :  { %v462_v19 = vpop.f32.mrf.mxu0  ;;  %v631_v40 = vpop.f32.mrf.mxu1 }
 0x120   :  { %v632_v63 = vadd.f32 %v631_v40, %v454_v36  ;;  %v762_v29 = vpop.f32.mrf.mxu2  ;;  %v1296_v40 = vsub.f32 %v5494_v1, %v7143_v26  ;;  %v5508_v36 = vsub.f32 %v309_v24, %v5498_v33  ;;  %v5518_v26 = vand.u32 4294901760, %v311_v43 }
 0x122   :  { %1032 = vmatmul.f32.gmra.mxu0 %v4962_v55  ;;  %v763_v25 = vadd.f32 %v762_v29, %v632_v63 }
 0x123   :  { %1129 = vmatmul.f32.gmra.mxu1 %v4930_v62  ;;  %1467 = vmatmul.f32.gmra.mxu3 %v5470_v12  ;;  %v3787_v62 = vsel %vm197_vm12, 1.0, %v7330_v6 }
 0x124   :  { %v5502_v51 = vadd.f32 %v894_v54, %v763_v25  ;;  %v5514_v29 = vsub.f32 %v3787_v62, %v3787_v62  ;;  %v7151_v25 = vand.u32 4294901760, %v5508_v36 }
 0x125   :  { %1290 = vmatmul.f32.gmra.mxu2 %v1289_v53  ;;  %v1297_v53 = vand.u32 4294901760, %v1296_v40 }
 0x126   :  { %v900_v57 = vpop.f32.mrf.mxu3  ;;  %v7152_v1 = vand.u32 4294901760, %v5514_v29  ;;  %2356 = vmatpush.msrb.mxu2 %v5514_v29  ;;  %v1304_v62 = vsub.f32 %v5508_v36, %v7151_v25 }
 0x127   :  { %v470_v14 = vpop.f32.mrf.mxu0  ;;  %v635_v31 = vpop.f32.mrf.mxu1 }
 0x128   :  { %v636_v63 = vadd.f32 %v635_v31, %v462_v19  ;;  %v767_v54 = vpop.f32.mrf.mxu2  ;;  %v2192_v19 = vsub.f32 %v5514_v29, %v7152_v1 }
 0x12a   :  { %1036 = vmatmul.f32.gmra.mxu0 %v4992_v8  ;;  %v768_v24 = vadd.f32 %v767_v54, %v636_v63  ;;  %v2193_v54 = vand.u32 4294901760, %v2192_v19 }
 0x12b   :  { %1133 = vmatmul.f32.gmra.mxu1 %v4962_v55  ;;  %1471 = vmatmul.f32.gmra.mxu3 %v5484_v13  ;;  %v5533_v55 = vsub.f32 %v311_v43, %v5518_v26 }
 0x12c   :  { %v5524_v31 = vadd.f32 %v900_v57, %v768_v24  ;;  %2194 = vmatpush.msrb.mxu1 %v2193_v54  ;;  %v3786_v57 = vsel %vm196_vm13, 1.0, %v7330_v6 }
 0x12d   :  { %1298 = vmatmul.f32.gmra.mxu2 %v1297_v53  ;;  %7331 = vst [vmem:[#allocation46_spill] sm:$0xff] %v5533_v55  ;;  %v1305_v53 = vand.u32 4294901760, %v1304_v62  ;;  %v7153_v24 = vand.u32 4294901760, %v5533_v55  ;;  %v5541_v25 = vsub.f32 %v3786_v57, %v3786_v57 }
 0x12e   :  { %v906_v40 = vpop.f32.mrf.mxu3 }
 0x12f   :  { %v478_v63 = vpop.f32.mrf.mxu0  ;;  %2359 = vmatpush.msrb.mxu2 %v5541_v25  ;;  %v1312_v62 = vsub.f32 %v5533_v55, %v7153_v24 }
 0x130   :  { %v639_v2 = vpop.f32.mrf.mxu1  ;;  %v772_v12 = vpop.f32.mrf.mxu2 }
 0x131   :  { %v640_v13 = vadd.f32 %v639_v2, %v470_v14  ;;  %v7154_v14 = vand.u32 4294901760, %v5541_v25 }
 0x132   :  { %1040 = vmatmul.f32.gmra.mxu0 %v5018_v27 }
 0x133   :  { %v773_v43 = vadd.f32 %v772_v12, %v640_v13  ;;  %1137 = vmatmul.f32.gmra.mxu1 %v4992_v8  ;;  %1475 = vmatmul.f32.gmra.mxu3 %v5498_v33  ;;  %v2198_v12 = vsub.f32 %v5541_v25, %v7154_v14 }
 0x135   :  { %v5546_v2 = vadd.f32 %v906_v40, %v773_v43  ;;  %1306 = vmatmul.f32.gmra.mxu2 %v1305_v53  ;;  %v2199_v1 = vand.u32 4294901760, %v2198_v12  ;;  %v3785_v40 = vsel %vm195_vm14, 1.0, %v7330_v6  ;;  %v1313_v53 = vand.u32 4294901760, %v1312_v62 }
 0x136   :  { %v912_v19 = vpop.f32.mrf.mxu3  ;;  %v5560_v43 = vsub.f32 %v3785_v40, %v3785_v40 }
 0x137   :  { %v981_v54 = vpop.f32.mrf.mxu0  ;;  %2200 = vmatpush.msrb.mxu1 %v2199_v1  ;;  %v3784_v1 = vsel %vm194_vm15, 1.0, %v7330_v6 }
 0x138   :  { %v643_v8 = vpop.f32.mrf.mxu1  ;;  %v777_v57 = vpop.f32.mrf.mxu2  ;;  %2362 = vmatpush.msrb.mxu2 %v5560_v43  ;;  %v7167_v12 = vand.u32 4294901760, %v5560_v43  ;;  %v982_v14 = vadd.f32 %v981_v54, %v5164_v17 }
 0x139   :  { %v644_v13 = vadd.f32 %v643_v8, %v478_v63 }
 0x13a   :  { %1044 = vmatmul.f32.gmra.mxu0 %v5049_v21  ;;  %v2204_v62 = vsub.f32 %v5560_v43, %v7167_v12  ;;  %v7358_v12 = vld [vmem:[#allocation28_spill] sm:$0xff] }
 0x13b   :  { %v778_v24 = vadd.f32 %v777_v57, %v644_v13  ;;  %1141 = vmatmul.f32.gmra.mxu1 %v5018_v27  ;;  %1479 = vmatmul.f32.gmra.mxu3 %v5518_v26 }
 0x13c   :  { %v2205_v40 = vand.u32 4294901760, %v2204_v62 }
 0x13d   :  { %v5565_v63 = vadd.f32 %v912_v19, %v778_v24  ;;  %1314 = vmatmul.f32.gmra.mxu2 %v1313_v53  ;;  %v5577_v24 = vsub.f32 %v3784_v1, %v3784_v1 }
 0x13e   :  { %v1416_v8 = vpop.f32.mrf.mxu3  ;;  %2206 = vmatpush.msrb.mxu1 %v2205_v40 }
 0x13f   :  { %v985_v55 = vpop.f32.mrf.mxu0  ;;  %2365 = vmatpush.msrb.mxu2 %v5577_v24 }
 0x140   :  { %v1082_v13 = vpop.f32.mrf.mxu1  ;;  %v1187_v57 = vpop.f32.mrf.mxu2  ;;  %v986_v53 = vadd.f32 %v985_v55, %v5218_v28  ;;  %v7332_v28 = vand.u32 4294901760, %v5093_v44 }
 0x141   :  { %v1083_v27 = vadd.f32 %v1082_v13, %v982_v14  ;;  %v7166_v14 = vand.u32 4294901760, %v5577_v24 }
 0x142   :  { %1533 = vmatmul.f32.vlgmr.msra.gmra.mxu0 %v5093_v44 }
 0x143   :  { %v1188_v19 = vadd.f32 %v1187_v57, %v1083_v27  ;;  %1145 = vmatmul.f32.gmra.mxu1 %v5049_v21  ;;  %1918 = vmatmul.f32.vlgmr.msra.gmra.mxu3 %v5079_v58  ;;  %v2210_v13 = vsub.f32 %v5577_v24, %v7166_v14 }
 0x145   :  { %v5582_v17 = vadd.f32 %v1416_v8, %v1188_v19  ;;  %1817 = vmatmul.f32.vlgmr.msra.gmra.mxu2 %v5079_v58  ;;  %v2211_v40 = vand.u32 4294901760, %v2210_v13  ;;  %v3783_v8 = vsel %vm193_vm0, 1.0, %v7330_v6 }
 0x146   :  { %v1420_v54 = vpop.f32.mrf.mxu3  ;;  %v5595_v58 = vsub.f32 %v3783_v8, %v3783_v8 }
 0x147   :  { %v989_v62 = vpop.f32.mrf.mxu0  ;;  %2212 = vmatpush.msrb.mxu1 %v2211_v40 }
 0x148   :  { %v1086_v21 = vpop.f32.mrf.mxu1  ;;  %v1195_v57 = vpop.f32.mrf.mxu2  ;;  %2368 = vmatpush.msrb.mxu2 %v5595_v58  ;;  %v7164_v19 = vand.u32 4294901760, %v5595_v58  ;;  %v990_v13 = vadd.f32 %v989_v62, %v5266_v42 }
 0x149   :  { %v1087_v27 = vadd.f32 %v1086_v21, %v986_v53 }
 0x14a   :  { %1538 = vmatmul.f32.gmra.mxu0 %v5130_v37  ;;  %v2216_v44 = vsub.f32 %v5595_v58, %v7164_v19 }
 0x14b   :  { %v1196_v1 = vadd.f32 %v1195_v57, %v1087_v27  ;;  %1652 = vmatmul.f32.vlgmr.msra.gmra.mxu1 %v7332_v28  ;;  %1922 = vmatmul.f32.gmra.mxu3 %v5108_v39 }
 0x14c   :  { %v2217_v40 = vand.u32 4294901760, %v2216_v44 }
 0x14d   :  { %v5601_v55 = vadd.f32 %v1420_v54, %v1196_v1  ;;  %1821 = vmatmul.f32.gmra.mxu2 %v5108_v39  ;;  %v7333_v1 = vand.u32 4294901760, %v5130_v37  ;;  %v3782_v39 = vsel %vm192_vm1, 1.0, %v7330_v6 }
 0x14e   :  { %v1424_v53 = vpop.f32.mrf.mxu3  ;;  %2218 = vmatpush.msrb.mxu1 %v2217_v40  ;;  %v5617_v42 = vsub.f32 %v3782_v39, %v3782_v39 }
 0x14f   :  { %v993_v21 = vpop.f32.mrf.mxu0 }
 0x150   :  { %v1090_v27 = vpop.f32.mrf.mxu1  ;;  %v1203_v8 = vpop.f32.mrf.mxu2  ;;  %v994_v37 = vadd.f32 %v993_v21, %v5316_v46  ;;  %2371 = vmatpush.msrb.mxu2 %v5617_v42  ;;  %v3781_v46 = vsel %vm191_vm2, 1.0, %v7330_v6  ;;  %v7381_v3 = vand.u32 4294901760, %v5617_v42 }
 0x151   :  { %v1091_v57 = vadd.f32 %v1090_v27, %v990_v13  ;;  %v7163_v13 = vand.u32 4294901760, %v5617_v42  ;;  %v5636_v21 = vsub.f32 %v3781_v46, %v3781_v46 }
 0x152   :  { %1543 = vmatmul.f32.gmra.mxu0 %v5176_v49 }
 0x153   :  { %v1204_v54 = vadd.f32 %v1203_v8, %v1091_v57  ;;  %1658 = vmatmul.f32.gmra.mxu1 %v7333_v1  ;;  %1926 = vmatmul.f32.gmra.mxu3 %v5148_v0  ;;  %v2222_v57 = vsub.f32 %v5617_v42, %v7163_v13 }
 0x154   :  { %2374 = vmatpush.msrb.mxu2 %v5636_v21 }
 0x155   :  { %v5619_v62 = vadd.f32 %v1424_v53, %v1204_v54  ;;  %1825 = vmatmul.f32.gmra.mxu2 %v5148_v0  ;;  %v2223_v53 = vand.u32 4294901760, %v2222_v57  ;;  %v7334_v0 = vand.u32 4294901760, %v5176_v49 }
 0x156   :  { %v1428_v28 = vpop.f32.mrf.mxu3 }
 0x157   :  { %v997_v44 = vpop.f32.mrf.mxu0  ;;  %2224 = vmatpush.msrb.mxu1 %v2223_v53 }
 0x158   :  { %v1094_v27 = vpop.f32.mrf.mxu1  ;;  %v1211_v40 = vpop.f32.mrf.mxu2  ;;  %v998_v49 = vadd.f32 %v997_v44, %v5360_v61  ;;  %v3780_v61 = vsel %vm190_vm5, 1.0, %v7330_v6 }
 0x159   :  { %v1095_v8 = vadd.f32 %v1094_v27, %v994_v37  ;;  %v7161_v37 = vand.u32 4294901760, %v5636_v21  ;;  %v5655_v44 = vsub.f32 %v3780_v61, %v3780_v61 }
 0x15a   :  { %1548 = vmatmul.f32.gmra.mxu0 %v5226_v56 }
 0x15b   :  { %v1212_v54 = vadd.f32 %v1211_v40, %v1095_v8  ;;  %1664 = vmatmul.f32.gmra.mxu1 %v7334_v0  ;;  %1930 = vmatmul.f32.gmra.mxu3 %v5204_v10  ;;  %v2228_v8 = vsub.f32 %v5636_v21, %v7161_v37 }
 0x15c   :  { %2377 = vmatpush.msrb.mxu2 %v5655_v44 }
 0x15d   :  { %v5638_v1 = vadd.f32 %v1428_v28, %v1212_v54  ;;  %1829 = vmatmul.f32.gmra.mxu2 %v5204_v10  ;;  %v2229_v28 = vand.u32 4294901760, %v2228_v8  ;;  %v7335_v10 = vand.u32 4294901760, %v5226_v56  ;;  %v7160_v8 = vand.u32 4294901760, %v5655_v44 }
 0x15e   :  { %v1432_v39 = vpop.f32.mrf.mxu3 }
 0x15f   :  { %v1001_v27 = vpop.f32.mrf.mxu0  ;;  %2230 = vmatpush.msrb.mxu1 %v2229_v28 }
 0x160   :  { %v1098_v57 = vpop.f32.mrf.mxu1  ;;  %v1219_v53 = vpop.f32.mrf.mxu2 }
 0x161   :  { %v1099_v40 = vadd.f32 %v1098_v57, %v998_v49  ;;  %v1002_v49 = vadd.f32 %v1001_v27, %v5390_v45  ;;  %v3779_v45 = vsel %vm189_vm9, 1.0, %v7330_v6 }
 0x162   :  { %1553 = vmatmul.f32.gmra.mxu0 %v5274_v9 }
 0x163   :  { %v1220_v54 = vadd.f32 %v1219_v53, %v1099_v40  ;;  %1670 = vmatmul.f32.gmra.mxu1 %v7335_v10  ;;  %1934 = vmatmul.f32.gmra.mxu3 %v5248_v34 }
 0x165   :  { %v5657_v0 = vadd.f32 %v1432_v39, %v1220_v54  ;;  %1833 = vmatmul.f32.gmra.mxu2 %v5248_v34  ;;  %v2234_v39 = vsub.f32 %v5655_v44, %v7160_v8  ;;  %v7336_v34 = vand.u32 4294901760, %v5274_v9  ;;  %v5674_v54 = vsub.f32 %v3779_v45, %v3779_v45 }
 0x166   :  { %v1436_v46 = vpop.f32.mrf.mxu3 }
 0x167   :  { %v1005_v57 = vpop.f32.mrf.mxu0  ;;  %v2235_v27 = vand.u32 4294901760, %v2234_v39  ;;  %2380 = vmatpush.msrb.mxu2 %v5674_v54 }
 0x168   :  { %v1102_v56 = vpop.f32.mrf.mxu1  ;;  %v1227_v53 = vpop.f32.mrf.mxu2 }
 0x169   :  { %v1103_v40 = vadd.f32 %v1102_v56, %v1002_v49  ;;  %2236 = vmatpush.msrb.mxu1 %v2235_v27  ;;  %v1006_v49 = vadd.f32 %v1005_v57, %v5404_v15 }
 0x16a   :  { %1558 = vmatmul.f32.gmra.mxu0 %v5322_v38 }
 0x16b   :  { %v1228_v28 = vadd.f32 %v1227_v53, %v1103_v40  ;;  %1676 = vmatmul.f32.gmra.mxu1 %v7336_v34  ;;  %1938 = vmatmul.f32.gmra.mxu3 %v5296_v18  ;;  %v7159_v40 = vand.u32 4294901760, %v5674_v54 }
 0x16d   :  { %v5676_v10 = vadd.f32 %v1436_v46, %v1228_v28  ;;  %1837 = vmatmul.f32.gmra.mxu2 %v5296_v18  ;;  %v2240_v46 = vsub.f32 %v5674_v54, %v7159_v40  ;;  %v7337_v18 = vand.u32 4294901760, %v5322_v38  ;;  %v3778_v28 = vsel %vm188_vm10, 1.0, %v7330_v6 }
 0x16e   :  { %v1440_v61 = vpop.f32.mrf.mxu3  ;;  %v5696_v27 = vsub.f32 %v3778_v28, %v3778_v28 }
 0x16f   :  { %v1009_v9 = vpop.f32.mrf.mxu0  ;;  %v2241_v15 = vand.u32 4294901760, %v2240_v46 }
 0x170   :  { %v1106_v56 = vpop.f32.mrf.mxu1  ;;  %v1235_v34 = vpop.f32.mrf.mxu2  ;;  %2383 = vmatpush.msrb.mxu2 %v5696_v27 }
 0x171   :  { %v1107_v53 = vadd.f32 %v1106_v56, %v1006_v49  ;;  %2242 = vmatpush.msrb.mxu1 %v2241_v15  ;;  %v1010_v49 = vadd.f32 %v1009_v9, %v5418_v41 }
 0x172   :  { %1563 = vmatmul.f32.gmra.mxu0 %v5366_v32 }
 0x173   :  { %v1236_v39 = vadd.f32 %v1235_v34, %v1107_v53  ;;  %1682 = vmatmul.f32.gmra.mxu1 %v7337_v18  ;;  %1942 = vmatmul.f32.gmra.mxu3 %v5344_v30  ;;  %v7157_v34 = vand.u32 4294901760, %v5696_v27  ;;  %v3777_v18 = vsel %vm187_vm11, 1.0, %v7330_v6 }
 0x174   :  { %v5715_v28 = vsub.f32 %v3777_v18, %v3777_v18 }
 0x175   :  { %v5689_v57 = vadd.f32 %v1440_v61, %v1236_v39  ;;  %1841 = vmatmul.f32.gmra.mxu2 %v5344_v30  ;;  %v7338_v39 = vand.u32 4294901760, %v5366_v32  ;;  %v2246_v30 = vsub.f32 %v5696_v27, %v7157_v34 }
 0x176   :  { %v1444_v45 = vpop.f32.mrf.mxu3  ;;  %2386 = vmatpush.msrb.mxu2 %v5715_v28 }
 0x177   :  { %v1013_v38 = vpop.f32.mrf.mxu0  ;;  %v2247_v9 = vand.u32 4294901760, %v2246_v30  ;;  %v7340_v30 = vand.u32 4294901760, %v5396_v60 }
 0x178   :  { %v1110_v56 = vpop.f32.mrf.mxu1  ;;  %v1243_v61 = vpop.f32.mrf.mxu2  ;;  %v1014_v32 = vadd.f32 %v1013_v38, %v5432_v59 }
 0x179   :  { %v1111_v53 = vadd.f32 %v1110_v56, %v1010_v49  ;;  %2248 = vmatpush.msrb.mxu1 %v2247_v9 }
 0x17a   :  { %1568 = vmatmul.f32.gmra.mxu0 %v5396_v60  ;;  %v7344_v60 = vld [vmem:[#allocation30_spill] sm:$0xff] }
 0x17b   :  { %v1244_v46 = vadd.f32 %v1243_v61, %v1111_v53  ;;  %1688 = vmatmul.f32.gmra.mxu1 %v7338_v39  ;;  %1946 = vmatmul.f32.gmra.mxu3 %v5386_v22  ;;  %v7158_v61 = vand.u32 4294901760, %v5715_v28 }
 0x17d   :  { %v5708_v41 = vadd.f32 %v1444_v45, %v1244_v46  ;;  %1845 = vmatmul.f32.gmra.mxu2 %v5386_v22  ;;  %v7339_v46 = vld [vmem:[#allocation20_spill] sm:$0xff]  ;;  %v7341_v22 = vld [vmem:[#allocation10_spill] sm:$0xff]  ;;  %v2252_v59 = vsub.f32 %v5715_v28, %v7158_v61 }
 0x17e   :  { %v1448_v15 = vpop.f32.mrf.mxu3  ;;  %v7345_v61 = vld [vmem:[#allocation22_spill] sm:$0xff]  ;;  %v7346_v8 = vand.u32 4294901760, %v7339_v46 }
 0x17f   :  { %v1017_v49 = vpop.f32.mrf.mxu0  ;;  %v2253_v9 = vand.u32 4294901760, %v2252_v59  ;;  %v7352_v19 = vand.u32 4294901760, %v7345_v61 }
 0x180   :  { %v1114_v56 = vpop.f32.mrf.mxu1  ;;  %v1251_v53 = vpop.f32.mrf.mxu2 }
 0x181   :  { %v1115_v45 = vadd.f32 %v1114_v56, %v1014_v32  ;;  %v3776_v32 = vsel %vm186_vm3, 1.0, %v7330_v6  ;;  %2254 = vmatpush.msrb.mxu1 %v2253_v9 }
 0x182   :  { %1573 = vmatmul.f32.gmra.mxu0 %v7339_v46 }
 0x183   :  { %v1252_v39 = vadd.f32 %v1251_v53, %v1115_v45  ;;  %1694 = vmatmul.f32.gmra.mxu1 %v7340_v30  ;;  %1950 = vmatmul.f32.gmra.mxu3 %v7341_v22  ;;  %v5734_v45 = vsub.f32 %v3776_v32, %v3776_v32  ;;  %v1018_v53 = vadd.f32 %v1017_v49, %v7344_v60  ;;  %v3775_v60 = vsel %vm185_vm4, 1.0, %v7330_v6 }
 0x185   :  { %v5727_v38 = vadd.f32 %v1448_v15, %v1252_v39  ;;  %1849 = vmatmul.f32.gmra.mxu2 %v7341_v22  ;;  %v7162_v59 = vand.u32 4294901760, %v5734_v45  ;;  %v7347_v22 = vld [vmem:[#allocation11_spill] sm:$0xff] }
 0x186   :  { %v1452_v56 = vpop.f32.mrf.mxu3  ;;  %2389 = vmatpush.msrb.mxu2 %v5734_v45 }
 0x187   :  { %7342 = vst [vmem:[#allocation20_spill] sm:$0xff] %v5727_v38  ;;  %v1021_v30 = vpop.f32.mrf.mxu0  ;;  %v2258_v49 = vsub.f32 %v5734_v45, %v7162_v59  ;;  %v7351_v59 = vld [vmem:[#allocation26_spill] sm:$0xff] }
 0x188   :  { %v1118_v34 = vpop.f32.mrf.mxu1  ;;  %v1259_v39 = vpop.f32.mrf.mxu2  ;;  %v7357_v14 = vand.u32 4294901760, %v7351_v59 }
 0x189   :  { %v1119_v15 = vadd.f32 %v1118_v34, %v1018_v53  ;;  %v2259_v32 = vand.u32 4294901760, %v2258_v49 }
 0x18a   :  { %1578 = vmatmul.f32.gmra.mxu0 %v7345_v61 }
 0x18b   :  { %v1260_v40 = vadd.f32 %v1259_v39, %v1119_v15  ;;  %1700 = vmatmul.f32.gmra.mxu1 %v7346_v8  ;;  %1954 = vmatmul.f32.gmra.mxu3 %v7347_v22  ;;  %v5753_v15 = vsub.f32 %v3775_v60, %v3775_v60  ;;  %v7350_v8 = vld [vmem:[#allocation41_spill] sm:$0xff] }
 0x18c   :  { %v1022_v46 = vadd.f32 %v1021_v30, %v7350_v8  ;;  %2260 = vmatpush.msrb.mxu1 %v2259_v32  ;;  %v3774_v8 = vsel %vm184_vm6, 1.0, %v7330_v6 }
 0x18d   :  { %v5746_v9 = vadd.f32 %v1452_v56, %v1260_v40  ;;  %1853 = vmatmul.f32.gmra.mxu2 %v7347_v22  ;;  %v7165_v49 = vand.u32 4294901760, %v5753_v15  ;;  %v7353_v22 = vld [vmem:[#allocation24_spill] sm:$0xff] }
 0x18e   :  { %v1456_v53 = vpop.f32.mrf.mxu3  ;;  %2392 = vmatpush.msrb.mxu2 %v5753_v15 }
 0x18f   :  { %7348 = vst [vmem:[#allocation10_spill] sm:$0xff] %v5746_v9  ;;  %v1025_v39 = vpop.f32.mrf.mxu0  ;;  %v2264_v30 = vsub.f32 %v5753_v15, %v7165_v49 }
 0x190   :  { %v1122_v37 = vpop.f32.mrf.mxu1  ;;  %v1267_v56 = vpop.f32.mrf.mxu2 }
 0x191   :  { %v1123_v40 = vadd.f32 %v1122_v37, %v1022_v46  ;;  %v2265_v60 = vand.u32 4294901760, %v2264_v30  ;;  %v7356_v30 = vld [vmem:[#allocation32_spill] sm:$0xff] }
 0x192   :  { %1583 = vmatmul.f32.gmra.mxu0 %v7351_v59 }
 0x193   :  { %v1268_v13 = vadd.f32 %v1267_v56, %v1123_v40  ;;  %1706 = vmatmul.f32.gmra.mxu1 %v7352_v19  ;;  %1958 = vmatmul.f32.gmra.mxu3 %v7353_v22  ;;  %v5772_v40 = vsub.f32 %v3774_v8, %v3774_v8  ;;  %v1026_v19 = vadd.f32 %v1025_v39, %v5474_v50  ;;  %v7404_v39 = vld [vmem:[#allocation23_spill] sm:$0xff] }
 0x194   :  { %2266 = vmatpush.msrb.mxu1 %v2265_v60  ;;  %v3773_v60 = vsel %vm183_vm7, 1.0, %v7330_v6 }
 0x195   :  { %v5765_v32 = vadd.f32 %v1456_v53, %v1268_v13  ;;  %1857 = vmatmul.f32.gmra.mxu2 %v7353_v22  ;;  %v7168_v22 = vand.u32 4294901760, %v5772_v40  ;;  %v5791_v59 = vsub.f32 %v3773_v60, %v3773_v60 }
 0x196   :  { %v1460_v46 = vpop.f32.mrf.mxu3  ;;  %2395 = vmatpush.msrb.mxu2 %v5772_v40 }
 0x197   :  { %7354 = vst [vmem:[#allocation12_spill] sm:$0xff] %v5765_v32  ;;  %v1029_v61 = vpop.f32.mrf.mxu0  ;;  %v2270_v50 = vsub.f32 %v5772_v40, %v7168_v22  ;;  %v7361_v22 = vld [vmem:[#allocation42_spill] sm:$0xff]  ;;  %v7362_v32 = vand.u32 4294901760, %v7356_v30  ;;  %v7169_v60 = vand.u32 4294901760, %v5791_v59 }
 0x198   :  { %v1126_v56 = vpop.f32.mrf.mxu1  ;;  %v1275_v53 = vpop.f32.mrf.mxu2  ;;  %2398 = vmatpush.msrb.mxu2 %v5791_v59 }
 0x199   :  { %v1127_v13 = vadd.f32 %v1126_v56, %v1026_v19 }
 0x19a   :  { %1588 = vmatmul.f32.gmra.mxu0 %v7356_v30  ;;  %v7365_v30 = vld [vmem:[#allocation8_spill] sm:$0xff] }
 0x19b   :  { %v1276_v49 = vadd.f32 %v1275_v53, %v1127_v13  ;;  %1712 = vmatmul.f32.gmra.mxu1 %v7357_v14  ;;  %1962 = vmatmul.f32.gmra.mxu3 %v7358_v12  ;;  %v1030_v14 = vadd.f32 %v1029_v61, %v5488_v47  ;;  %v2271_v13 = vand.u32 4294901760, %v2270_v50  ;;  %v2276_v47 = vsub.f32 %v5791_v59, %v7169_v60 }
 0x19d   :  { %v5781_v8 = vadd.f32 %v1460_v46, %v1276_v49  ;;  %1861 = vmatmul.f32.gmra.mxu2 %v7358_v12  ;;  %2272 = vmatpush.msrb.mxu1 %v2271_v13  ;;  %v7363_v12 = vld [vmem:[#allocation34_spill] sm:$0xff]  ;;  %v2277_v13 = vand.u32 4294901760, %v2276_v47  ;;  %v7368_v47 = vand.u32 4294901760, %v7361_v22 }
 0x19e   :  { %v1464_v19 = vpop.f32.mrf.mxu3 }
 0x19f   :  { %7359 = vst [vmem:[#allocation30_spill] sm:$0xff] %v5781_v8  ;;  %v1033_v56 = vpop.f32.mrf.mxu0  ;;  %2278 = vmatpush.msrb.mxu1 %v2277_v13 }
 0x1a0   :  { %v1130_v49 = vpop.f32.mrf.mxu1  ;;  %v1283_v53 = vpop.f32.mrf.mxu2  ;;  %v1034_v50 = vadd.f32 %v1033_v56, %v5502_v51  ;;  %v7366_v51 = vmov 1.0   ;;  %v7367_v56 = vld [vmem:[#allocation43_spill] sm:$0xff] }
 0x1a1   :  { %v1131_v46 = vadd.f32 %v1130_v49, %v1030_v14 }
 0x1a2   :  { %1593 = vmatmul.f32.gmra.mxu0 %v7361_v22  ;;  %v7371_v22 = vand.u32 4294901760, %v5541_v25  ;;  %v7374_v25 = vld [vmem:[#allocation45_spill] sm:$0xff] }
 0x1a3   :  { %v1284_v8 = vadd.f32 %v1283_v53, %v1131_v46  ;;  %1718 = vmatmul.f32.gmra.mxu1 %v7362_v32  ;;  %1966 = vmatmul.f32.gmra.mxu3 %v7363_v12  ;;  %v5810_v32 = vld [vmem:[%s6995_s1] ss:$0 sm:$0xff] }
 0x1a4   :  { %vm7170_vm8 = vcmp.eq.s32.totalorder %v7365_v30, %v5810_v32 }
 0x1a5   :  { %v5800_v9 = vadd.f32 %v1464_v19, %v1284_v8  ;;  %1865 = vmatmul.f32.gmra.mxu2 %v7363_v12  ;;  %v3772_v46 = vsel %vm7170_vm8, 1.0, %v7330_v6  ;;  %3915 = vmatpush.msk.msrb.mxu0 %vm7170_vm8, %v7366_v51 }
 0x1a6   :  { %v1468_v61 = vpop.f32.mrf.mxu3  ;;  %v5823_v53 = vsub.f32 %v3772_v46, %v3772_v46  ;;  %3931 = vmatpush.msk.msrb.mxu3 %vm7170_vm8, %v7366_v51 }
 0x1a7   :  { %7364 = vst [vmem:[#allocation22_spill] sm:$0xff] %v5800_v9  ;;  %v1037_v14 = vpop.f32.mrf.mxu0 }
 0x1a8   :  { %v1134_v49 = vpop.f32.mrf.mxu1  ;;  %v1291_v19 = vpop.f32.mrf.mxu2  ;;  %2401 = vmatpush.msrb.mxu2 %v5823_v53  ;;  %v2281_v13 = vand.u32 4294901760, %v5823_v53 }
 0x1a9   :  { %v1135_v8 = vadd.f32 %v1134_v49, %v1034_v50  ;;  %v7369_v50 = vld [vmem:[#allocation36_spill] sm:$0xff]  ;;  %v7370_v49 = vand.u32 4294901760, %v5514_v29 }
 0x1aa   :  { %1598 = vmatmul.f32.gmra.mxu0 %v7367_v56  ;;  %v7372_v29 = vld [vmem:[#allocation16_spill] sm:$0xff] }
 0x1ab   :  { %v1292_v12 = vadd.f32 %v1291_v19, %v1135_v8  ;;  %1724 = vmatmul.f32.gmra.mxu1 %v7368_v47  ;;  %1970 = vmatmul.f32.gmra.mxu3 %v7369_v50  ;;  %v2282_v8 = vsub.f32 %v5823_v53, %v2281_v13  ;;  %v1038_v19 = vadd.f32 %v1037_v14, %v5524_v31 }
 0x1ac   :  { %2626 = vmatpush.msra.mxu0 %v7370_v49  ;;  %vm213_vm8 = vcmp.eq.s32.totalorder %v7372_v29, %v5810_v32 }
 0x1ad   :  { %v5836_v46 = vadd.f32 %v1468_v61, %v1292_v12  ;;  %1869 = vmatmul.f32.gmra.mxu2 %v7369_v50  ;;  %v2283_v38 = vand.u32 4294901760, %v2282_v8  ;;  %v7373_v61 = vand.u32 4294901760, %v5560_v43  ;;  %v3803_v49 = vsel %vm213_vm8, 1.0, %v7330_v6  ;;  %v1986_v8 = vld [vmem:[#allocation4] sm:$0xff] }
 0x1ae   :  { %v1472_v60 = vpop.f32.mrf.mxu3  ;;  %2630 = vmatpush.msra.mxu0 %v7371_v22  ;;  %3948 = vmatpush.msk.msra.mxu2 %vm213_vm8, %v7366_v51  ;;  %v5858_v31 = vsub.f32 %v3803_v49, %v3803_v49  ;;  %v7375_v43 = vand.u32 4294901760, %v7367_v56  ;;  %v5873_v56 = vand.u32 4294901760, %v1986_v8 }
 0x1af   :  { %v1041_v47 = vpop.f32.mrf.mxu0  ;;  %2284 = vmatpush.msrb.mxu1 %v2283_v38 }
 0x1b0   :  { %v1138_v9 = vpop.f32.mrf.mxu1  ;;  %2634 = vmatpush.msra.mxu0 %v7373_v61  ;;  %v1299_v50 = vpop.f32.mrf.mxu2  ;;  %v7180_v22 = vand.u32 4294901760, %v5858_v31  ;;  %v7378_v61 = vand.u32 4294901760, %v5577_v24  ;;  %v1042_v49 = vadd.f32 %v1041_v47, %v5546_v2  ;;  %v5895_v2 = vsub.f32 %v1986_v8, %v5873_v56 }
 0x1b1   :  { %v1139_v12 = vadd.f32 %v1138_v9, %v1038_v19  ;;  %v7376_v9 = vld [vmem:[#allocation44_spill] sm:$0xff]  ;;  %3932 = vmatpush.msk.msra.mxu1 %vm197_vm12, %v7366_v51  ;;  %v7382_v47 = vand.u32 4294901760, %v7374_v25 }
 0x1b2   :  { %1603 = vmatmul.f32.gmra.mxu0 %v7374_v25 }
 0x1b3   :  { %v1300_v14 = vadd.f32 %v1299_v50, %v1139_v12  ;;  %1730 = vmatmul.f32.gmra.mxu1 %v7375_v43  ;;  %1974 = vmatmul.f32.gmra.mxu3 %v7376_v9  ;;  %v3029_v50 = vsub.f32 %v5858_v31, %v7180_v22 }
 0x1b4   :  { %2638 = vmatpush.msra.mxu0 %v7378_v61  ;;  %3933 = vmatpush.msk.msra.mxu1 %vm196_vm13, %v7366_v51  ;;  %v7380_v61 = vld [vmem:[#allocation17_spill] sm:$0xff] }
 0x1b5   :  { %v5870_v38 = vadd.f32 %v1472_v60, %v1300_v14  ;;  %1873 = vmatmul.f32.gmra.mxu2 %v7376_v9  ;;  %v7379_v60 = vand.u32 4294901760, %v5595_v58  ;;  %v3030_v43 = vand.u32 4294901760, %v3029_v50  ;;  %vm212_vm12 = vcmp.eq.s32.totalorder %v7380_v61, %v5810_v32  ;;  %v1988_v50 = vld [vmem:[#allocation4 + $0x10] sm:$0xff] }
 0x1b6   :  { %v1476_v12 = vpop.f32.mrf.mxu3  ;;  %3934 = vmatpush.msk.msra.mxu1 %vm195_vm14, %v7366_v51  ;;  %v3802_v4 = vsel %vm212_vm12, 1.0, %v7330_v6  ;;  %3949 = vmatpush.msk.msra.mxu2 %vm212_vm12, %v7366_v51 }
 0x1b7   :  { %v1045_v24 = vpop.f32.mrf.mxu0  ;;  %2642 = vmatpush.msra.mxu0 %v7379_v60  ;;  %3031 = vmatpush.msra.mxu3 %v3030_v43  ;;  %v5904_v42 = vsub.f32 %v3802_v4, %v3802_v4  ;;  %v5921_v43 = vand.u32 4294901760, %v1988_v50  ;;  %v7385_v4 = vld [vmem:[#allocation18_spill] sm:$0xff] }
 0x1b8   :  { %v1142_v14 = vpop.f32.mrf.mxu1  ;;  %v1307_v19 = vpop.f32.mrf.mxu2  ;;  %3935 = vmatpush.msk.msra.mxu1 %vm194_vm15, %v7366_v51  ;;  %v1046_v5 = vadd.f32 %v1045_v24, %v5565_v63  ;;  %vm211_vm13 = vcmp.eq.s32.totalorder %v7385_v4, %v5810_v32  ;;  %v7386_v63 = vand.u32 4294901760, %v5674_v54  ;;  %v7387_v24 = vld [vmem:[#allocation46_spill] sm:$0xff]  ;;  %v7388_v54 = vand.u32 4294901760, %v5508_v36 }
 0x1b9   :  { %v1143_v9 = vadd.f32 %v1142_v14, %v1042_v49  ;;  %2646 = vmatpush.msra.mxu0 %v7381_v3  ;;  %v7178_v25 = vand.u32 4294901760, %v5904_v42  ;;  %v7383_v49 = vand.u32 4294901760, %v5636_v21  ;;  %v2054_v14 = vand.u32 4294901760, %v5895_v2  ;;  %3950 = vmatpush.msk.msra.mxu2 %vm211_vm13, %v7366_v51 }
 0x1ba   :  { %1608 = vmatmul.f32.gmra.mxu0 %v5508_v36  ;;  %3936 = vmatpush.msk.msra.mxu1 %vm193_vm0, %v7366_v51  ;;  %v3801_v11 = vsel %vm211_vm13, 1.0, %v7330_v6  ;;  %vm7403_vm0 = vcmp.eq.s32.totalorder %v7365_v30, %v5810_v32 }
 0x1bb   :  { %v1308_v58 = vadd.f32 %v1307_v19, %v1143_v9  ;;  %1736 = vmatmul.f32.gmra.mxu1 %v7382_v47  ;;  %1978 = vmatmul.f32.gmra.mxu3 %v5498_v33  ;;  %v3035_v21 = vsub.f32 %v5904_v42, %v7178_v25  ;;  %v7384_v9 = vand.u32 4294901760, %v5655_v44  ;;  %v2055_v44 = vsub.f32 %v5895_v2, %v2054_v14  ;;  %v7420_v25 = vld [vmem:[#allocation33_spill] sm:$0xff] }
 0x1bc   :  { %2650 = vmatpush.msra.mxu0 %v7383_v49  ;;  %3937 = vmatpush.msk.msra.mxu1 %vm192_vm1, %v7366_v51  ;;  %v1990_v49 = vld [vmem:[#allocation4 + $0x20] sm:$0xff]  ;;  %vm208_vm1 = vcmp.eq.s32.totalorder %v7404_v39, %v5810_v32 }
 0x1bd   :  { %v5914_v8 = vadd.f32 %v1476_v12, %v1308_v58  ;;  %1877 = vmatmul.f32.gmra.mxu2 %v5498_v33  ;;  %v3036_v7 = vand.u32 4294901760, %v3035_v21  ;;  %v5944_v58 = vsub.f32 %v1988_v50, %v5921_v43  ;;  %v2056_v36 = vand.u32 4294901760, %v2055_v44 }
 0x1be   :  { %v1480_v60 = vpop.f32.mrf.mxu3  ;;  %2654 = vmatpush.msra.mxu0 %v7384_v9  ;;  %3938 = vmatpush.msk.msra.mxu1 %vm191_vm2, %v7366_v51  ;;  %v7389_v9 = vand.u32 4294901760, %v5696_v27 }
 0x1bf   :  { %v1534_v12 = vpop.f32.mrf.mxu0  ;;  %3037 = vmatpush.msra.mxu3 %v3036_v7 }
 0x1c0   :  { %v1146_v33 = vpop.f32.mrf.mxu1  ;;  %v1315_v3 = vpop.f32.mrf.mxu2  ;;  %2658 = vmatpush.msra.mxu0 %v7386_v63  ;;  %3939 = vmatpush.msk.msra.mxu1 %vm190_vm5, %v7366_v51  ;;  %v1535_v16 = vadd.f32 %v1534_v12, %v5582_v17  ;;  %v7393_v17 = vand.u32 4294901760, %v5734_v45  ;;  %v7394_v45 = vand.u32 4294901760, %v7387_v24 }
 0x1c1   :  { %v1147_v19 = vadd.f32 %v1146_v33, %v1046_v5  ;;  %v5957_v5 = vsub.f32 %v3801_v11, %v3801_v11  ;;  %v7392_v11 = vld [vmem:[#allocation19_spill] sm:$0xff] }
 0x1c2   :  { %1613 = vmatmul.f32.gmra.mxu0 %v7387_v24  ;;  %3940 = vmatpush.msk.msra.mxu1 %vm189_vm9, %v7366_v51  ;;  %vm210_vm14 = vcmp.eq.s32.totalorder %v7392_v11, %v5810_v32 }
 0x1c3   :  { %v1316_v47 = vadd.f32 %v1315_v3, %v1147_v19  ;;  %1742 = vmatmul.f32.gmra.mxu1 %v7388_v54  ;;  %1982 = vmatmul.f32.gmra.mxu3 %v5518_v26  ;;  %v7177_v21 = vand.u32 4294901760, %v5957_v5  ;;  %v2062_v19 = vand.u32 4294901760, %v5944_v58  ;;  %v5970_v3 = vand.u32 4294901760, %v1990_v49  ;;  %v1992_v54 = vld [vmem:[#allocation4 + $0x30] sm:$0xff] }
 0x1c4   :  { %2662 = vmatpush.msra.mxu0 %v7389_v9  ;;  %v3800_v23 = vsel %vm210_vm14, 1.0, %v7330_v6  ;;  %3951 = vmatpush.msk.msra.mxu2 %vm210_vm14, %v7366_v51 }
 0x1c5   :  { %v5963_v50 = vadd.f32 %v1480_v60, %v1316_v47  ;;  %1881 = vmatmul.f32.gmra.mxu2 %v5518_v26  ;;  %7390 = vst [vmem:[#allocation11_spill] sm:$0xff] %v5970_v3  ;;  %v3041_v27 = vsub.f32 %v5957_v5, %v7177_v21  ;;  %v7391_v26 = vand.u32 4294901760, %v5715_v28  ;;  %v2063_v12 = vsub.f32 %v5944_v58, %v2062_v19  ;;  %v2006_v21 = vld [vmem:[#allocation4 + $0xa0] sm:$0xff] }
 0x1c6   :  { %v1919_v33 = vpop.f32.mrf.mxu3  ;;  %v5992_v28 = vsub.f32 %v1990_v49, %v5970_v3  ;;  %v6004_v9 = vsub.f32 %v3800_v23, %v3800_v23  ;;  %3941 = vmatpush.msk.msra.mxu1 %vm188_vm10, %v7366_v51 }
 0x1c7   :  { %v1539_v60 = vpop.f32.mrf.mxu0  ;;  %2666 = vmatpush.msra.mxu0 %v7391_v26  ;;  %v3042_v20 = vand.u32 4294901760, %v3041_v27  ;;  %v2064_v24 = vand.u32 4294901760, %v2063_v12  ;;  %v6017_v26 = vand.u32 4294901760, %v1992_v54 }
 0x1c8   :  { %v1653_v7 = vpop.f32.mrf.mxu1  ;;  %v1818_v44 = vpop.f32.mrf.mxu2  ;;  %v2070_v27 = vand.u32 4294901760, %v5992_v28  ;;  %3942 = vmatpush.msk.msra.mxu1 %vm187_vm11, %v7366_v51  ;;  %v1540_v35 = vadd.f32 %v1539_v60, %v5601_v55  ;;  %v7400_v55 = vand.u32 4294901760, %v5791_v59  ;;  %v1994_v59 = vld [vmem:[#allocation4 + $0x40] sm:$0xff]  ;;  %vm203_vm11 = vcmp.eq.s32.totalorder %v7420_v25, %v5810_v32 }
 0x1c9   :  { %v1654_v63 = vadd.f32 %v1653_v7, %v1535_v16  ;;  %2670 = vmatpush.msra.mxu0 %v7393_v17  ;;  %3043 = vmatpush.msra.mxu3 %v3042_v20  ;;  %v7396_v16 = vand.u32 4294901760, %v5753_v15  ;;  %7397 = vst [vmem:[#allocation41_spill] sm:$0xff] %v6017_v26  ;;  %v7399_v20 = vld [vmem:[#allocation21_spill] sm:$0xff] }
 0x1ca   :  { %2057 = vmatmul.f32.vlgmr.msrb.gmra.mxu0 %v2056_v36  ;;  %v7175_v36 = vand.u32 4294901760, %v6004_v9  ;;  %3943 = vmatpush.msk.msra.mxu1 %vm186_vm3, %v7366_v51  ;;  %vm209_vm15 = vcmp.eq.s32.totalorder %v7399_v20, %v5810_v32  ;;  %v2071_v60 = vsub.f32 %v5992_v28, %v2070_v27 }
 0x1cb   :  { %v1819_v47 = vadd.f32 %v1818_v44, %v1654_v63  ;;  %1748 = vmatmul.f32.gmra.mxu1 %v7394_v45  ;;  %2523 = vmatmul.f32.vlgmr.msrb.gmra.mxu3 %v2054_v14  ;;  %v3799_v18 = vsel %vm209_vm15, 1.0, %v7330_v6 }
 0x1cc   :  { %2674 = vmatpush.msra.mxu0 %v7396_v16  ;;  %v3047_v15 = vsub.f32 %v6004_v9, %v7175_v36  ;;  %3952 = vmatpush.msk.msra.mxu2 %vm209_vm15, %v7366_v51  ;;  %v6050_v12 = vsub.f32 %v3799_v18, %v3799_v18  ;;  %v2072_v45 = vand.u32 4294901760, %v2071_v60  ;;  %v6063_v16 = vand.u32 4294901760, %v1994_v59 }
 0x1cd   :  { %v6010_v49 = vadd.f32 %v1919_v33, %v1819_v47  ;;  %2404 = vmatmul.f32.vlgmr.msrb.gmra.mxu2 %v5895_v2  ;;  %v7398_v2 = vand.u32 4294901760, %v5772_v40  ;;  %v6039_v40 = vsub.f32 %v1992_v54, %v6017_v26  ;;  %3944 = vmatpush.msk.msra.mxu1 %vm185_vm4, %v7366_v51 }
 0x1ce   :  { %v1923_v14 = vpop.f32.mrf.mxu3  ;;  %v3048_v48 = vand.u32 4294901760, %v3047_v15  ;;  %v7174_v47 = vand.u32 4294901760, %v6050_v12  ;;  %7402 = vst [vmem:[#allocation24_spill] sm:$0xff] %v6063_v16  ;;  %v6081_v37 = vsub.f32 %v1994_v59, %v6063_v16  ;;  %v3798_v15 = vsel %vm208_vm1, 1.0, %v7330_v6  ;;  %3953 = vmatpush.msk.msra.mxu2 %vm208_vm1, %v7366_v51 }
 0x1cf   :  { %7395 = vst [vmem:[#allocation13_spill] sm:$0xff] %v6010_v49  ;;  %v1544_v33 = vpop.f32.mrf.mxu0  ;;  %2678 = vmatpush.msra.mxu0 %v7398_v2  ;;  %v2078_v54 = vand.u32 4294901760, %v6039_v40  ;;  %3945 = vmatpush.msk.msra.mxu1 %vm184_vm6, %v7366_v51  ;;  %v6100_v2 = vsub.f32 %v3798_v15, %v3798_v15 }
 0x1d0   :  { %v1659_v7 = vpop.f32.mrf.mxu1  ;;  %v1822_v44 = vpop.f32.mrf.mxu2  ;;  %3049 = vmatpush.msra.mxu3 %v3048_v48  ;;  %v1545_v34 = vadd.f32 %v1544_v33, %v5619_v62  ;;  %v3053_v53 = vsub.f32 %v6050_v12, %v7174_v47 }
 0x1d1   :  { %v1660_v63 = vadd.f32 %v1659_v7, %v1540_v35  ;;  %2682 = vmatpush.msra.mxu0 %v7400_v55  ;;  %3946 = vmatpush.msk.msra.mxu1 %vm183_vm7, %v7366_v51  ;;  %v2079_v62 = vsub.f32 %v6039_v40, %v2078_v54  ;;  %v7173_v60 = vand.u32 4294901760, %v6100_v2 }
 0x1d2   :  { %2065 = vmatmul.f32.gmra.mxu0 %v2064_v24  ;;  %v3054_v35 = vand.u32 4294901760, %v3053_v53  ;;  %v7407_v53 = vld [vmem:[#allocation25_spill] sm:$0xff] }
 0x1d3   :  { %v1823_v17 = vadd.f32 %v1822_v44, %v1660_v63  ;;  %2286 = vmatmul.f32.vlgmr.msrb.gmra.mxu1 %v5873_v56  ;;  %2529 = vmatmul.f32.gmra.mxu3 %v2062_v19  ;;  %v2086_v63 = vand.u32 4294901760, %v6081_v37  ;;  %v6109_v44 = vand.u32 4294901760, %v1996_v52  ;;  %v3059_v59 = vsub.f32 %v6100_v2, %v7173_v60 }
 0x1d4   :  { %2686 = vmatpush.msra.mxu0 %v2281_v13  ;;  %3947 = vmatpush.msk.msra.mxu1 %vm7403_vm0, %v7366_v51  ;;  %vm207_vm2 = vcmp.eq.s32.totalorder %v7407_v53, %v5810_v32 }
 0x1d5   :  { %v6056_v23 = vadd.f32 %v1923_v14, %v1823_v17  ;;  %2409 = vmatmul.f32.gmra.mxu2 %v5944_v58  ;;  %3055 = vmatpush.msra.mxu3 %v3054_v35  ;;  %7406 = vst [vmem:[#allocation32_spill] sm:$0xff] %v6109_v44 }
 0x1d6   :  { %v1927_v19 = vpop.f32.mrf.mxu3  ;;  %3193 = vmatpush.msrb.mxu0 %v5858_v31  ;;  %3964 = vmatpush.msk.msrb.mxu1 %vm213_vm8, %v7366_v51 }
 0x1d7   :  { %7401 = vst [vmem:[#allocation26_spill] sm:$0xff] %v6056_v23  ;;  %v1549_v24 = vpop.f32.mrf.mxu0  ;;  %3954 = vmatpush.msk.msra.mxu2 %vm207_vm2, %v7366_v51 }
 0x1d8   :  { %v1665_v13 = vpop.f32.mrf.mxu1  ;;  %v1826_v14 = vpop.f32.mrf.mxu2  ;;  %3196 = vmatpush.msrb.mxu0 %v5904_v42  ;;  %v1550_v48 = vadd.f32 %v1549_v24, %v5638_v1  ;;  %3965 = vmatpush.msk.msrb.mxu1 %vm212_vm12, %v7366_v51  ;;  %v2087_v1 = vsub.f32 %v6081_v37, %v2086_v63  ;;  %v3060_v24 = vand.u32 4294901760, %v3059_v59 }
 0x1d9   :  { %v1666_v58 = vadd.f32 %v1665_v13, %v1545_v34  ;;  %v1998_v34 = vld [vmem:[#allocation4 + $0x60] sm:$0xff]  ;;  %v3797_v13 = vsel %vm207_vm2, 1.0, %v7330_v6 }
 0x1da   :  { %2073 = vmatmul.f32.gmra.mxu0 %v2072_v45  ;;  %3966 = vmatpush.msk.msrb.mxu1 %vm211_vm13, %v7366_v51  ;;  %v6128_v45 = vsub.f32 %v1996_v52, %v6109_v44 }
 0x1db   :  { %v1827_v33 = vadd.f32 %v1826_v14, %v1666_v58  ;;  %2290 = vmatmul.f32.gmra.mxu1 %v5921_v43  ;;  %2535 = vmatmul.f32.gmra.mxu3 %v2070_v27  ;;  %v2080_v27 = vand.u32 4294901760, %v2079_v62  ;;  %v6147_v58 = vsub.f32 %v3797_v13, %v3797_v13  ;;  %v2088_v14 = vand.u32 4294901760, %v2087_v1  ;;  %v7410_v1 = vld [vmem:[#allocation27_spill] sm:$0xff] }
 0x1dc   :  { %3199 = vmatpush.msrb.mxu0 %v5957_v5  ;;  %3967 = vmatpush.msk.msrb.mxu1 %vm210_vm14, %v7366_v51  ;;  %v2094_v62 = vand.u32 4294901760, %v6128_v45  ;;  %vm206_vm5 = vcmp.eq.s32.totalorder %v7410_v1, %v5810_v32 }
 0x1dd   :  { %v6098_v30 = vadd.f32 %v1927_v19, %v1827_v33  ;;  %2414 = vmatmul.f32.gmra.mxu2 %v5992_v28  ;;  %3061 = vmatpush.msra.mxu3 %v3060_v24  ;;  %v6152_v33 = vand.u32 4294901760, %v1998_v34  ;;  %v7445_v61 = vand.u32 4294901760, %v6147_v58 }
 0x1de   :  { %v1931_v7 = vpop.f32.mrf.mxu3  ;;  %3202 = vmatpush.msrb.mxu0 %v6004_v9  ;;  %3968 = vmatpush.msk.msrb.mxu1 %vm209_vm15, %v7366_v51 }
 0x1df   :  { %7405 = vst [vmem:[#allocation14_spill] sm:$0xff] %v6098_v30  ;;  %v1554_v55 = vpop.f32.mrf.mxu0  ;;  %3955 = vmatpush.msk.msra.mxu2 %vm206_vm5, %v7366_v51  ;;  %v7427_v30 = vld [vmem:[#allocation37_spill] sm:$0xff] }
 0x1e0   :  { %v1671_v18 = vpop.f32.mrf.mxu1  ;;  %v1830_v17 = vpop.f32.mrf.mxu2  ;;  %3205 = vmatpush.msrb.mxu0 %v6050_v12  ;;  %7409 = vst [vmem:[#allocation15_spill] sm:$0xff] %v6152_v33  ;;  %v1555_v52 = vadd.f32 %v1554_v55, %v5657_v0  ;;  %3969 = vmatpush.msk.msrb.mxu1 %vm208_vm1, %v7366_v51  ;;  %v2095_v0 = vsub.f32 %v6128_v45, %v2094_v62 }
 0x1e1   :  { %v1672_v28 = vadd.f32 %v1671_v18, %v1550_v48  ;;  %v6170_v55 = vsub.f32 %v1998_v34, %v6152_v33  ;;  %vm201_vm4 = vcmp.eq.s32.totalorder %v7427_v30, %v5810_v32 }
 0x1e2   :  { %2081 = vmatmul.f32.gmra.mxu0 %v2080_v27  ;;  %v7171_v27 = vand.u32 4294901760, %v6147_v58  ;;  %3970 = vmatpush.msk.msrb.mxu1 %vm207_vm2, %v7366_v51  ;;  %v2096_v24 = vand.u32 4294901760, %v2095_v0 }
 0x1e3   :  { %v1831_v19 = vadd.f32 %v1830_v17, %v1672_v28  ;;  %2294 = vmatmul.f32.gmra.mxu1 %v5970_v3  ;;  %2541 = vmatmul.f32.gmra.mxu3 %v2078_v54  ;;  %v2000_v17 = vld [vmem:[#allocation4 + $0x70] sm:$0xff] }
 0x1e4   :  { %3208 = vmatpush.msrb.mxu0 %v6100_v2  ;;  %v3065_v18 = vsub.f32 %v6147_v58, %v7171_v27  ;;  %3971 = vmatpush.msk.msrb.mxu1 %vm206_vm5, %v7366_v51  ;;  %v7413_v27 = vld [vmem:[#allocation29_spill] sm:$0xff] }
 0x1e5   :  { %v6145_v54 = vadd.f32 %v1931_v7, %v1831_v19  ;;  %2419 = vmatmul.f32.gmra.mxu2 %v6039_v40  ;;  %v3796_v19 = vsel %vm206_vm5, 1.0, %v7330_v6  ;;  %vm205_vm9 = vcmp.eq.s32.totalorder %v7413_v27, %v5810_v32 }
 0x1e6   :  { %v1935_v35 = vpop.f32.mrf.mxu3  ;;  %3211 = vmatpush.msrb.mxu0 %v6147_v58  ;;  %v3066_v59 = vand.u32 4294901760, %v3065_v18  ;;  %v6193_v34 = vsub.f32 %v3796_v19, %v3796_v19  ;;  %3956 = vmatpush.msk.msra.mxu2 %vm205_vm9, %v7366_v51 }
 0x1e7   :  { %7408 = vst [vmem:[#allocation28_spill] sm:$0xff] %v6145_v54  ;;  %v1559_v15 = vpop.f32.mrf.mxu0  ;;  %3972 = vmatpush.msk.msrb.mxu1 %vm205_vm9, %v7366_v51 }
 0x1e8   :  { %v1677_v7 = vpop.f32.mrf.mxu1  ;;  %v1834_v48 = vpop.f32.mrf.mxu2  ;;  %3067 = vmatpush.msra.mxu3 %v3066_v59  ;;  %3214 = vmatpush.msrb.mxu0 %v6193_v34 }
 0x1e9   :  { %v1678_v40 = vadd.f32 %v1677_v7, %v1555_v52  ;;  %v6197_v52 = vand.u32 4294901760, %v2000_v17  ;;  %v1560_v7 = vadd.f32 %v1559_v15, %v5676_v10  ;;  %v2002_v10 = vld [vmem:[#allocation4 + $0x80] sm:$0xff] }
 0x1ea   :  { %2089 = vmatmul.f32.gmra.mxu0 %v2088_v14  ;;  %v2102_v14 = vand.u32 4294901760, %v6170_v55 }
 0x1eb   :  { %v1835_v28 = vadd.f32 %v1834_v48, %v1678_v40  ;;  %2298 = vmatmul.f32.gmra.mxu1 %v6017_v26  ;;  %2547 = vmatmul.f32.gmra.mxu3 %v2086_v63  ;;  %7412 = vst [vmem:[#allocation34_spill] sm:$0xff] %v6197_v52  ;;  %v7172_v48 = vand.u32 4294901760, %v6193_v34  ;;  %v6207_v59 = vsub.f32 %v2000_v17, %v6197_v52 }
 0x1ec   :  { %v2103_v0 = vsub.f32 %v6170_v55, %v2102_v14 }
 0x1ed   :  { %v6191_v63 = vadd.f32 %v1935_v35, %v1835_v28  ;;  %2424 = vmatmul.f32.gmra.mxu2 %v6081_v37  ;;  %v3071_v37 = vsub.f32 %v6193_v34, %v7172_v48 }
 0x1ee   :  { %v1939_v13 = vpop.f32.mrf.mxu3 }
 0x1ef   :  { %7411 = vst [vmem:[#allocation42_spill] sm:$0xff] %v6191_v63  ;;  %v1564_v40 = vpop.f32.mrf.mxu0  ;;  %v3072_v15 = vand.u32 4294901760, %v3071_v37 }
 0x1f0   :  { %v1683_v35 = vpop.f32.mrf.mxu1  ;;  %v1838_v28 = vpop.f32.mrf.mxu2  ;;  %v1565_v37 = vadd.f32 %v1564_v40, %v5689_v57  ;;  %v2004_v57 = vld [vmem:[#allocation4 + $0x90] sm:$0xff] }
 0x1f1   :  { %v1684_v18 = vadd.f32 %v1683_v35, %v1560_v7  ;;  %v3795_v7 = vsel %vm205_vm9, 1.0, %v7330_v6  ;;  %3073 = vmatpush.msra.mxu3 %v3072_v15 }
 0x1f2   :  { %2097 = vmatmul.f32.gmra.mxu0 %v2096_v24  ;;  %v6226_v17 = vsub.f32 %v3795_v7, %v3795_v7  ;;  %v2104_v24 = vand.u32 4294901760, %v2103_v0 }
 0x1f3   :  { %v1839_v19 = vadd.f32 %v1838_v28, %v1684_v18  ;;  %2302 = vmatmul.f32.gmra.mxu1 %v6063_v16  ;;  %2553 = vmatmul.f32.gmra.mxu3 %v2094_v62  ;;  %v2110_v18 = vand.u32 4294901760, %v6207_v59  ;;  %v6230_v28 = vand.u32 4294901760, %v2002_v10 }
 0x1f4   :  { %v7176_v60 = vand.u32 4294901760, %v6226_v17  ;;  %3217 = vmatpush.msrb.mxu0 %v6226_v17  ;;  %v7447_v11 = vand.u32 4294901760, %v6226_v17 }
 0x1f5   :  { %v6224_v62 = vadd.f32 %v1939_v13, %v1839_v19  ;;  %2429 = vmatmul.f32.gmra.mxu2 %v6128_v45  ;;  %7415 = vst [vmem:[#allocation43_spill] sm:$0xff] %v6230_v28  ;;  %v2111_v0 = vsub.f32 %v6207_v59, %v2110_v18  ;;  %v6240_v7 = vsub.f32 %v2002_v10, %v6230_v28  ;;  %v6249_v10 = vand.u32 4294901760, %v2004_v57 }
 0x1f6   :  { %v1943_v35 = vpop.f32.mrf.mxu3  ;;  %v3077_v45 = vsub.f32 %v6226_v17, %v7176_v60 }
 0x1f7   :  { %7414 = vst [vmem:[#allocation8_spill] sm:$0xff] %v6224_v62  ;;  %v1569_v48 = vpop.f32.mrf.mxu0  ;;  %v2118_v60 = vand.u32 4294901760, %v6240_v7  ;;  %v7424_v62 = vld [vmem:[#allocation35_spill] sm:$0xff] }
 0x1f8   :  { %v1689_v13 = vpop.f32.mrf.mxu1  ;;  %v1842_v15 = vpop.f32.mrf.mxu2  ;;  %v3078_v40 = vand.u32 4294901760, %v3077_v45  ;;  %7418 = vst [vmem:[#allocation16_spill] sm:$0xff] %v6249_v10  ;;  %vm202_vm3 = vcmp.eq.s32.totalorder %v7424_v62, %v5810_v32 }
 0x1f9   :  { %v1690_v19 = vadd.f32 %v1689_v13, %v1565_v37  ;;  %v7417_v37 = vld [vmem:[#allocation31_spill] sm:$0xff] }
 0x1fa   :  { %2105 = vmatmul.f32.gmra.mxu0 %v2104_v24  ;;  %3079 = vmatpush.msra.mxu3 %v3078_v40  ;;  %vm204_vm10 = vcmp.eq.s32.totalorder %v7417_v37, %v5810_v32  ;;  %v2112_v24 = vand.u32 4294901760, %v2111_v0  ;;  %v2119_v40 = vsub.f32 %v6240_v7, %v2118_v60 }
 0x1fb   :  { %v1843_v47 = vadd.f32 %v1842_v15, %v1690_v19  ;;  %2306 = vmatmul.f32.gmra.mxu1 %v6109_v44  ;;  %2559 = vmatmul.f32.gmra.mxu3 %v2102_v14  ;;  %v3794_v14 = vsel %vm204_vm10, 1.0, %v7330_v6 }
 0x1fc   :  { %3973 = vmatpush.msk.msrb.mxu1 %vm204_vm10, %v7366_v51  ;;  %3957 = vmatpush.msk.msra.mxu2 %vm204_vm10, %v7366_v51 }
 0x1fd   :  { %v6243_v36 = vadd.f32 %v1943_v35, %v1843_v47  ;;  %2434 = vmatmul.f32.gmra.mxu2 %v6170_v55  ;;  %v1570_v47 = vadd.f32 %v1569_v48, %v5708_v41  ;;  %v6264_v55 = vsub.f32 %v3794_v14, %v3794_v14  ;;  %v6270_v41 = vsub.f32 %v2004_v57, %v6249_v10 }
 0x1fe   :  { %v1947_v13 = vpop.f32.mrf.mxu3  ;;  %3974 = vmatpush.msk.msrb.mxu1 %vm203_vm11, %v7366_v51  ;;  %3958 = vmatpush.msk.msra.mxu2 %vm203_vm11, %v7366_v51 }
 0x1ff   :  { %7416 = vst [vmem:[#allocation36_spill] sm:$0xff] %v6243_v36  ;;  %v1574_v35 = vpop.f32.mrf.mxu0  ;;  %v7179_v0 = vand.u32 4294901760, %v6264_v55  ;;  %3220 = vmatpush.msrb.mxu0 %v6264_v55  ;;  %v7449_v17 = vand.u32 4294901760, %v6264_v55 }
 0x200   :  { %v1695_v19 = vpop.f32.mrf.mxu1  ;;  %v1846_v45 = vpop.f32.mrf.mxu2  ;;  %3975 = vmatpush.msk.msrb.mxu1 %vm202_vm3, %v7366_v51  ;;  %3959 = vmatpush.msk.msra.mxu2 %vm202_vm3, %v7366_v51 }
 0x201   :  { %v1696_v15 = vadd.f32 %v1695_v19, %v1570_v47  ;;  %v3083_v14 = vsub.f32 %v6264_v55, %v7179_v0 }
 0x202   :  { %2113 = vmatmul.f32.gmra.mxu0 %v2112_v24  ;;  %v2120_v24 = vand.u32 4294901760, %v2119_v40  ;;  %3976 = vmatpush.msk.msrb.mxu1 %vm201_vm4, %v7366_v51 }
 0x203   :  { %v1847_v48 = vadd.f32 %v1846_v45, %v1696_v15  ;;  %2310 = vmatmul.f32.gmra.mxu1 %v6152_v33  ;;  %2565 = vmatmul.f32.gmra.mxu3 %v2110_v18  ;;  %v3084_v19 = vand.u32 4294901760, %v3083_v14  ;;  %v2126_v15 = vand.u32 4294901760, %v6270_v41  ;;  %v6282_v45 = vand.u32 4294901760, %v2006_v21  ;;  %v7433_v33 = vld [vmem:[#allocation39_spill] sm:$0xff] }
 0x204   :  { %v3793_v18 = vsel %vm203_vm11, 1.0, %v7330_v6  ;;  %3960 = vmatpush.msk.msra.mxu2 %vm201_vm4, %v7366_v51  ;;  %vm199_vm7 = vcmp.eq.s32.totalorder %v7433_v33, %v5810_v32 }
 0x205   :  { %v6276_v47 = vadd.f32 %v1947_v13, %v1847_v48  ;;  %2439 = vmatmul.f32.gmra.mxu2 %v6207_v59  ;;  %7421 = vst [vmem:[#allocation44_spill] sm:$0xff] %v6282_v45  ;;  %v7422_v13 = vld [vmem:[#allocation20_spill] sm:$0xff]  ;;  %3085 = vmatpush.msra.mxu3 %v3084_v19  ;;  %v6297_v59 = vsub.f32 %v3793_v18, %v3793_v18 }
 0x206   :  { %v1951_v57 = vpop.f32.mrf.mxu3  ;;  %v1575_v48 = vadd.f32 %v1574_v35, %v7422_v13  ;;  %v2127_v36 = vsub.f32 %v6270_v41, %v2126_v15  ;;  %v6303_v35 = vsub.f32 %v2006_v21, %v6282_v45  ;;  %v2008_v13 = vld [vmem:[#allocation4 + $0xb0] sm:$0xff] }
 0x207   :  { %7419 = vst [vmem:[#allocation45_spill] sm:$0xff] %v6276_v47  ;;  %v1579_v14 = vpop.f32.mrf.mxu0  ;;  %v7181_v47 = vand.u32 4294901760, %v6297_v59  ;;  %3223 = vmatpush.msrb.mxu0 %v6297_v59 }
 0x208   :  { %v1701_v40 = vpop.f32.mrf.mxu1  ;;  %v1850_v22 = vpop.f32.mrf.mxu2 }
 0x209   :  { %v1702_v0 = vadd.f32 %v1701_v40, %v1575_v48  ;;  %v3089_v18 = vsub.f32 %v6297_v59, %v7181_v47 }
 0x20a   :  { %2121 = vmatmul.f32.gmra.mxu0 %v2120_v24  ;;  %v2128_v24 = vand.u32 4294901760, %v2127_v36 }
 0x20b   :  { %v1851_v19 = vadd.f32 %v1850_v22, %v1702_v0  ;;  %2314 = vmatmul.f32.gmra.mxu1 %v6197_v52  ;;  %2571 = vmatmul.f32.gmra.mxu3 %v2118_v60  ;;  %v3090_v40 = vand.u32 4294901760, %v3089_v18  ;;  %v2134_v22 = vand.u32 4294901760, %v6303_v35  ;;  %v6315_v0 = vand.u32 4294901760, %v2008_v13 }
 0x20c   :  { %v3792_v60 = vsel %vm202_vm3, 1.0, %v7330_v6 }
 0x20d   :  { %v6309_v48 = vadd.f32 %v1951_v57, %v1851_v19  ;;  %2444 = vmatmul.f32.gmra.mxu2 %v6240_v7  ;;  %v7425_v57 = vld [vmem:[#allocation10_spill] sm:$0xff]  ;;  %3091 = vmatpush.msra.mxu3 %v3090_v40  ;;  %v6330_v36 = vsub.f32 %v3792_v60, %v3792_v60  ;;  %v2135_v54 = vsub.f32 %v6303_v35, %v2134_v22 }
 0x20e   :  { %v1955_v21 = vpop.f32.mrf.mxu3  ;;  %v1580_v19 = vadd.f32 %v1579_v14, %v7425_v57  ;;  %v6336_v14 = vsub.f32 %v2008_v13, %v6315_v0  ;;  %v2010_v57 = vld [vmem:[#allocation4 + $0xc0] sm:$0xff] }
 0x20f   :  { %7423 = vst [vmem:[#allocation9_spill] sm:$0xff] %v6309_v48  ;;  %v1584_v18 = vpop.f32.mrf.mxu0  ;;  %v7182_v63 = vand.u32 4294901760, %v6330_v36  ;;  %3226 = vmatpush.msrb.mxu0 %v6330_v36  ;;  %v7451_v1 = vand.u32 4294901760, %v6330_v36 }
 0x210   :  { %v1707_v7 = vpop.f32.mrf.mxu1  ;;  %v1854_v48 = vpop.f32.mrf.mxu2 }
 0x211   :  { %v1708_v47 = vadd.f32 %v1707_v7, %v1580_v19  ;;  %v3095_v60 = vsub.f32 %v6330_v36, %v7182_v63 }
 0x212   :  { %2129 = vmatmul.f32.gmra.mxu0 %v2128_v24  ;;  %v2136_v24 = vand.u32 4294901760, %v2135_v54 }
 0x213   :  { %v1855_v40 = vadd.f32 %v1854_v48, %v1708_v47  ;;  %2318 = vmatmul.f32.gmra.mxu1 %v6230_v28  ;;  %2577 = vmatmul.f32.gmra.mxu3 %v2126_v15  ;;  %v3096_v7 = vand.u32 4294901760, %v3095_v60  ;;  %v2142_v47 = vand.u32 4294901760, %v6336_v14  ;;  %v6348_v48 = vand.u32 4294901760, %v2010_v57  ;;  %v7430_v28 = vld [vmem:[#allocation38_spill] sm:$0xff] }
 0x214   :  { %v3791_v15 = vsel %vm201_vm4, 1.0, %v7330_v6  ;;  %vm200_vm6 = vcmp.eq.s32.totalorder %v7430_v28, %v5810_v32 }
 0x215   :  { %v6342_v19 = vadd.f32 %v1955_v21, %v1855_v40  ;;  %2449 = vmatmul.f32.gmra.mxu2 %v6270_v41  ;;  %v7428_v21 = vld [vmem:[#allocation12_spill] sm:$0xff]  ;;  %3097 = vmatpush.msra.mxu3 %v3096_v7  ;;  %v6363_v54 = vsub.f32 %v3791_v15, %v3791_v15  ;;  %v2143_v49 = vsub.f32 %v6336_v14, %v2142_v47 }
 0x216   :  { %v1959_v13 = vpop.f32.mrf.mxu3  ;;  %v1585_v40 = vadd.f32 %v1584_v18, %v7428_v21  ;;  %v6369_v18 = vsub.f32 %v2010_v57, %v6348_v48  ;;  %v2012_v21 = vld [vmem:[#allocation4 + $0xd0] sm:$0xff]  ;;  %3977 = vmatpush.msk.msrb.mxu1 %vm200_vm6, %v7366_v51  ;;  %3961 = vmatpush.msk.msra.mxu2 %vm200_vm6, %v7366_v51 }
 0x217   :  { %7426 = vst [vmem:[#allocation17_spill] sm:$0xff] %v6342_v19  ;;  %v1589_v60 = vpop.f32.mrf.mxu0  ;;  %v7185_v23 = vand.u32 4294901760, %v6363_v54  ;;  %3229 = vmatpush.msrb.mxu0 %v6363_v54  ;;  %v7453_v36 = vand.u32 4294901760, %v6363_v54 }
 0x218   :  { %v1713_v41 = vpop.f32.mrf.mxu1  ;;  %v1858_v19 = vpop.f32.mrf.mxu2  ;;  %3978 = vmatpush.msk.msrb.mxu1 %vm199_vm7, %v7366_v51  ;;  %3962 = vmatpush.msk.msra.mxu2 %vm199_vm7, %v7366_v51 }
 0x219   :  { %v1714_v63 = vadd.f32 %v1713_v41, %v1585_v40  ;;  %v3101_v15 = vsub.f32 %v6363_v54, %v7185_v23 }
 0x21a   :  { %2137 = vmatmul.f32.gmra.mxu0 %v2136_v24  ;;  %v2144_v24 = vand.u32 4294901760, %v2143_v49 }
 0x21b   :  { %v1859_v7 = vadd.f32 %v1858_v19, %v1714_v63  ;;  %2322 = vmatmul.f32.gmra.mxu1 %v6249_v10  ;;  %2583 = vmatmul.f32.gmra.mxu3 %v2134_v22  ;;  %v3102_v41 = vand.u32 4294901760, %v3101_v15  ;;  %v2150_v63 = vand.u32 4294901760, %v6369_v18  ;;  %v6381_v19 = vand.u32 4294901760, %v2012_v21 }
 0x21c   :  { %v3790_v22 = vsel %vm200_vm6, 1.0, %v7330_v6 }
 0x21d   :  { %v6375_v40 = vadd.f32 %v1959_v13, %v1859_v7  ;;  %2454 = vmatmul.f32.gmra.mxu2 %v6303_v35  ;;  %v7431_v13 = vld [vmem:[#allocation30_spill] sm:$0xff]  ;;  %3103 = vmatpush.msra.mxu3 %v3102_v41  ;;  %v6396_v49 = vsub.f32 %v3790_v22, %v3790_v22  ;;  %v2151_v52 = vsub.f32 %v6369_v18, %v2150_v63 }
 0x21e   :  { %v1963_v57 = vpop.f32.mrf.mxu3  ;;  %v1590_v7 = vadd.f32 %v1589_v60, %v7431_v13  ;;  %v6402_v60 = vsub.f32 %v2012_v21, %v6381_v19  ;;  %v2014_v13 = vld [vmem:[#allocation4 + $0xe0] sm:$0xff] }
 0x21f   :  { %7429 = vst [vmem:[#allocation18_spill] sm:$0xff] %v6375_v40  ;;  %v1594_v15 = vpop.f32.mrf.mxu0  ;;  %v7192_v10 = vand.u32 4294901760, %v6396_v49  ;;  %3232 = vmatpush.msrb.mxu0 %v6396_v49 }
 0x220   :  { %v1719_v35 = vpop.f32.mrf.mxu1  ;;  %v1862_v40 = vpop.f32.mrf.mxu2 }
 0x221   :  { %v1720_v23 = vadd.f32 %v1719_v35, %v1590_v7  ;;  %v3107_v22 = vsub.f32 %v6396_v49, %v7192_v10 }
 0x222   :  { %2145 = vmatmul.f32.gmra.mxu0 %v2144_v24  ;;  %v2152_v24 = vand.u32 4294901760, %v2151_v52 }
 0x223   :  { %v1863_v41 = vadd.f32 %v1862_v40, %v1720_v23  ;;  %2326 = vmatmul.f32.gmra.mxu1 %v6282_v45  ;;  %2589 = vmatmul.f32.gmra.mxu3 %v2142_v47  ;;  %v3108_v35 = vand.u32 4294901760, %v3107_v22  ;;  %v2158_v23 = vand.u32 4294901760, %v6402_v60  ;;  %v6414_v40 = vand.u32 4294901760, %v2014_v13 }
 0x224   :  { %v3789_v47 = vsel %vm199_vm7, 1.0, %v7330_v6 }
 0x225   :  { %v6408_v7 = vadd.f32 %v1963_v57, %v1863_v41  ;;  %2459 = vmatmul.f32.gmra.mxu2 %v6336_v14  ;;  %v7434_v57 = vld [vmem:[#allocation22_spill] sm:$0xff]  ;;  %3109 = vmatpush.msra.mxu3 %v3108_v35  ;;  %v6429_v52 = vsub.f32 %v3789_v47, %v3789_v47  ;;  %v2159_v44 = vsub.f32 %v6402_v60, %v2158_v23 }
 0x226   :  { %v1967_v21 = vpop.f32.mrf.mxu3  ;;  %v1595_v41 = vadd.f32 %v1594_v15, %v7434_v57  ;;  %v2165_v15 = vsub.f32 %v2014_v13, %v6414_v40  ;;  %v2016_v57 = vld [vmem:[#allocation4 + $0xf0] sm:$0xff] }
 0x227   :  { %7432 = vst [vmem:[#allocation46_spill] sm:$0xff] %v6408_v7  ;;  %v1599_v22 = vpop.f32.mrf.mxu0  ;;  %v7204_v45 = vand.u32 4294901760, %v6429_v52  ;;  %3235 = vmatpush.msrb.mxu0 %v6429_v52  ;;  %v2160_v16 = vand.u32 4294901760, %v2159_v44  ;;  %v6442_v3 = vand.u32 4294901760, %v2016_v57  ;;  %v7455_v62 = vand.u32 4294901760, %v6429_v52 }
 0x228   :  { %v1725_v14 = vpop.f32.mrf.mxu1  ;;  %v1866_v7 = vpop.f32.mrf.mxu2  ;;  %v2166_v26 = vand.u32 4294901760, %v2165_v15 }
 0x229   :  { %v1726_v10 = vadd.f32 %v1725_v14, %v1595_v41  ;;  %v3113_v47 = vsub.f32 %v6429_v52, %v7204_v45 }
 0x22a   :  { %2153 = vmatmul.f32.gmra.mxu0 %v2152_v24 }
 0x22b   :  { %v1867_v35 = vadd.f32 %v1866_v7, %v1726_v10  ;;  %2330 = vmatmul.f32.gmra.mxu1 %v6315_v0  ;;  %2595 = vmatmul.f32.gmra.mxu3 %v2150_v63  ;;  %v3114_v14 = vand.u32 4294901760, %v3113_v47  ;;  %v7436_v10 = vld [vmem:[#allocation40_spill] sm:$0xff]  ;;  %v1600_v63 = vadd.f32 %v1599_v22, %v5836_v46 }
 0x22c   :  { %vm198_vm0 = vcmp.eq.s32.totalorder %v7436_v10, %v5810_v32 }
 0x22d   :  { %v6439_v41 = vadd.f32 %v1967_v21, %v1867_v35  ;;  %2464 = vmatmul.f32.gmra.mxu2 %v6369_v18  ;;  %3115 = vmatpush.msra.mxu3 %v3114_v14  ;;  %v3788_v7 = vsel %vm198_vm0, 1.0, %v7330_v6  ;;  %v7437_v21 = vand.u32 4294901760, %v5858_v31  ;;  %v2167_v6 = vsub.f32 %v2165_v15, %v2166_v26  ;;  %v2018_v31 = vld [vmem:[#allocation4 + $0x100] sm:$0xff] }
 0x22e   :  { %v1971_v24 = vpop.f32.mrf.mxu3  ;;  %3963 = vmatpush.msk.msra.mxu2 %vm198_vm0, %v7366_v51  ;;  %v6455_v18 = vsub.f32 %v3788_v7, %v3788_v7  ;;  %3979 = vmatpush.msk.msrb.mxu1 %vm198_vm0, %v7366_v51  ;;  %v2173_v35 = vsub.f32 %v2016_v57, %v6442_v3  ;;  %v7438_v14 = vand.u32 4294901760, %v5904_v42 }
 0x22f   :  { %7435 = vst [vmem:[#allocation19_spill] sm:$0xff] %v6439_v41  ;;  %v1604_v13 = vpop.f32.mrf.mxu0  ;;  %v2168_v42 = vand.u32 4294901760, %v2167_v6 }
 0x230   :  { %v1731_v44 = vpop.f32.mrf.mxu1  ;;  %3463 = vmatpush.msrb.mxu2 %v7437_v21  ;;  %v1870_v22 = vpop.f32.mrf.mxu2  ;;  %v7203_v47 = vand.u32 4294901760, %v6455_v18  ;;  %3238 = vmatpush.msrb.mxu0 %v6455_v18  ;;  %v7456_v52 = vand.u32 4294901760, %v6455_v18 }
 0x231   :  { %v1732_v46 = vadd.f32 %v1731_v44, %v1600_v63  ;;  %v7439_v63 = vand.u32 4294901760, %v5957_v5  ;;  %v2174_v44 = vand.u32 4294901760, %v2173_v35 }
 0x232   :  { %2161 = vmatmul.f32.gmra.mxu0 %v2160_v16  ;;  %3467 = vmatpush.msrb.mxu2 %v7438_v14  ;;  %v3119_v21 = vsub.f32 %v6455_v18, %v7203_v47  ;;  %v7441_v47 = vand.u32 4294901760, %v6004_v9  ;;  %v7443_v9 = vand.u32 4294901760, %v6100_v2 }
 0x233   :  { %v1871_v7 = vadd.f32 %v1870_v22, %v1732_v46  ;;  %2334 = vmatmul.f32.gmra.mxu1 %v6348_v48  ;;  %2601 = vmatmul.f32.gmra.mxu3 %v2158_v23  ;;  %v6477_v46 = vand.u32 4294901760, %v2018_v31  ;;  %v1605_v22 = vadd.f32 %v1604_v13, %v5870_v38 }
 0x234   :  { %3471 = vmatpush.msrb.mxu2 %v7439_v63  ;;  %v3120_v23 = vand.u32 4294901760, %v3119_v21  ;;  %v7446_v21 = vand.u32 4294901760, %v6193_v34 }
 0x235   :  { %v6474_v16 = vadd.f32 %v1971_v24, %v1871_v7  ;;  %2469 = vmatmul.f32.gmra.mxu2 %v6402_v60  ;;  %v7442_v60 = vand.u32 4294901760, %v6050_v12  ;;  %v2175_v24 = vsub.f32 %v2173_v35, %v2174_v44  ;;  %v2181_v38 = vsub.f32 %v2018_v31, %v6477_v46  ;;  %v1987_v7 = vld [vmem:[#allocation4 + $0x8] sm:$0xff] }
 0x236   :  { %v1975_v57 = vpop.f32.mrf.mxu3  ;;  %3475 = vmatpush.msrb.mxu2 %v7441_v47  ;;  %3121 = vmatpush.msra.mxu3 %v3120_v23  ;;  %v1989_v23 = vld [vmem:[#allocation4 + $0x18] sm:$0xff] }
 0x237   :  { %7440 = vst [vmem:[#allocation21_spill] sm:$0xff] %v6474_v16  ;;  %v1609_v14 = vpop.f32.mrf.mxu0  ;;  %v2176_v12 = vand.u32 4294901760, %v2175_v24  ;;  %v2182_v47 = vand.u32 4294901760, %v2181_v38  ;;  %v1991_v24 = vld [vmem:[#allocation4 + $0x28] sm:$0xff] }
 0x238   :  { %v1737_v5 = vpop.f32.mrf.mxu1  ;;  %v1874_v45 = vpop.f32.mrf.mxu2  ;;  %3980 = vmatpush.msk.msrb.mxu3 %vm213_vm8, %v7366_v51  ;;  %3479 = vmatpush.msrb.mxu2 %v7442_v60 }
 0x239   :  { %v1738_v63 = vadd.f32 %v1737_v5, %v1605_v22  ;;  %v2183_v4 = vsub.f32 %v2181_v38, %v2182_v47  ;;  %v7450_v5 = vand.u32 4294901760, %v6297_v59 }
 0x23a   :  { %2169 = vmatmul.f32.gmra.mxu0 %v2168_v42  ;;  %3981 = vmatpush.msk.msrb.mxu3 %vm212_vm12, %v7366_v51  ;;  %v6511_v42 = vand.u32 4294901760, %v1987_v7 }
 0x23b   :  { %v1875_v13 = vadd.f32 %v1874_v45, %v1738_v63  ;;  %2338 = vmatmul.f32.gmra.mxu1 %v6381_v19  ;;  %2607 = vmatmul.f32.gmra.mxu3 %v2166_v26  ;;  %v1610_v26 = vadd.f32 %v1609_v14, %v5914_v8  ;;  %v2184_v34 = vand.u32 4294901760, %v2183_v4 }
 0x23c   :  { %3483 = vmatpush.msrb.mxu2 %v7443_v9  ;;  %3982 = vmatpush.msk.msrb.mxu3 %vm211_vm13, %v7366_v51  ;;  %v6527_v20 = vsub.f32 %v1987_v7, %v6511_v42  ;;  %v1993_v7 = vld [vmem:[#allocation4 + $0x38] sm:$0xff] }
 0x23d   :  { %v6496_v29 = vadd.f32 %v1975_v57, %v1875_v13  ;;  %2474 = vmatmul.f32.gmra.mxu2 %v2165_v15  ;;  %v6612_v33 = vand.u32 4294901760, %v1993_v7 }
 0x23e   :  { %v1979_v6 = vpop.f32.mrf.mxu3  ;;  %3487 = vmatpush.msrb.mxu2 %v7445_v61  ;;  %3983 = vmatpush.msk.msrb.mxu3 %vm210_vm14, %v7366_v51  ;;  %v7215_v53 = vand.u32 4294901760, %v6527_v20 }
 0x23f   :  { %7444 = vst [vmem:[#allocation23_spill] sm:$0xff] %v6496_v29  ;;  %v1614_v45 = vpop.f32.mrf.mxu0 }
 0x240   :  { %v1743_v2 = vpop.f32.mrf.mxu1  ;;  %v1878_v31 = vpop.f32.mrf.mxu2  ;;  %3491 = vmatpush.msrb.mxu2 %v7446_v21  ;;  %3984 = vmatpush.msk.msrb.mxu3 %vm209_vm15, %v7366_v51  ;;  %v2892_v27 = vsub.f32 %v6527_v20, %v7215_v53 }
 0x241   :  { %v1744_v15 = vadd.f32 %v1743_v2, %v1610_v26 }
 0x242   :  { %2177 = vmatmul.f32.gmra.mxu0 %v2176_v12  ;;  %3985 = vmatpush.msk.msrb.mxu3 %vm208_vm1, %v7366_v51  ;;  %v7454_v12 = vand.u32 4294901760, %v6396_v49  ;;  %v2893_v25 = vand.u32 4294901760, %v2892_v27 }
 0x243   :  { %v1879_v8 = vadd.f32 %v1878_v31, %v1744_v15  ;;  %2342 = vmatmul.f32.gmra.mxu1 %v6414_v40  ;;  %2613 = vmatmul.f32.gmra.mxu3 %v2174_v44  ;;  %v1615_v44 = vadd.f32 %v1614_v45, %v5963_v50  ;;  %v6543_v50 = vand.u32 4294901760, %v1989_v23 }
 0x244   :  { %3495 = vmatpush.msrb.mxu2 %v7447_v11  ;;  %3986 = vmatpush.msk.msrb.mxu3 %vm207_vm2, %v7366_v51  ;;  %v1995_v11 = vld [vmem:[#allocation4 + $0x48] sm:$0xff] }
 0x245   :  { %v6524_v58 = vadd.f32 %v1979_v6, %v1879_v8  ;;  %2479 = vmatmul.f32.gmra.mxu2 %v2173_v35  ;;  %v6562_v60 = vsub.f32 %v1989_v23, %v6543_v50 }
 0x246   :  { %v1983_v57 = vpop.f32.mrf.mxu3  ;;  %3499 = vmatpush.msrb.mxu2 %v7449_v17  ;;  %3987 = vmatpush.msk.msrb.mxu3 %vm206_vm5, %v7366_v51  ;;  %v6626_v17 = vand.u32 4294901760, %v1995_v11 }
 0x247   :  { %7448 = vst [vmem:[#allocation25_spill] sm:$0xff] %v6524_v58  ;;  %v2058_v39 = vpop.f32.mrf.mxu0  ;;  %v7214_v6 = vand.u32 4294901760, %v6562_v60 }
 0x248   :  { %v1749_v22 = vpop.f32.mrf.mxu1  ;;  %v1882_v14 = vpop.f32.mrf.mxu2  ;;  %3503 = vmatpush.msrb.mxu2 %v7450_v5  ;;  %3988 = vmatpush.msk.msrb.mxu3 %vm205_vm9, %v7366_v51 }
 0x249   :  { %v1750_v35 = vadd.f32 %v1749_v22, %v1615_v44  ;;  %v2900_v30 = vsub.f32 %v6562_v60, %v7214_v6 }
 0x24a   :  { %2185 = vmatmul.f32.gmra.mxu0 %v2184_v34  ;;  %3989 = vmatpush.msk.msrb.mxu3 %vm204_vm10, %v7366_v51 }
 0x24b   :  { %v1883_v55 = vadd.f32 %v1882_v14, %v1750_v35  ;;  %2346 = vmatmul.f32.gmra.mxu1 %v6442_v3  ;;  %2619 = vmatmul.f32.gmra.mxu3 %v2182_v47  ;;  %v6578_v47 = vand.u32 4294901760, %v1991_v24  ;;  %v2901_v31 = vand.u32 4294901760, %v2900_v30  ;;  %v1999_v30 = vld [vmem:[#allocation4 + $0x68] sm:$0xff] }
 0x24c   :  { %3507 = vmatpush.msrb.mxu2 %v7451_v1  ;;  %3990 = vmatpush.msk.msrb.mxu3 %vm203_vm11, %v7366_v51 }
 0x24d   :  { %v6556_v59 = vadd.f32 %v1983_v57, %v1883_v55  ;;  %2484 = vmatmul.f32.gmra.mxu2 %v2181_v38  ;;  %v6598_v45 = vsub.f32 %v1991_v24, %v6578_v47  ;;  %v6636_v55 = vsub.f32 %v1995_v11, %v6626_v17 }
 0x24e   :  { %v2524_v63 = vpop.f32.mrf.mxu3  ;;  %3511 = vmatpush.msrb.mxu2 %v7453_v36  ;;  %3991 = vmatpush.msk.msrb.mxu3 %vm202_vm3, %v7366_v51  ;;  %v7458_v36 = vld [vmem:[#allocation41_spill] sm:$0xff] }
 0x24f   :  { %7452 = vst [vmem:[#allocation27_spill] sm:$0xff] %v6556_v59  ;;  %v2066_v37 = vpop.f32.mrf.mxu0  ;;  %v7213_v21 = vand.u32 4294901760, %v6598_v45 }
 0x250   :  { %v2287_v13 = vpop.f32.mrf.mxu1  ;;  %v2405_v9 = vpop.f32.mrf.mxu2  ;;  %3515 = vmatpush.msrb.mxu2 %v7454_v12  ;;  %3992 = vmatpush.msk.msrb.mxu3 %vm201_vm4, %v7366_v51 }
 0x251   :  { %v2288_v38 = vadd.f32 %v2287_v13, %v2058_v39  ;;  %v2908_v32 = vsub.f32 %v6598_v45, %v7213_v21  ;;  %v7457_v39 = vld [vmem:[#allocation11_spill] sm:$0xff]  ;;  %v7210_v13 = vand.u32 4294901760, %v6636_v55  ;;  %v2013_v21 = vld [vmem:[#allocation4 + $0xd8] sm:$0xff] }
 0x252   :  { %2688 = vmatmul.f32.vlgmr.msra.gmra.mxu0 %v5873_v56  ;;  %3993 = vmatpush.msk.msrb.mxu3 %vm200_vm6, %v7366_v51 }
 0x253   :  { %v2406_v54 = vadd.f32 %v2405_v9, %v2288_v38  ;;  %2350 = vmatmul.f32.gmra.mxu1 %v6477_v46  ;;  %3123 = vmatmul.f32.vlgmr.msra.gmra.mxu3 %v6511_v42 }
 0x254   :  { %3519 = vmatpush.msrb.mxu2 %v7455_v62  ;;  %3994 = vmatpush.msk.msrb.mxu3 %vm199_vm7, %v7366_v51 }
 0x255   :  { %v6592_v49 = vadd.f32 %v2524_v63, %v2406_v54  ;;  %2894 = vmatmul.f32.vlgmr.msra.gmra.mxu2 %v2893_v25  ;;  %v1997_v63 = vld [vmem:[#allocation4 + $0x58] sm:$0xff]  ;;  %v2924_v54 = vsub.f32 %v6636_v55, %v7210_v13 }
 0x256   :  { %v2530_v26 = vpop.f32.mrf.mxu3  ;;  %3523 = vmatpush.msrb.mxu2 %v7456_v52  ;;  %3995 = vmatpush.msk.msrb.mxu3 %vm198_vm0, %v7366_v51  ;;  %v6622_v51 = vsub.f32 %v1993_v7, %v6612_v33  ;;  %v6640_v38 = vand.u32 4294901760, %v1997_v63 }
 0x257   :  { %v2074_v28 = vpop.f32.mrf.mxu0 }
 0x258   :  { %v2291_v61 = vpop.f32.mrf.mxu1  ;;  %v2410_v15 = vpop.f32.mrf.mxu2  ;;  %v7211_v23 = vand.u32 4294901760, %v6622_v51  ;;  %v6650_v62 = vsub.f32 %v1997_v63, %v6640_v38 }
 0x259   :  { %v2292_v2 = vadd.f32 %v2291_v61, %v2066_v37  ;;  %v7459_v61 = vld [vmem:[#allocation24_spill] sm:$0xff] }
 0x25a   :  { %2692 = vmatmul.f32.gmra.mxu0 %v5921_v43  ;;  %v2916_v5 = vsub.f32 %v6622_v51, %v7211_v23 }
 0x25b   :  { %v2411_v4 = vadd.f32 %v2410_v15, %v2292_v2  ;;  %2789 = vmatmul.f32.vlgmr.msra.gmra.mxu1 %v5873_v56  ;;  %3127 = vmatmul.f32.gmra.mxu3 %v6543_v50  ;;  %v2909_v56 = vand.u32 4294901760, %v2908_v32  ;;  %v2925_v2 = vand.u32 4294901760, %v2924_v54  ;;  %v7209_v15 = vand.u32 4294901760, %v6650_v62 }
 0x25d   :  { %v6616_v18 = vadd.f32 %v2530_v26, %v2411_v4  ;;  %2902 = vmatmul.f32.gmra.mxu2 %v2901_v31  ;;  %v6654_v31 = vand.u32 4294901760, %v1999_v30 }
 0x25e   :  { %v2536_v8 = vpop.f32.mrf.mxu3 }
 0x25f   :  { %v2082_v10 = vpop.f32.mrf.mxu0  ;;  %v6664_v11 = vsub.f32 %v1999_v30, %v6654_v31  ;;  %v7461_v30 = vld [vmem:[#allocation15_spill] sm:$0xff] }
 0x260   :  { %v2295_v34 = vpop.f32.mrf.mxu1  ;;  %v2415_v44 = vpop.f32.mrf.mxu2 }
 0x261   :  { %v2296_v57 = vadd.f32 %v2295_v34, %v2074_v28 }
 0x262   :  { %2696 = vmatmul.f32.gmra.mxu0 %v7457_v39 }
 0x263   :  { %v2416_v22 = vadd.f32 %v2415_v44, %v2296_v57  ;;  %2793 = vmatmul.f32.gmra.mxu1 %v5921_v43  ;;  %3131 = vmatmul.f32.gmra.mxu3 %v6578_v47  ;;  %v2917_v43 = vand.u32 4294901760, %v2916_v5  ;;  %v2001_v57 = vld [vmem:[#allocation4 + $0x78] sm:$0xff]  ;;  %v7207_v5 = vand.u32 4294901760, %v6664_v11 }
 0x265   :  { %v6630_v35 = vadd.f32 %v2536_v8, %v2416_v22  ;;  %2910 = vmatmul.f32.gmra.mxu2 %v2909_v56  ;;  %v7460_v22 = vld [vmem:[#allocation32_spill] sm:$0xff] }
 0x266   :  { %v2542_v14 = vpop.f32.mrf.mxu3 }
 0x267   :  { %v2090_v1 = vpop.f32.mrf.mxu0 }
 0x268   :  { %v2299_v27 = vpop.f32.mrf.mxu1  ;;  %v2420_v24 = vpop.f32.mrf.mxu2 }
 0x269   :  { %v2300_v37 = vadd.f32 %v2299_v27, %v2082_v10  ;;  %v2932_v10 = vsub.f32 %v6650_v62, %v7209_v15  ;;  %v2011_v15 = vld [vmem:[#allocation4 + $0xc8] sm:$0xff] }
 0x26a   :  { %2700 = vmatmul.f32.gmra.mxu0 %v7458_v36 }
 0x26b   :  { %v2421_v9 = vadd.f32 %v2420_v24, %v2300_v37  ;;  %2797 = vmatmul.f32.gmra.mxu1 %v7457_v39  ;;  %3135 = vmatmul.f32.gmra.mxu3 %v6612_v33  ;;  %v2940_v24 = vsub.f32 %v6664_v11, %v7207_v5 }
 0x26d   :  { %v6644_v12 = vadd.f32 %v2542_v14, %v2421_v9  ;;  %2918 = vmatmul.f32.gmra.mxu2 %v2917_v43  ;;  %v2933_v14 = vand.u32 4294901760, %v2932_v10  ;;  %v2003_v9 = vld [vmem:[#allocation4 + $0x88] sm:$0xff] }
 0x26e   :  { %v2548_v25 = vpop.f32.mrf.mxu3 }
 0x26f   :  { %v2098_v26 = vpop.f32.mrf.mxu0 }
 0x270   :  { %v2303_v28 = vpop.f32.mrf.mxu1  ;;  %v2425_v52 = vpop.f32.mrf.mxu2 }
 0x271   :  { %v2304_v7 = vadd.f32 %v2303_v28, %v2090_v1  ;;  %v6668_v1 = vand.u32 4294901760, %v2001_v57  ;;  %v2941_v28 = vand.u32 4294901760, %v2940_v24 }
 0x272   :  { %2704 = vmatmul.f32.gmra.mxu0 %v7459_v61 }
 0x273   :  { %v2426_v4 = vadd.f32 %v2425_v52, %v2304_v7  ;;  %2801 = vmatmul.f32.gmra.mxu1 %v7458_v36  ;;  %3139 = vmatmul.f32.gmra.mxu3 %v6626_v17  ;;  %v6678_v36 = vsub.f32 %v2001_v57, %v6668_v1  ;;  %v6682_v52 = vand.u32 4294901760, %v2003_v9  ;;  %v2005_v57 = vld [vmem:[#allocation4 + $0x98] sm:$0xff] }
 0x275   :  { %v6658_v8 = vadd.f32 %v2548_v25, %v2426_v4  ;;  %2926 = vmatmul.f32.gmra.mxu2 %v2925_v2  ;;  %v7206_v7 = vand.u32 4294901760, %v6678_v36  ;;  %v6692_v10 = vsub.f32 %v2003_v9, %v6682_v52 }
 0x276   :  { %v2554_v32 = vpop.f32.mrf.mxu3 }
 0x277   :  { %v2106_v34 = vpop.f32.mrf.mxu0 }
 0x278   :  { %v2307_v44 = vpop.f32.mrf.mxu1  ;;  %v2430_v56 = vpop.f32.mrf.mxu2 }
 0x279   :  { %v2308_v39 = vadd.f32 %v2307_v44, %v2098_v26 }
 0x27a   :  { %2708 = vmatmul.f32.gmra.mxu0 %v7460_v22 }
 0x27b   :  { %v2431_v63 = vadd.f32 %v2430_v56, %v2308_v39  ;;  %2805 = vmatmul.f32.gmra.mxu1 %v7459_v61  ;;  %3143 = vmatmul.f32.gmra.mxu3 %v6640_v38 }
 0x27d   :  { %v6672_v27 = vadd.f32 %v2554_v32, %v2431_v63  ;;  %2934 = vmatmul.f32.gmra.mxu2 %v2933_v14  ;;  %v2948_v32 = vsub.f32 %v6678_v36, %v7206_v7  ;;  %v7462_v14 = vld [vmem:[#allocation34_spill] sm:$0xff]  ;;  %v7205_v63 = vand.u32 4294901760, %v6692_v10 }
 0x27e   :  { %v2560_v37 = vpop.f32.mrf.mxu3 }
 0x27f   :  { %v2114_v43 = vpop.f32.mrf.mxu0 }
 0x280   :  { %v2311_v25 = vpop.f32.mrf.mxu1  ;;  %v2435_v26 = vpop.f32.mrf.mxu2 }
 0x281   :  { %v2312_v54 = vadd.f32 %v2311_v25, %v2106_v34 }
 0x282   :  { %2712 = vmatmul.f32.gmra.mxu0 %v7461_v30 }
 0x283   :  { %v2436_v61 = vadd.f32 %v2435_v26, %v2312_v54  ;;  %2809 = vmatmul.f32.gmra.mxu1 %v7460_v22  ;;  %3147 = vmatmul.f32.gmra.mxu3 %v6654_v31  ;;  %v2949_v22 = vand.u32 4294901760, %v2948_v32 }
 0x285   :  { %v6686_v2 = vadd.f32 %v2560_v37, %v2436_v61  ;;  %2942 = vmatmul.f32.gmra.mxu2 %v2941_v28  ;;  %v6696_v37 = vand.u32 4294901760, %v2005_v57  ;;  %v2007_v28 = vld [vmem:[#allocation4 + $0xa8] sm:$0xff] }
 0x286   :  { %v2566_v4 = vpop.f32.mrf.mxu3 }
 0x287   :  { %v2122_v34 = vpop.f32.mrf.mxu0  ;;  %v6706_v54 = vsub.f32 %v2005_v57, %v6696_v37 }
 0x288   :  { %v2315_v44 = vpop.f32.mrf.mxu1  ;;  %v2440_v56 = vpop.f32.mrf.mxu2 }
 0x289   :  { %v2316_v39 = vadd.f32 %v2315_v44, %v2114_v43  ;;  %v2956_v43 = vsub.f32 %v6692_v10, %v7205_v63  ;;  %v2009_v63 = vld [vmem:[#allocation4 + $0xb8] sm:$0xff] }
 0x28a   :  { %2716 = vmatmul.f32.gmra.mxu0 %v7462_v14 }
 0x28b   :  { %v2441_v24 = vadd.f32 %v2440_v56, %v2316_v39  ;;  %2813 = vmatmul.f32.gmra.mxu1 %v7461_v30  ;;  %3151 = vmatmul.f32.gmra.mxu3 %v6668_v1  ;;  %v7463_v39 = vld [vmem:[#allocation43_spill] sm:$0xff]  ;;  %v2957_v30 = vand.u32 4294901760, %v2956_v43  ;;  %v6710_v56 = vand.u32 4294901760, %v2007_v28 }
 0x28d   :  { %v6700_v25 = vadd.f32 %v2566_v4, %v2441_v24  ;;  %2950 = vmatmul.f32.gmra.mxu2 %v2949_v22  ;;  %v7208_v4 = vand.u32 4294901760, %v6706_v54 }
 0x28e   :  { %v2572_v9 = vpop.f32.mrf.mxu3 }
 0x28f   :  { %v2130_v26 = vpop.f32.mrf.mxu0 }
 0x290   :  { %v2319_v61 = vpop.f32.mrf.mxu1  ;;  %v2445_v44 = vpop.f32.mrf.mxu2 }
 0x291   :  { %v2320_v32 = vadd.f32 %v2319_v61, %v2122_v34  ;;  %v2964_v34 = vsub.f32 %v6706_v54, %v7208_v4  ;;  %v6720_v61 = vsub.f32 %v2007_v28, %v6710_v56 }
 0x292   :  { %2720 = vmatmul.f32.gmra.mxu0 %v7463_v39 }
 0x293   :  { %v2446_v22 = vadd.f32 %v2445_v44, %v2320_v32  ;;  %2817 = vmatmul.f32.gmra.mxu1 %v7462_v14  ;;  %3155 = vmatmul.f32.gmra.mxu3 %v6682_v52  ;;  %v7464_v44 = vld [vmem:[#allocation16_spill] sm:$0xff]  ;;  %v2965_v14 = vand.u32 4294901760, %v2964_v34 }
 0x295   :  { %v6714_v24 = vadd.f32 %v2572_v9, %v2446_v22  ;;  %2958 = vmatmul.f32.gmra.mxu2 %v2957_v30  ;;  %v7212_v9 = vand.u32 4294901760, %v6720_v61  ;;  %v6724_v22 = vand.u32 4294901760, %v2009_v63 }
 0x296   :  { %v2578_v57 = vpop.f32.mrf.mxu3 }
 0x297   :  { %v2138_v43 = vpop.f32.mrf.mxu0 }
 0x298   :  { %v2323_v7 = vpop.f32.mrf.mxu1  ;;  %v2450_v32 = vpop.f32.mrf.mxu2 }
 0x299   :  { %v2324_v5 = vadd.f32 %v2323_v7, %v2130_v26  ;;  %v2972_v7 = vsub.f32 %v6720_v61, %v7212_v9  ;;  %v6734_v26 = vsub.f32 %v2009_v63, %v6724_v22 }
 0x29a   :  { %2724 = vmatmul.f32.gmra.mxu0 %v7464_v44 }
 0x29b   :  { %v2451_v30 = vadd.f32 %v2450_v32, %v2324_v5  ;;  %2821 = vmatmul.f32.gmra.mxu1 %v7463_v39  ;;  %3159 = vmatmul.f32.gmra.mxu3 %v6696_v37  ;;  %v7465_v32 = vld [vmem:[#allocation44_spill] sm:$0xff]  ;;  %v2973_v39 = vand.u32 4294901760, %v2972_v7 }
 0x29d   :  { %v6728_v4 = vadd.f32 %v2578_v57, %v2451_v30  ;;  %2966 = vmatmul.f32.gmra.mxu2 %v2965_v14  ;;  %v7216_v57 = vand.u32 4294901760, %v6734_v26  ;;  %v6738_v30 = vand.u32 4294901760, %v2011_v15 }
 0x29e   :  { %v2584_v28 = vpop.f32.mrf.mxu3 }
 0x29f   :  { %v2146_v34 = vpop.f32.mrf.mxu0 }
 0x2a0   :  { %v2327_v13 = vpop.f32.mrf.mxu1  ;;  %v2455_v5 = vpop.f32.mrf.mxu2 }
 0x2a1   :  { %v2328_v23 = vadd.f32 %v2327_v13, %v2138_v43  ;;  %v2980_v13 = vsub.f32 %v6734_v26, %v7216_v57  ;;  %v6748_v43 = vsub.f32 %v2011_v15, %v6738_v30  ;;  %v2015_v57 = vld [vmem:[#allocation4 + $0xe8] sm:$0xff] }
 0x2a2   :  { %2728 = vmatmul.f32.gmra.mxu0 %v7465_v32 }
 0x2a3   :  { %v2456_v14 = vadd.f32 %v2455_v5, %v2328_v23  ;;  %2825 = vmatmul.f32.gmra.mxu1 %v7464_v44  ;;  %3163 = vmatmul.f32.gmra.mxu3 %v6710_v56  ;;  %v2981_v44 = vand.u32 4294901760, %v2980_v13  ;;  %v6752_v5 = vand.u32 4294901760, %v2013_v21 }
 0x2a5   :  { %v6742_v9 = vadd.f32 %v2584_v28, %v2456_v14  ;;  %2974 = vmatmul.f32.gmra.mxu2 %v2973_v39  ;;  %v7217_v28 = vand.u32 4294901760, %v6748_v43  ;;  %7466 = vst [vmem:[#allocation29_spill] sm:$0xff] %v6752_v5 }
 0x2a6   :  { %v2590_v63 = vpop.f32.mrf.mxu3 }
 0x2a7   :  { %v2154_v7 = vpop.f32.mrf.mxu0 }
 0x2a8   :  { %v2331_v6 = vpop.f32.mrf.mxu1  ;;  %v2460_v23 = vpop.f32.mrf.mxu2 }
 0x2a9   :  { %v2332_v53 = vadd.f32 %v2331_v6, %v2146_v34  ;;  %v2988_v6 = vsub.f32 %v6748_v43, %v7217_v28  ;;  %v6762_v34 = vsub.f32 %v2013_v21, %v6752_v5  ;;  %v2017_v28 = vld [vmem:[#allocation4 + $0xf8] sm:$0xff] }
 0x2aa   :  { %2732 = vmatmul.f32.gmra.mxu0 %v6315_v0 }
 0x2ab   :  { %v2461_v39 = vadd.f32 %v2460_v23, %v2332_v53  ;;  %2829 = vmatmul.f32.gmra.mxu1 %v7465_v32  ;;  %3167 = vmatmul.f32.gmra.mxu3 %v6724_v22  ;;  %7467 = vst [vmem:[#allocation31_spill] sm:$0xff] %v6762_v34  ;;  %v2989_v32 = vand.u32 4294901760, %v2988_v6  ;;  %v6766_v23 = vand.u32 4294901760, %v2015_v57 }
 0x2ad   :  { %v6756_v14 = vadd.f32 %v2590_v63, %v2461_v39  ;;  %2982 = vmatmul.f32.gmra.mxu2 %v2981_v44  ;;  %v7218_v63 = vand.u32 4294901760, %v6762_v34 }
 0x2ae   :  { %v2596_v15 = vpop.f32.mrf.mxu3 }
 0x2af   :  { %v2162_v13 = vpop.f32.mrf.mxu0 }
 0x2b0   :  { %v2335_v59 = vpop.f32.mrf.mxu1  ;;  %v2465_v53 = vpop.f32.mrf.mxu2 }
 0x2b1   :  { %v2336_v58 = vadd.f32 %v2335_v59, %v2154_v7  ;;  %v2996_v59 = vsub.f32 %v6762_v34, %v7218_v63  ;;  %v6776_v7 = vsub.f32 %v2015_v57, %v6766_v23  ;;  %v2019_v63 = vld [vmem:[#allocation4 + $0x108] sm:$0xff] }
 0x2b2   :  { %2736 = vmatmul.f32.gmra.mxu0 %v6348_v48 }
 0x2b3   :  { %v2466_v44 = vadd.f32 %v2465_v53, %v2336_v58  ;;  %2833 = vmatmul.f32.gmra.mxu1 %v6315_v0  ;;  %3171 = vmatmul.f32.gmra.mxu3 %v6738_v30  ;;  %7468 = vst [vmem:[#allocation33_spill] sm:$0xff] %v6776_v7  ;;  %v2997_v0 = vand.u32 4294901760, %v2996_v59  ;;  %v6780_v53 = vand.u32 4294901760, %v2017_v28 }
 0x2b5   :  { %v6770_v39 = vadd.f32 %v2596_v15, %v2466_v44  ;;  %2990 = vmatmul.f32.gmra.mxu2 %v2989_v32  ;;  %v7221_v15 = vand.u32 4294901760, %v6776_v7 }
 0x2b6   :  { %v2602_v21 = vpop.f32.mrf.mxu3 }
 0x2b7   :  { %v2170_v6 = vpop.f32.mrf.mxu0 }
 0x2b8   :  { %v2339_v29 = vpop.f32.mrf.mxu1  ;;  %v2470_v58 = vpop.f32.mrf.mxu2 }
 0x2b9   :  { %v2340_v16 = vadd.f32 %v2339_v29, %v2162_v13  ;;  %v3004_v29 = vsub.f32 %v6776_v7, %v7221_v15  ;;  %v6790_v13 = vsub.f32 %v2017_v28, %v6780_v53 }
 0x2ba   :  { %2740 = vmatmul.f32.gmra.mxu0 %v6381_v19 }
 0x2bb   :  { %v2471_v32 = vadd.f32 %v2470_v58, %v2340_v16  ;;  %2837 = vmatmul.f32.gmra.mxu1 %v6348_v48  ;;  %3175 = vmatmul.f32.gmra.mxu3 %v6752_v5  ;;  %v3005_v48 = vand.u32 4294901760, %v3004_v29  ;;  %v6794_v58 = vand.u32 4294901760, %v2019_v63 }
 0x2bd   :  { %v6784_v44 = vadd.f32 %v2602_v21, %v2471_v32  ;;  %2998 = vmatmul.f32.gmra.mxu2 %v2997_v0  ;;  %v7226_v21 = vand.u32 4294901760, %v6790_v13 }
 0x2be   :  { %v2608_v57 = vpop.f32.mrf.mxu3 }
 0x2bf   :  { %v2178_v59 = vpop.f32.mrf.mxu0 }
 0x2c0   :  { %v2343_v41 = vpop.f32.mrf.mxu1  ;;  %v2475_v16 = vpop.f32.mrf.mxu2 }
 0x2c1   :  { %v2344_v34 = vadd.f32 %v2343_v41, %v2170_v6  ;;  %v3012_v41 = vsub.f32 %v6790_v13, %v7226_v21  ;;  %v6804_v6 = vsub.f32 %v2019_v63, %v6794_v58 }
 0x2c2   :  { %2744 = vmatmul.f32.gmra.mxu0 %v6414_v40 }
 0x2c3   :  { %v2476_v0 = vadd.f32 %v2475_v16, %v2344_v34  ;;  %2841 = vmatmul.f32.gmra.mxu1 %v6381_v19  ;;  %3179 = vmatmul.f32.gmra.mxu3 %v6766_v23  ;;  %7469 = vst [vmem:[#allocation20_spill] sm:$0xff] %v6804_v6  ;;  %v3013_v19 = vand.u32 4294901760, %v3012_v41  ;;  %v7227_v34 = vand.u32 4294901760, %v6804_v6 }
 0x2c5   :  { %v6798_v32 = vadd.f32 %v2608_v57, %v2476_v0  ;;  %3006 = vmatmul.f32.gmra.mxu2 %v3005_v48  ;;  %v3020_v63 = vsub.f32 %v6804_v6, %v7227_v34 }
 0x2c6   :  { %v2614_v28 = vpop.f32.mrf.mxu3 }
 0x2c7   :  { %v2186_v29 = vpop.f32.mrf.mxu0  ;;  %v3021_v41 = vand.u32 4294901760, %v3020_v63 }
 0x2c8   :  { %v2347_v15 = vpop.f32.mrf.mxu1  ;;  %v2480_v5 = vpop.f32.mrf.mxu2 }
 0x2c9   :  { %v2348_v7 = vadd.f32 %v2347_v15, %v2178_v59 }
 0x2ca   :  { %2748 = vmatmul.f32.gmra.mxu0 %v6442_v3 }
 0x2cb   :  { %v2481_v57 = vadd.f32 %v2480_v5, %v2348_v7  ;;  %2845 = vmatmul.f32.gmra.mxu1 %v6414_v40  ;;  %3183 = vmatmul.f32.gmra.mxu3 %v6780_v53 }
 0x2cd   :  { %v6810_v16 = vadd.f32 %v2614_v28, %v2481_v57  ;;  %3014 = vmatmul.f32.gmra.mxu2 %v3013_v19 }
 0x2ce   :  { %v2620_v48 = vpop.f32.mrf.mxu3 }
 0x2cf   :  { %v2689_v15 = vpop.f32.mrf.mxu0 }
 0x2d0   :  { %v2351_v59 = vpop.f32.mrf.mxu1  ;;  %v2485_v21 = vpop.f32.mrf.mxu2  ;;  %v2690_v28 = vadd.f32 %v2689_v15, %v6592_v49 }
 0x2d1   :  { %v2352_v0 = vadd.f32 %v2351_v59, %v2186_v29 }
 0x2d2   :  { %2752 = vmatmul.f32.gmra.mxu0 %v6477_v46 }
 0x2d3   :  { %v2486_v5 = vadd.f32 %v2485_v21, %v2352_v0  ;;  %2849 = vmatmul.f32.gmra.mxu1 %v6442_v3  ;;  %3187 = vmatmul.f32.gmra.mxu3 %v6794_v58 }
 0x2d5   :  { %v6818_v40 = vadd.f32 %v2620_v48, %v2486_v5  ;;  %3022 = vmatmul.f32.gmra.mxu2 %v3021_v41 }
 0x2d6   :  { %v3124_v7 = vpop.f32.mrf.mxu3 }
 0x2d7   :  { %v2693_v19 = vpop.f32.mrf.mxu0 }
 0x2d8   :  { %v2790_v57 = vpop.f32.mrf.mxu1  ;;  %v2895_v6 = vpop.f32.mrf.mxu2  ;;  %v2694_v48 = vadd.f32 %v2693_v19, %v6616_v18  ;;  %v7471_v19 = vand.u32 4294901760, %v6562_v60 }
 0x2d9   :  { %v2791_v34 = vadd.f32 %v2790_v57, %v2690_v28 }
 0x2da   :  { %3241 = vmatmul.f32.vlgmr.msrb.gmra.mxu0 %v6527_v20 }
 0x2db   :  { %v2896_v29 = vadd.f32 %v2895_v6, %v2791_v34  ;;  %2853 = vmatmul.f32.gmra.mxu1 %v6477_v46  ;;  %3626 = vmatmul.f32.vlgmr.msrb.gmra.mxu3 %v6511_v42  ;;  %v7470_v6 = vand.u32 4294901760, %v6527_v20 }
 0x2dd   :  { %v6824_v3 = vadd.f32 %v3124_v7, %v2896_v29  ;;  %3525 = vmatmul.f32.vlgmr.msrb.gmra.mxu2 %v6511_v42 }
 0x2de   :  { %v3128_v21 = vpop.f32.mrf.mxu3 }
 0x2df   :  { %v2697_v63 = vpop.f32.mrf.mxu0 }
 0x2e0   :  { %v2794_v49 = vpop.f32.mrf.mxu1  ;;  %v2903_v59 = vpop.f32.mrf.mxu2  ;;  %v2698_v34 = vadd.f32 %v2697_v63, %v6630_v35 }
 0x2e1   :  { %v2795_v15 = vadd.f32 %v2794_v49, %v2694_v48  ;;  %v7472_v49 = vand.u32 4294901760, %v6598_v45 }
 0x2e2   :  { %3246 = vmatmul.f32.gmra.mxu0 %v6562_v60 }
 0x2e3   :  { %v2904_v0 = vadd.f32 %v2903_v59, %v2795_v15  ;;  %3360 = vmatmul.f32.vlgmr.msrb.gmra.mxu1 %v7470_v6  ;;  %3630 = vmatmul.f32.gmra.mxu3 %v6543_v50 }
 0x2e5   :  { %v6832_v46 = vadd.f32 %v3128_v21, %v2904_v0  ;;  %3529 = vmatmul.f32.gmra.mxu2 %v6543_v50 }
 0x2e6   :  { %v3132_v42 = vpop.f32.mrf.mxu3 }
 0x2e7   :  { %v2701_v18 = vpop.f32.mrf.mxu0 }
 0x2e8   :  { %v2798_v41 = vpop.f32.mrf.mxu1  ;;  %v2911_v7 = vpop.f32.mrf.mxu2  ;;  %v2702_v57 = vadd.f32 %v2701_v18, %v6644_v12 }
 0x2e9   :  { %v2799_v5 = vadd.f32 %v2798_v41, %v2698_v34  ;;  %v7473_v34 = vand.u32 4294901760, %v6622_v51 }
 0x2ea   :  { %3251 = vmatmul.f32.gmra.mxu0 %v6598_v45 }
 0x2eb   :  { %v2912_v28 = vadd.f32 %v2911_v7, %v2799_v5  ;;  %3366 = vmatmul.f32.gmra.mxu1 %v7471_v19  ;;  %3634 = vmatmul.f32.gmra.mxu3 %v6578_v47  ;;  %v7474_v19 = vand.u32 4294901760, %v6636_v55 }
 0x2ed   :  { %v6840_v20 = vadd.f32 %v3132_v42, %v2912_v28  ;;  %3533 = vmatmul.f32.gmra.mxu2 %v6578_v47 }
 0x2ee   :  { %v3136_v50 = vpop.f32.mrf.mxu3 }
 0x2ef   :  { %v2705_v35 = vpop.f32.mrf.mxu0 }
 0x2f0   :  { %v2802_v29 = vpop.f32.mrf.mxu1  ;;  %v2919_v48 = vpop.f32.mrf.mxu2  ;;  %v2706_v15 = vadd.f32 %v2705_v35, %v6658_v8 }
 0x2f1   :  { %v2803_v21 = vadd.f32 %v2802_v29, %v2702_v57 }
 0x2f2   :  { %3256 = vmatmul.f32.gmra.mxu0 %v6622_v51 }
 0x2f3   :  { %v2920_v63 = vadd.f32 %v2919_v48, %v2803_v21  ;;  %3372 = vmatmul.f32.gmra.mxu1 %v7472_v49  ;;  %3638 = vmatmul.f32.gmra.mxu3 %v6612_v33  ;;  %v7475_v48 = vand.u32 4294901760, %v6650_v62 }
 0x2f5   :  { %v6848_v60 = vadd.f32 %v3136_v50, %v2920_v63  ;;  %3537 = vmatmul.f32.gmra.mxu2 %v6612_v33 }
 0x2f6   :  { %v3140_v47 = vpop.f32.mrf.mxu3 }
 0x2f7   :  { %v2709_v12 = vpop.f32.mrf.mxu0 }
 0x2f8   :  { %v2806_v59 = vpop.f32.mrf.mxu1  ;;  %v2927_v6 = vpop.f32.mrf.mxu2  ;;  %v2710_v18 = vadd.f32 %v2709_v12, %v6672_v27 }
 0x2f9   :  { %v2807_v0 = vadd.f32 %v2806_v59, %v2706_v15  ;;  %v7476_v59 = vand.u32 4294901760, %v6664_v11 }
 0x2fa   :  { %3261 = vmatmul.f32.gmra.mxu0 %v6636_v55 }
 0x2fb   :  { %v2928_v42 = vadd.f32 %v2927_v6, %v2807_v0  ;;  %3378 = vmatmul.f32.gmra.mxu1 %v7473_v34  ;;  %3642 = vmatmul.f32.gmra.mxu3 %v6626_v17 }
 0x2fd   :  { %v6856_v45 = vadd.f32 %v3140_v47, %v2928_v42  ;;  %3541 = vmatmul.f32.gmra.mxu2 %v6626_v17 }
 0x2fe   :  { %v3144_v33 = vpop.f32.mrf.mxu3 }
 0x2ff   :  { %v2713_v8 = vpop.f32.mrf.mxu0 }
 0x300   :  { %v2810_v41 = vpop.f32.mrf.mxu1  ;;  %v2935_v7 = vpop.f32.mrf.mxu2  ;;  %v2714_v50 = vadd.f32 %v2713_v8, %v6686_v2 }
 0x301   :  { %v2811_v5 = vadd.f32 %v2810_v41, %v2710_v18  ;;  %v7477_v18 = vand.u32 4294901760, %v6678_v36 }
 0x302   :  { %3266 = vmatmul.f32.gmra.mxu0 %v6650_v62 }
 0x303   :  { %v2936_v28 = vadd.f32 %v2935_v7, %v2811_v5  ;;  %3384 = vmatmul.f32.gmra.mxu1 %v7474_v19  ;;  %3646 = vmatmul.f32.gmra.mxu3 %v6640_v38 }
 0x305   :  { %v6864_v51 = vadd.f32 %v3144_v33, %v2936_v28  ;;  %3545 = vmatmul.f32.gmra.mxu2 %v6640_v38 }
 0x306   :  { %v3148_v17 = vpop.f32.mrf.mxu3 }
 0x307   :  { %v2717_v27 = vpop.f32.mrf.mxu0 }
 0x308   :  { %v2814_v57 = vpop.f32.mrf.mxu1  ;;  %v2943_v29 = vpop.f32.mrf.mxu2  ;;  %v2718_v63 = vadd.f32 %v2717_v27, %v6700_v25 }
 0x309   :  { %v2815_v35 = vadd.f32 %v2814_v57, %v2714_v50 }
 0x30a   :  { %3271 = vmatmul.f32.gmra.mxu0 %v6664_v11 }
 0x30b   :  { %v2944_v21 = vadd.f32 %v2943_v29, %v2815_v35  ;;  %3390 = vmatmul.f32.gmra.mxu1 %v7475_v48  ;;  %3650 = vmatmul.f32.gmra.mxu3 %v6654_v31  ;;  %v7479_v29 = vand.u32 4294901760, %v6706_v54 }
 0x30d   :  { %v6872_v55 = vadd.f32 %v3148_v17, %v2944_v21  ;;  %3549 = vmatmul.f32.gmra.mxu2 %v6654_v31 }
 0x30e   :  { %v3152_v38 = vpop.f32.mrf.mxu3 }
 0x30f   :  { %v2721_v2 = vpop.f32.mrf.mxu0 }
 0x310   :  { %v2818_v49 = vpop.f32.mrf.mxu1  ;;  %v2951_v15 = vpop.f32.mrf.mxu2  ;;  %v2722_v0 = vadd.f32 %v2721_v2, %v6714_v24 }
 0x311   :  { %v2819_v47 = vadd.f32 %v2818_v49, %v2718_v63  ;;  %v7480_v49 = vand.u32 4294901760, %v6720_v61 }
 0x312   :  { %3276 = vmatmul.f32.gmra.mxu0 %v6678_v36  ;;  %v7478_v36 = vand.u32 4294901760, %v6692_v10 }
 0x313   :  { %v2952_v12 = vadd.f32 %v2951_v15, %v2819_v47  ;;  %3396 = vmatmul.f32.gmra.mxu1 %v7476_v59  ;;  %3654 = vmatmul.f32.gmra.mxu3 %v6668_v1 }
 0x315   :  { %v6880_v62 = vadd.f32 %v3152_v38, %v2952_v12  ;;  %3553 = vmatmul.f32.gmra.mxu2 %v6668_v1 }
 0x316   :  { %v3156_v31 = vpop.f32.mrf.mxu3 }
 0x317   :  { %v2725_v25 = vpop.f32.mrf.mxu0 }
 0x318   :  { %v2822_v6 = vpop.f32.mrf.mxu1  ;;  %v2959_v34 = vpop.f32.mrf.mxu2  ;;  %v2726_v8 = vadd.f32 %v2725_v25, %v6728_v4 }
 0x319   :  { %v2823_v42 = vadd.f32 %v2822_v6, %v2722_v0  ;;  %v7481_v0 = vand.u32 4294901760, %v6734_v26 }
 0x31a   :  { %3281 = vmatmul.f32.gmra.mxu0 %v6692_v10 }
 0x31b   :  { %v2960_v33 = vadd.f32 %v2959_v34, %v2823_v42  ;;  %3402 = vmatmul.f32.gmra.mxu1 %v7477_v18  ;;  %3658 = vmatmul.f32.gmra.mxu3 %v6682_v52 }
 0x31d   :  { %v6888_v11 = vadd.f32 %v3156_v31, %v2960_v33  ;;  %3557 = vmatmul.f32.gmra.mxu2 %v6682_v52  ;;  %v7482_v33 = vld [vmem:[#allocation31_spill] sm:$0xff] }
 0x31e   :  { %v3160_v1 = vpop.f32.mrf.mxu3 }
 0x31f   :  { %v2729_v24 = vpop.f32.mrf.mxu0 }
 0x320   :  { %v2730_v41 = vadd.f32 %v2729_v24, %v6742_v9  ;;  %v2826_v5 = vpop.f32.mrf.mxu1  ;;  %v2967_v28 = vpop.f32.mrf.mxu2 }
 0x321   :  { %v2827_v7 = vadd.f32 %v2826_v5, %v2726_v8 }
 0x322   :  { %3286 = vmatmul.f32.gmra.mxu0 %v6706_v54 }
 0x323   :  { %v2968_v19 = vadd.f32 %v2967_v28, %v2827_v7  ;;  %3408 = vmatmul.f32.gmra.mxu1 %v7478_v36  ;;  %3662 = vmatmul.f32.gmra.mxu3 %v6696_v37  ;;  %v7485_v28 = vld [vmem:[#allocation33_spill] sm:$0xff]  ;;  %v7486_v36 = vand.u32 4294901760, %v7482_v33 }
 0x325   :  { %v6897_v17 = vadd.f32 %v3160_v1, %v2968_v19  ;;  %3561 = vmatmul.f32.gmra.mxu2 %v6696_v37  ;;  %v7483_v1 = vand.u32 4294901760, %v6748_v43 }
 0x326   :  { %v3164_v52 = vpop.f32.mrf.mxu3 }
 0x327   :  { %v2733_v4 = vpop.f32.mrf.mxu0 }
 0x328   :  { %v2734_v50 = vadd.f32 %v2733_v4, %v6756_v14  ;;  %v2830_v9 = vpop.f32.mrf.mxu1  ;;  %v2975_v57 = vpop.f32.mrf.mxu2 }
 0x329   :  { %v2831_v27 = vadd.f32 %v2830_v9, %v2730_v41 }
 0x32a   :  { %3291 = vmatmul.f32.gmra.mxu0 %v6720_v61 }
 0x32b   :  { %v2976_v35 = vadd.f32 %v2975_v57, %v2831_v27  ;;  %3414 = vmatmul.f32.gmra.mxu1 %v7479_v29  ;;  %3666 = vmatmul.f32.gmra.mxu3 %v6710_v56 }
 0x32d   :  { %v6905_v10 = vadd.f32 %v3164_v52, %v2976_v35  ;;  %3565 = vmatmul.f32.gmra.mxu2 %v6710_v56  ;;  %v7487_v35 = vand.u32 4294901760, %v7485_v28 }
 0x32e   :  { %v3168_v37 = vpop.f32.mrf.mxu3 }
 0x32f   :  { %v2737_v21 = vpop.f32.mrf.mxu0 }
 0x330   :  { %v2738_v48 = vadd.f32 %v2737_v21, %v6770_v39  ;;  %v2834_v14 = vpop.f32.mrf.mxu1  ;;  %v2983_v63 = vpop.f32.mrf.mxu2 }
 0x331   :  { %v2835_v38 = vadd.f32 %v2834_v14, %v2734_v50 }
 0x332   :  { %3296 = vmatmul.f32.gmra.mxu0 %v6734_v26  ;;  %v7484_v26 = vld [vmem:[#allocation29_spill] sm:$0xff] }
 0x333   :  { %v2984_v2 = vadd.f32 %v2983_v63, %v2835_v38  ;;  %3420 = vmatmul.f32.gmra.mxu1 %v7480_v49  ;;  %3670 = vmatmul.f32.gmra.mxu3 %v6724_v22  ;;  %v7488_v38 = vld [vmem:[#allocation20_spill] sm:$0xff] }
 0x335   :  { %v6913_v54 = vadd.f32 %v3168_v37, %v2984_v2  ;;  %3569 = vmatmul.f32.gmra.mxu2 %v6724_v22  ;;  %v7489_v2 = vand.u32 4294901760, %v6790_v13 }
 0x336   :  { %v3172_v56 = vpop.f32.mrf.mxu3 }
 0x337   :  { %v2741_v47 = vpop.f32.mrf.mxu0 }
 0x338   :  { %v2742_v15 = vadd.f32 %v2741_v47, %v6784_v44  ;;  %v2838_v39 = vpop.f32.mrf.mxu1  ;;  %v2991_v59 = vpop.f32.mrf.mxu2 }
 0x339   :  { %v2839_v12 = vadd.f32 %v2838_v39, %v2738_v48 }
 0x33a   :  { %3301 = vmatmul.f32.gmra.mxu0 %v6748_v43 }
 0x33b   :  { %v2992_v31 = vadd.f32 %v2991_v59, %v2839_v12  ;;  %3426 = vmatmul.f32.gmra.mxu1 %v7481_v0  ;;  %3674 = vmatmul.f32.gmra.mxu3 %v6738_v30  ;;  %v7490_v59 = vand.u32 4294901760, %v7488_v38  ;;  %v7491_v0 = vld [vmem:[#allocation13_spill] sm:$0xff] }
 0x33d   :  { %v6921_v61 = vadd.f32 %v3172_v56, %v2992_v31  ;;  %3573 = vmatmul.f32.gmra.mxu2 %v6738_v30 }
 0x33e   :  { %v3176_v22 = vpop.f32.mrf.mxu3 }
 0x33f   :  { %v2745_v25 = vpop.f32.mrf.mxu0 }
 0x340   :  { %v2746_v6 = vadd.f32 %v2745_v25, %v6798_v32  ;;  %v2842_v44 = vpop.f32.mrf.mxu1  ;;  %v2999_v34 = vpop.f32.mrf.mxu2 }
 0x341   :  { %v2843_v42 = vadd.f32 %v2842_v44, %v2742_v15 }
 0x342   :  { %3306 = vmatmul.f32.gmra.mxu0 %v7482_v33 }
 0x343   :  { %v3000_v18 = vadd.f32 %v2999_v34, %v2843_v42  ;;  %3432 = vmatmul.f32.gmra.mxu1 %v7483_v1  ;;  %3678 = vmatmul.f32.gmra.mxu3 %v7484_v26 }
 0x345   :  { %v6929_v8 = vadd.f32 %v3176_v22, %v3000_v18  ;;  %3577 = vmatmul.f32.gmra.mxu2 %v7484_v26  ;;  %v7492_v18 = vld [vmem:[#allocation26_spill] sm:$0xff] }
 0x346   :  { %v3180_v30 = vpop.f32.mrf.mxu3 }
 0x347   :  { %v2749_v24 = vpop.f32.mrf.mxu0 }
 0x348   :  { %v2750_v41 = vadd.f32 %v2749_v24, %v6810_v16  ;;  %v2846_v32 = vpop.f32.mrf.mxu1  ;;  %v3007_v7 = vpop.f32.mrf.mxu2 }
 0x349   :  { %v2847_v5 = vadd.f32 %v2846_v32, %v2746_v6 }
 0x34a   :  { %3311 = vmatmul.f32.gmra.mxu0 %v7485_v28 }
 0x34b   :  { %v3008_v19 = vadd.f32 %v3007_v7, %v2847_v5  ;;  %3438 = vmatmul.f32.gmra.mxu1 %v7486_v36  ;;  %3682 = vmatmul.f32.gmra.mxu3 %v6766_v23  ;;  %v7493_v36 = vld [vmem:[#allocation14_spill] sm:$0xff] }
 0x34d   :  { %v6937_v43 = vadd.f32 %v3180_v30, %v3008_v19  ;;  %3581 = vmatmul.f32.gmra.mxu2 %v6766_v23 }
 0x34e   :  { %v3184_v52 = vpop.f32.mrf.mxu3 }
 0x34f   :  { %v2753_v4 = vpop.f32.mrf.mxu0 }
 0x350   :  { %v2754_v50 = vadd.f32 %v2753_v4, %v6818_v40  ;;  %v2850_v16 = vpop.f32.mrf.mxu1  ;;  %v3015_v27 = vpop.f32.mrf.mxu2 }
 0x351   :  { %v2851_v9 = vadd.f32 %v2850_v16, %v2750_v41 }
 0x352   :  { %3316 = vmatmul.f32.gmra.mxu0 %v6790_v13 }
 0x353   :  { %v3016_v57 = vadd.f32 %v3015_v27, %v2851_v9  ;;  %3444 = vmatmul.f32.gmra.mxu1 %v7487_v35  ;;  %3686 = vmatmul.f32.gmra.mxu3 %v6780_v53 }
 0x355   :  { %v6945_v29 = vadd.f32 %v3184_v52, %v3016_v57  ;;  %3585 = vmatmul.f32.gmra.mxu2 %v6780_v53 }
 0x356   :  { %v3188_v23 = vpop.f32.mrf.mxu3 }
 0x357   :  { %v3242_v37 = vpop.f32.mrf.mxu0 }
 0x358   :  { %v3243_v21 = vadd.f32 %v3242_v37, %v6824_v3  ;;  %v2854_v40 = vpop.f32.mrf.mxu1  ;;  %v3023_v14 = vpop.f32.mrf.mxu2 }
 0x359   :  { %v2855_v48 = vadd.f32 %v2854_v40, %v2754_v50 }
 0x35a   :  { %3321 = vmatmul.f32.gmra.mxu0 %v7488_v38 }
 0x35b   :  { %v3024_v63 = vadd.f32 %v3023_v14, %v2855_v48  ;;  %3450 = vmatmul.f32.gmra.mxu1 %v7489_v2  ;;  %3690 = vmatmul.f32.gmra.mxu3 %v6794_v58 }
 0x35d   :  { %v6953_v49 = vadd.f32 %v3188_v23, %v3024_v63  ;;  %3589 = vmatmul.f32.gmra.mxu2 %v6794_v58 }
 0x35e   :  { %v3627_v53 = vpop.f32.mrf.mxu3 }
 0x35f   :  { %v3247_v56 = vpop.f32.mrf.mxu0 }
 0x360   :  { %v3248_v47 = vadd.f32 %v3247_v56, %v6832_v46  ;;  %v3361_v3 = vpop.f32.mrf.mxu1  ;;  %v3526_v39 = vpop.f32.mrf.mxu2 }
 0x361   :  { %v3362_v15 = vadd.f32 %v3361_v3, %v3243_v21 }
 0x363   :  { %v3527_v12 = vadd.f32 %v3526_v39, %v3362_v15  ;;  %3456 = vmatmul.f32.gmra.mxu1 %v7490_v59 }
 0x365   :  { %v3628_v31 = vadd.f32 %v3627_v53, %v3527_v12 }
 0x366   :  { %v3631_v13 = vpop.f32.mrf.mxu3 }
 0x367   :  { %v3694_v22 = vmul.f32 %v3628_v31, %v7491_v0  ;;  %v3252_v25 = vpop.f32.mrf.mxu0 }
 0x368   :  { %v3253_v6 = vadd.f32 %v3252_v25, %v6840_v20  ;;  %v3367_v44 = vpop.f32.mrf.mxu1  ;;  %v3530_v42 = vpop.f32.mrf.mxu2 }
 0x369   :  { %v3368_v58 = vadd.f32 %v3367_v44, %v3248_v47 }
 0x36b   :  { %v3531_v34 = vadd.f32 %v3530_v42, %v3368_v58 }
 0x36d   :  { %v3632_v33 = vadd.f32 %v3631_v13, %v3531_v34 }
 0x36e   :  { %v3635_v46 = vpop.f32.mrf.mxu3 }
 0x36f   :  { %v3695_v1 = vmul.f32 %v3632_v33, %v7492_v18  ;;  %v3257_v26 = vpop.f32.mrf.mxu0 }
 0x370   :  { %v3258_v30 = vadd.f32 %v3257_v26, %v6848_v60  ;;  %v3373_v24 = vpop.f32.mrf.mxu1  ;;  %v3534_v5 = vpop.f32.mrf.mxu2  ;;  %v7494_v60 = vld [vmem:[#allocation28_spill] sm:$0xff] }
 0x371   :  { %v3711_v41 = vadd.f32 %v3695_v1, %v3694_v22  ;;  %v3374_v32 = vadd.f32 %v3373_v24, %v3253_v6  ;;  %v7497_v26 = vld [vmem:[#allocation36_spill] sm:$0xff] }
 0x373   :  { %v3535_v7 = vadd.f32 %v3534_v5, %v3374_v32 }
 0x375   :  { %v3636_v28 = vadd.f32 %v3635_v46, %v3535_v7 }
 0x376   :  { %v3639_v19 = vpop.f32.mrf.mxu3 }
 0x377   :  { %v3696_v20 = vmul.f32 %v3636_v28, %v7493_v36  ;;  %v3262_v52 = vpop.f32.mrf.mxu0 }
 0x378   :  { %v3263_v4 = vadd.f32 %v3262_v52, %v6856_v45  ;;  %v3379_v50 = vpop.f32.mrf.mxu1  ;;  %v3538_v27 = vpop.f32.mrf.mxu2  ;;  %v7495_v45 = vld [vmem:[#allocation42_spill] sm:$0xff] }
 0x379   :  { %v3712_v16 = vadd.f32 %v3711_v41, %v3696_v20  ;;  %v3380_v9 = vadd.f32 %v3379_v50, %v3258_v30  ;;  %v7498_v20 = vld [vmem:[#allocation45_spill] sm:$0xff] }
 0x37b   :  { %v3539_v57 = vadd.f32 %v3538_v27, %v3380_v9 }
 0x37d   :  { %v3640_v35 = vadd.f32 %v3639_v19, %v3539_v57 }
 0x37e   :  { %v3643_v23 = vpop.f32.mrf.mxu3 }
 0x37f   :  { %v3697_v37 = vmul.f32 %v3640_v35, %v7494_v60  ;;  %v3267_v21 = vpop.f32.mrf.mxu0  ;;  %v7499_v60 = vld [vmem:[#allocation9_spill] sm:$0xff] }
 0x380   :  { %v3268_v40 = vadd.f32 %v3267_v21, %v6864_v51  ;;  %v3385_v48 = vpop.f32.mrf.mxu1  ;;  %v3542_v63 = vpop.f32.mrf.mxu2  ;;  %v7496_v51 = vld [vmem:[#allocation8_spill] sm:$0xff] }
 0x381   :  { %v3713_v14 = vadd.f32 %v3712_v16, %v3697_v37  ;;  %v3386_v38 = vadd.f32 %v3385_v48, %v3263_v4 }
 0x383   :  { %v3543_v2 = vadd.f32 %v3542_v63, %v3386_v38 }
 0x385   :  { %v3644_v53 = vadd.f32 %v3643_v23, %v3543_v2 }
 0x386   :  { %v3647_v56 = vpop.f32.mrf.mxu3 }
 0x387   :  { %v3698_v47 = vmul.f32 %v3644_v53, %v7495_v45  ;;  %v3272_v3 = vpop.f32.mrf.mxu0 }
 0x388   :  { %v3391_v15 = vpop.f32.mrf.mxu1  ;;  %v3546_v59 = vpop.f32.mrf.mxu2  ;;  %v3273_v22 = vadd.f32 %v3272_v3, %v6872_v55 }
 0x389   :  { %v3714_v39 = vadd.f32 %v3713_v14, %v3698_v47  ;;  %v3392_v12 = vadd.f32 %v3391_v15, %v3268_v40 }
 0x38b   :  { %v3547_v31 = vadd.f32 %v3546_v59, %v3392_v12 }
 0x38d   :  { %v3648_v13 = vadd.f32 %v3647_v56, %v3547_v31  ;;  %v7500_v56 = vld [vmem:[#allocation17_spill] sm:$0xff] }
 0x38e   :  { %v3651_v0 = vpop.f32.mrf.mxu3 }
 0x38f   :  { %v3699_v25 = vmul.f32 %v3648_v13, %v7496_v51  ;;  %v3277_v6 = vpop.f32.mrf.mxu0 }
 0x390   :  { %v3397_v44 = vpop.f32.mrf.mxu1  ;;  %v3550_v34 = vpop.f32.mrf.mxu2  ;;  %v3278_v1 = vadd.f32 %v3277_v6, %v6880_v62 }
 0x391   :  { %v3715_v58 = vadd.f32 %v3714_v39, %v3699_v25  ;;  %v3398_v42 = vadd.f32 %v3397_v44, %v3273_v22 }
 0x393   :  { %v3551_v33 = vadd.f32 %v3550_v34, %v3398_v42 }
 0x395   :  { %v3652_v46 = vadd.f32 %v3651_v0, %v3551_v33  ;;  %v7501_v0 = vld [vmem:[#allocation18_spill] sm:$0xff] }
 0x396   :  { %v3655_v18 = vpop.f32.mrf.mxu3 }
 0x397   :  { %v3700_v30 = vmul.f32 %v3652_v46, %v7497_v26  ;;  %v3282_v24 = vpop.f32.mrf.mxu0  ;;  %v7502_v46 = vld [vmem:[#allocation46_spill] sm:$0xff] }
 0x398   :  { %v3403_v41 = vpop.f32.mrf.mxu1  ;;  %v3554_v7 = vpop.f32.mrf.mxu2  ;;  %v3283_v36 = vadd.f32 %v3282_v24, %v6888_v11 }
 0x399   :  { %v3716_v32 = vadd.f32 %v3715_v58, %v3700_v30  ;;  %v3404_v5 = vadd.f32 %v3403_v41, %v3278_v1 }
 0x39b   :  { %v3555_v55 = vadd.f32 %v3554_v7, %v3404_v5 }
 0x39d   :  { %v3656_v28 = vadd.f32 %v3655_v18, %v3555_v55  ;;  %v7503_v55 = vld [vmem:[#allocation19_spill] sm:$0xff] }
 0x39e   :  { %v3659_v19 = vpop.f32.mrf.mxu3 }
 0x39f   :  { %v3701_v52 = vmul.f32 %v3656_v28, %v7498_v20  ;;  %v3287_v4 = vpop.f32.mrf.mxu0 }
 0x3a0   :  { %v3409_v50 = vpop.f32.mrf.mxu1  ;;  %v3558_v27 = vpop.f32.mrf.mxu2  ;;  %v3288_v23 = vadd.f32 %v3287_v4, %v6897_v17 }
 0x3a1   :  { %v3717_v16 = vadd.f32 %v3716_v32, %v3701_v52  ;;  %v3410_v9 = vadd.f32 %v3409_v50, %v3283_v36 }
 0x3a3   :  { %v3559_v62 = vadd.f32 %v3558_v27, %v3410_v9  ;;  %v7504_v27 = vld [vmem:[#allocation21_spill] sm:$0xff] }
 0x3a5   :  { %v3660_v57 = vadd.f32 %v3659_v19, %v3559_v62 }
 0x3a6   :  { %v3663_v35 = vpop.f32.mrf.mxu3 }
 0x3a7   :  { %v3702_v37 = vmul.f32 %v3660_v57, %v7499_v60  ;;  %v3292_v21 = vpop.f32.mrf.mxu0 }
 0x3a8   :  { %v3415_v40 = vpop.f32.mrf.mxu1  ;;  %v3562_v38 = vpop.f32.mrf.mxu2  ;;  %v3293_v53 = vadd.f32 %v3292_v21, %v6905_v10 }
 0x3a9   :  { %v3718_v48 = vadd.f32 %v3717_v16, %v3702_v37  ;;  %v3416_v14 = vadd.f32 %v3415_v40, %v3288_v23 }
 0x3ab   :  { %v3563_v11 = vadd.f32 %v3562_v38, %v3416_v14 }
 0x3ad   :  { %v3664_v63 = vadd.f32 %v3663_v35, %v3563_v11 }
 0x3ae   :  { %v3667_v2 = vpop.f32.mrf.mxu3 }
 0x3af   :  { %v3703_v45 = vmul.f32 %v3664_v63, %v7500_v56  ;;  %v3297_v47 = vpop.f32.mrf.mxu0 }
 0x3b0   :  { %v3421_v3 = vpop.f32.mrf.mxu1  ;;  %v3566_v12 = vpop.f32.mrf.mxu2  ;;  %v3298_v13 = vadd.f32 %v3297_v47, %v6913_v54 }
 0x3b1   :  { %v3719_v15 = vadd.f32 %v3718_v48, %v3703_v45  ;;  %v3422_v39 = vadd.f32 %v3421_v3, %v3293_v53  ;;  %v7505_v48 = vld [vmem:[#allocation23_spill] sm:$0xff]  ;;  %v7506_v3 = vld [vmem:[#allocation25_spill] sm:$0xff] }
 0x3b3   :  { %v3567_v17 = vadd.f32 %v3566_v12, %v3422_v39 }
 0x3b5   :  { %v3668_v59 = vadd.f32 %v3667_v2, %v3567_v17 }
 0x3b6   :  { %v3671_v31 = vpop.f32.mrf.mxu3 }
 0x3b7   :  { %v3704_v22 = vmul.f32 %v3668_v59, %v7501_v0  ;;  %v3302_v51 = vpop.f32.mrf.mxu0  ;;  %v7507_v0 = vld [vmem:[#allocation27_spill] sm:$0xff] }
 0x3b8   :  { %v3427_v25 = vpop.f32.mrf.mxu1  ;;  %v3570_v58 = vpop.f32.mrf.mxu2  ;;  %v3303_v33 = vadd.f32 %v3302_v51, %v6921_v61 }
 0x3b9   :  { %v3720_v6 = vadd.f32 %v3719_v15, %v3704_v22  ;;  %v3428_v44 = vadd.f32 %v3427_v25, %v3298_v13 }
 0x3bb   :  { %v3571_v10 = vadd.f32 %v3570_v58, %v3428_v44 }
 0x3bd   :  { %v3672_v42 = vadd.f32 %v3671_v31, %v3571_v10 }
 0x3be   :  { %v3675_v34 = vpop.f32.mrf.mxu3 }
 0x3bf   :  { %v3705_v18 = vmul.f32 %v3672_v42, %v7502_v46  ;;  %v3307_v1 = vpop.f32.mrf.mxu0 }
 0x3c0   :  { %v3433_v26 = vpop.f32.mrf.mxu1  ;;  %v3574_v41 = vpop.f32.mrf.mxu2  ;;  %v3308_v7 = vadd.f32 %v3307_v1, %v6929_v8 }
 0x3c1   :  { %v3721_v30 = vadd.f32 %v3720_v6, %v3705_v18  ;;  %v3434_v24 = vadd.f32 %v3433_v26, %v3303_v33 }
 0x3c3   :  { %v3575_v54 = vadd.f32 %v3574_v41, %v3434_v24 }
 0x3c5   :  { %v3676_v32 = vadd.f32 %v3675_v34, %v3575_v54 }
 0x3c6   :  { %v3679_v5 = vpop.f32.mrf.mxu3 }
 0x3c7   :  { %v3706_v28 = vmul.f32 %v3676_v32, %v7503_v55  ;;  %v3312_v19 = vpop.f32.mrf.mxu0 }
 0x3c8   :  { %v3439_v36 = vpop.f32.mrf.mxu1  ;;  %v3578_v4 = vpop.f32.mrf.mxu2  ;;  %v3313_v9 = vadd.f32 %v3312_v19, %v6937_v43 }
 0x3c9   :  { %v3722_v20 = vadd.f32 %v3721_v30, %v3706_v28  ;;  %v3440_v52 = vadd.f32 %v3439_v36, %v3308_v7 }
 0x3cb   :  { %v3579_v61 = vadd.f32 %v3578_v4, %v3440_v52 }
 0x3cd   :  { %v3680_v50 = vadd.f32 %v3679_v5, %v3579_v61 }
 0x3ce   :  { %v3683_v16 = vpop.f32.mrf.mxu3 }
 0x3cf   :  { %v3707_v62 = vmul.f32 %v3680_v50, %v7504_v27  ;;  %v3317_v37 = vpop.f32.mrf.mxu0 }
 0x3d0   :  { %v3445_v57 = vpop.f32.mrf.mxu1  ;;  %v3582_v60 = vpop.f32.mrf.mxu2  ;;  %v3318_v40 = vadd.f32 %v3317_v37, %v6945_v29 }
 0x3d1   :  { %v3723_v35 = vadd.f32 %v3722_v20, %v3707_v62  ;;  %v3446_v23 = vadd.f32 %v3445_v57, %v3313_v9 }
 0x3d3   :  { %v3583_v8 = vadd.f32 %v3582_v60, %v3446_v23 }
 0x3d5   :  { %v3684_v21 = vadd.f32 %v3683_v16, %v3583_v8 }
 0x3d6   :  { %v3687_v11 = vpop.f32.mrf.mxu3 }
 0x3d7   :  { %v3708_v14 = vmul.f32 %v3684_v21, %v7505_v48  ;;  %v3322_v43 = vpop.f32.mrf.mxu0 }
 0x3d8   :  { %v3451_v38 = vpop.f32.mrf.mxu1  ;;  %v3586_v53 = vpop.f32.mrf.mxu2  ;;  %v3323_v47 = vadd.f32 %v3322_v43, %v6953_v49 }
 0x3d9   :  { %v3724_v63 = vadd.f32 %v3723_v35, %v3708_v14  ;;  %v3452_v2 = vadd.f32 %v3451_v38, %v3318_v40 }
 0x3db   :  { %v3587_v56 = vadd.f32 %v3586_v53, %v3452_v2 }
 0x3dd   :  { %v3688_v45 = vadd.f32 %v3687_v11, %v3587_v56 }
 0x3de   :  { %v3691_v31 = vpop.f32.mrf.mxu3 }
 0x3df   :  { %v3709_v15 = vmul.f32 %v3688_v45, %v7506_v3 }
 0x3e0   :  { %v3457_v39 = vpop.f32.mrf.mxu1  ;;  %v3590_v59 = vpop.f32.mrf.mxu2 }
 0x3e1   :  { %v3725_v12 = vadd.f32 %v3724_v63, %v3709_v15  ;;  %v3458_v17 = vadd.f32 %v3457_v39, %v3323_v47 }
 0x3e3   :  { %v3591_v29 = vadd.f32 %v3590_v59, %v3458_v17 }
 0x3e5   :  { %v3692_v13 = vadd.f32 %v3691_v31, %v3591_v29 }
 0x3e7   :  { %v3710_v22 = vmul.f32 %v3692_v13, %v7507_v0 }
 0x3e9   :  { %v3726_v51 = vadd.f32 %v3725_v12, %v3710_v22 }
 0x3eb   :  { %v3727_v25 = vrot.slane %v3726_v51, 4 }
 0x3ed   :  { %v3728_v6 = vadd.f32 %v3727_v25, %v3726_v51 }
 0x3ef   :  { %v3729_v44 = vrot.slane %v3728_v6, 2 }
 0x3f1   :  { %v3730_v58 = vadd.f32 %v3729_v44, %v3728_v6 }
 0x3f3   :  { %v3731_v10 = vrot.slane %v3730_v58, 1 }
 0x3f5   :  { %v3732_v42 = vadd.f32 %v3731_v10, %v3730_v58 }
 0x3f7   :  { %3733 = vst [vmem:[%s6998_s4] sm:$0x1] %v3732_v42 }
 0x3f8   :  { %3738 = vsyncpa [#allocation3], 1 }
 0x3f9   :  { %3739 = vsyncpa [#allocation5], 1 }

</bundles_post_ra>
